<compile_context>
chip_gen: v5e
topology: v5e:2x2
jax: 0.10.0
libtpu: 0.0.40
codegen_flags: <defaults>
</compile_context>

<pallas_src>
import jax
import jax.numpy as jnp
from jax.experimental import pallas as pl
from jax.experimental.pallas import tpu as pltpu

# ---- synthetic config (small but lane-dense) ----
N = 64           # batch size
C = 8            # number of image regions (100 in the real model)
F = 128          # img_feat_size (FRCN_FEAT_SIZE; 2048 in the real model)
Q = 32           # ques_att_feat_size (LSTM_OUT_SIZE * Q_GLIMPSES)
MFB_K = 4
MFB_O = 32
KO = MFB_K * MFB_O      # 128
HIDDEN = 16             # HIDDEN_SIZE
GLIMPSES = 2            # I_GLIMPSES

NB = 16                 # samples per grid step -> NB*C = 128 MXU rows, grid=(4,)
assert N % NB == 0

# MXU operand dtype (inputs/weights are pre-cast to this at the call boundary).
MXU_DTYPE = jnp.bfloat16


def iatt_kernel(img_ref, ques_ref, wi_ref, bi_ref, wq_ref, bq_ref, pool_ref,
                w1_ref, b1_ref, w2_ref, b2_ref, out_ref):
    img3 = img_ref[...]                          # (NB, C, F)  bf16
    img2 = img3.reshape(NB * C, F)               # all regions of the batch tile
    ques = ques_ref[...]                         # (NB, Q)     bf16

    # ---------------- MFB ----------------
    # proj_i / proj_q (nn.Linear, weights pre-transposed to (in, out)).
    # bf16 x bf16 on the MXU, f32 accumulation, f32 bias add.
    pi = jnp.dot(img2, wi_ref[...],
                 preferred_element_type=jnp.float32) + bi_ref[...]   # (NB*C, KO)
    pq = jnp.dot(ques, wq_ref[...],
                 preferred_element_type=jnp.float32) + bq_ref[...]   # (NB, KO)

    # exp_out[n, c, :] = pi[n, c, :] * pq[n, :]  (broadcast over regions), f32
    exp_out = pi.reshape(NB, C, KO) * pq[:, None, :]                 # (NB, C, KO)

    # AvgPool1d(K, stride=K) * K == group-sum over K consecutive lanes, done as
    # a matmul with a fixed 0/1 (KO, O) matrix, kept in f32 (exact).
    # TODO(synk): at production KO (=5000) replace with a grouped lane-sum.
    z = jnp.dot(exp_out.reshape(NB * C, KO), pool_ref[...],
                preferred_element_type=jnp.float32)                  # (NB*C, O)

    # signed square root (f32)
    z = jnp.sqrt(jnp.maximum(z, 0.0)) - jnp.sqrt(jnp.maximum(-z, 0.0))

    # F.normalize over the flattened (C * O) vector, per sample (L2, eps=1e-12)
    z3 = z.reshape(NB, C, MFB_O)
    ss = jnp.sum(jnp.sum(z3 * z3, axis=2, keepdims=True), axis=1, keepdims=True)
    z3 = z3 / jnp.maximum(jnp.sqrt(ss), 1e-12)
    zf = z3.reshape(NB * C, MFB_O)

    # ---------------- MLP (FC -> ReLU -> Linear) ----------------
    h = jnp.maximum(
        jnp.dot(zf.astype(MXU_DTYPE), w1_ref[...],
                preferred_element_type=jnp.float32) + b1_ref[...], 0.0)
    logits = jnp.dot(h.astype(MXU_DTYPE), w2_ref[...],
                     preferred_element_type=jnp.float32) + b2_ref[...]  # (NB*C, G)

    # softmax over the region axis (dim=1 of (N, C, G)), per sample, in f32.
    # (At production C=100, transpose logits to (NB, G, C) so the reduction
    #  runs over lanes instead of 2-lane-wide vregs.)
    lg = logits.reshape(NB, C, GLIMPSES)
    m = jnp.max(lg, axis=1, keepdims=True)
    e = jnp.exp(lg - m)
    att = e / jnp.sum(e, axis=1, keepdims=True)                         # (NB, C, G)

    # Attention-weighted sum over regions as ONE batched MXU contraction:
    # (NB, C, G) x (NB, C, F) -[contract C]-> (NB, G, F); lane-dense store.
    out_ref[...] = jnp.einsum("bcg,bcf->bgf", att.astype(MXU_DTYPE), img3,
                              preferred_element_type=jnp.float32)


def make_params(key):
    ks = jax.random.split(key, 8)
    s = 0.05
    wi = jax.random.normal(ks[0], (F, KO), jnp.float32) * s
    bi = jax.random.normal(ks[1], (1, KO), jnp.float32) * s
    wq = jax.random.normal(ks[2], (Q, KO), jnp.float32) * s
    bq = jax.random.normal(ks[3], (1, KO), jnp.float32) * s
    w1 = jax.random.normal(ks[4], (MFB_O, HIDDEN), jnp.float32) * s
    b1 = jax.random.normal(ks[5], (1, HIDDEN), jnp.float32) * s
    w2 = jax.random.normal(ks[6], (HIDDEN, GLIMPSES), jnp.float32) * s
    b2 = jax.random.normal(ks[7], (1, GLIMPSES), jnp.float32) * s
    # fixed sum-pooling matrix for AvgPool1d(K, stride=K) * K
    pool = (jnp.arange(KO)[:, None] // MFB_K ==
            jnp.arange(MFB_O)[None, :]).astype(jnp.float32)              # (KO, O)
    return dict(wi=wi, bi=bi, wq=wq, bq=bq, pool=pool, w1=w1, b1=b1, w2=w2, b2=b2)


def iatt_forward(img_feat, ques_att_feat, p):
    """img_feat: (N, C, F) bf16, ques_att_feat: (N, Q) bf16 -> (N, G*F) f32."""
    n_tiles = N // NB
    wspec = lambda r, c: pl.BlockSpec((r, c), lambda i: (0, 0))  # resident weights
    out = pl.pallas_call(
        iatt_kernel,
        out_shape=jax.ShapeDtypeStruct((N, GLIMPSES, F), jnp.float32),
        grid=(n_tiles,),
        in_specs=[
            pl.BlockSpec((NB, C, F), lambda i: (i, 0, 0)),       # img batch tile (bf16)
            pl.BlockSpec((NB, Q), lambda i: (i, 0)),             # ques tile      (bf16)
            wspec(F, KO),                                        # proj_i weight  (bf16)
            wspec(1, KO),                                        # proj_i bias    (f32)
            wspec(Q, KO),                                        # proj_q weight  (bf16)
            wspec(1, KO),                                        # proj_q bias    (f32)
            wspec(KO, MFB_O),                                    # 0/1 sum-pool   (f32)
            wspec(MFB_O, HIDDEN),                                # mlp fc weight  (bf16)
            wspec(1, HIDDEN),                                    # mlp fc bias    (f32)
            wspec(HIDDEN, GLIMPSES),                             # mlp out weight (bf16)
            wspec(1, GLIMPSES),                                  # mlp out bias   (f32)
        ],
        out_specs=pl.BlockSpec((NB, GLIMPSES, F), lambda i: (i, 0, 0)),
        compiler_params=pltpu.CompilerParams(
            dimension_semantics=("parallel",)),
    )(img_feat, ques_att_feat, p["wi"], p["bi"], p["wq"], p["bq"], p["pool"],
      p["w1"], p["b1"], p["w2"], p["b2"])
    # glimpse-major concat (torch.cat along dim=1) == reshape of (N, G, F)
    return out.reshape(N, GLIMPSES * F)


def iatt_reference(img_feat, ques_att_feat, p):
    """Pure-JAX f32 reference of the PyTorch forward (eval mode) over the same
    (bf16-rounded) inputs/weights that the kernel consumes."""
    hp = jax.lax.Precision.HIGHEST
    f32 = jnp.float32
    img = img_feat.astype(f32)
    ques = ques_att_feat.astype(f32)
    wi, wq = p["wi"].astype(f32), p["wq"].astype(f32)
    w1, w2 = p["w1"].astype(f32), p["w2"].astype(f32)

    pi = jnp.matmul(img, wi, precision=hp) + p["bi"]                   # (N, C, KO)
    pq = jnp.matmul(ques[:, None, :], wq, precision=hp) + p["bq"]      # (N, 1, KO)
    exp_out = pi * pq
    z = exp_out.reshape(N, C, MFB_O, MFB_K).sum(-1)                    # sum pool
    z = jnp.sqrt(jnp.maximum(z, 0.0)) - jnp.sqrt(jnp.maximum(-z, 0.0))
    flat = z.reshape(N, -1)
    flat = flat / jnp.maximum(
        jnp.linalg.norm(flat, axis=1, keepdims=True), 1e-12)
    z = flat.reshape(N, C, MFB_O)
    h = jnp.maximum(jnp.matmul(z, w1, precision=hp) + p["b1"], 0.0)
    logits = jnp.matmul(h, w2, precision=hp) + p["b2"]                 # (N, C, G)
    att = jax.nn.softmax(logits, axis=1)
    out = jnp.einsum("ncg,ncf->ngf", att, img, precision=hp)
    return out.reshape(N, GLIMPSES * F)                                # glimpse-major


if __name__ == "__main__":
    key = jax.random.PRNGKey(0)
    k_img, k_q, k_p = jax.random.split(key, 3)
    img_feat = jax.random.normal(k_img, (N, C, F), jnp.float32)
    ques_att_feat = jax.random.normal(k_q, (N, Q), jnp.float32)
    params = make_params(k_p)

    # bf16 at the pallas_call boundary (perf review): halves HBM traffic for
    # the big operands; f32 accumulation and f32 nonlinear math stay inside.
    img_in = img_feat.astype(MXU_DTYPE)
    ques_in = ques_att_feat.astype(MXU_DTYPE)
    p_in = dict(params)
    for name in ("wi", "wq", "w1", "w2"):
        p_in[name] = params[name].astype(MXU_DTYPE)

    out = iatt_forward(img_in, ques_in, p_in)
    out = jax.block_until_ready(out)

    ref = iatt_reference(img_in, ques_in, p_in)
    assert out.shape == (N, GLIMPSES * F)
    assert jnp.allclose(out, ref, atol=2e-2, rtol=2e-2), "mismatch vs reference"
    print("KERNEL_OK")
</pallas_src>

<mosaic_0001>
module attributes {stable_mosaic.version = 11 : i64} {
  func.func @iatt_kernel(%arg0: i32, %arg1: memref<16x8x128xbf16, #tpu.memory_space<vmem>>, %arg2: memref<16x32xbf16, #tpu.memory_space<vmem>>, %arg3: memref<128x128xbf16, #tpu.memory_space<vmem>>, %arg4: memref<1x128xf32, #tpu.memory_space<vmem>>, %arg5: memref<32x128xbf16, #tpu.memory_space<vmem>>, %arg6: memref<1x128xf32, #tpu.memory_space<vmem>>, %arg7: memref<128x32xf32, #tpu.memory_space<vmem>>, %arg8: memref<32x16xbf16, #tpu.memory_space<vmem>>, %arg9: memref<1x16xf32, #tpu.memory_space<vmem>>, %arg10: memref<16x2xbf16, #tpu.memory_space<vmem>>, %arg11: memref<1x2xf32, #tpu.memory_space<vmem>>, %arg12: memref<16x2x128xf32, #tpu.memory_space<vmem>>) attributes {dimension_semantics = [#tpu.dimension_semantics<parallel>], iteration_bounds = array<i64: 4>, scalar_prefetch = 0 : i64, scratch_operands = 0 : i64, tpu.core_type = #tpu.core_type<tc>, window_params = [{transform_indices = @transform_0, window_bounds = array<i64: 16, 8, 128>}, {transform_indices = @transform_1, window_bounds = array<i64: 16, 32>}, {pipeline_mode = #tpu.pipeline_mode<synchronous>, transform_indices = @transform_2, window_bounds = array<i64: 128, 128>}, {pipeline_mode = #tpu.pipeline_mode<synchronous>, transform_indices = @transform_3, window_bounds = array<i64: 1, 128>}, {pipeline_mode = #tpu.pipeline_mode<synchronous>, transform_indices = @transform_4, window_bounds = array<i64: 32, 128>}, {pipeline_mode = #tpu.pipeline_mode<synchronous>, transform_indices = @transform_5, window_bounds = array<i64: 1, 128>}, {pipeline_mode = #tpu.pipeline_mode<synchronous>, transform_indices = @transform_6, window_bounds = array<i64: 128, 32>}, {pipeline_mode = #tpu.pipeline_mode<synchronous>, transform_indices = @transform_7, window_bounds = array<i64: 32, 16>}, {pipeline_mode = #tpu.pipeline_mode<synchronous>, transform_indices = @transform_8, window_bounds = array<i64: 1, 16>}, {pipeline_mode = #tpu.pipeline_mode<synchronous>, transform_indices = @transform_9, window_bounds = array<i64: 16, 2>}, {pipeline_mode = #tpu.pipeline_mode<synchronous>, transform_indices = @transform_10, window_bounds = array<i64: 1, 2>}, {transform_indices = @transform_11, window_bounds = array<i64: 16, 2, 128>}]} {
    %c0 = arith.constant 0 : index
    %c0_0 = arith.constant 0 : index
    %c0_1 = arith.constant 0 : index
    %0 = vector.load %arg1[%c0, %c0_0, %c0_1] : memref<16x8x128xbf16, #tpu.memory_space<vmem>>, vector<16x8x128xbf16>
    %1 = vector.shape_cast %0 : vector<16x8x128xbf16> to vector<128x128xbf16>
    %c0_2 = arith.constant 0 : index
    %c0_3 = arith.constant 0 : index
    %2 = vector.load %arg2[%c0_2, %c0_3] : memref<16x32xbf16, #tpu.memory_space<vmem>>, vector<16x32xbf16>
    %c0_4 = arith.constant 0 : index
    %c0_5 = arith.constant 0 : index
    %3 = vector.load %arg3[%c0_4, %c0_5] : memref<128x128xbf16, #tpu.memory_space<vmem>>, vector<128x128xbf16>
    %cst = arith.constant dense<0.000000e+00> : vector<128x128xf32>
    %4 = tpu.matmul %1, %3, %cst {dimension_numbers = #tpu.dot_dimension_numbers<[1], [0], [0], [1], [0, 0, 1, 1], [], []>} : vector<128x128xbf16>, vector<128x128xbf16>, vector<128x128xf32> -> vector<128x128xf32>
    %c0_6 = arith.constant 0 : index
    %c0_7 = arith.constant 0 : index
    %5 = vector.load %arg4[%c0_6, %c0_7] : memref<1x128xf32, #tpu.memory_space<vmem>>, vector<1x128xf32>
    %6 = vector.broadcast %5 : vector<1x128xf32> to vector<128x128xf32>
    %7 = arith.addf %4, %6 : vector<128x128xf32>
    %c0_8 = arith.constant 0 : index
    %c0_9 = arith.constant 0 : index
    %8 = vector.load %arg5[%c0_8, %c0_9] : memref<32x128xbf16, #tpu.memory_space<vmem>>, vector<32x128xbf16>
    %cst_10 = arith.constant dense<0.000000e+00> : vector<16x128xf32>
    %9 = tpu.matmul %2, %8, %cst_10 {dimension_numbers = #tpu.dot_dimension_numbers<[1], [0], [0], [1], [0, 0, 1, 1], [], []>} : vector<16x32xbf16>, vector<32x128xbf16>, vector<16x128xf32> -> vector<16x128xf32>
    %c0_11 = arith.constant 0 : index
    %c0_12 = arith.constant 0 : index
    %10 = vector.load %arg6[%c0_11, %c0_12] : memref<1x128xf32, #tpu.memory_space<vmem>>, vector<1x128xf32>
    %11 = vector.broadcast %10 : vector<1x128xf32> to vector<16x128xf32>
    %12 = arith.addf %9, %11 : vector<16x128xf32>
    %13 = vector.shape_cast %7 : vector<128x128xf32> to vector<16x8x128xf32>
    %14 = vector.shape_cast %12 : vector<16x128xf32> to vector<16x1x128xf32>
    %15 = vector.broadcast %14 : vector<16x1x128xf32> to vector<16x8x128xf32>
    %16 = arith.mulf %13, %15 : vector<16x8x128xf32>
    %17 = vector.shape_cast %16 : vector<16x8x128xf32> to vector<128x128xf32>
    %c0_13 = arith.constant 0 : index
    %c0_14 = arith.constant 0 : index
    %18 = vector.load %arg7[%c0_13, %c0_14] : memref<128x32xf32, #tpu.memory_space<vmem>>, vector<128x32xf32>
    %cst_15 = arith.constant dense<0.000000e+00> : vector<128x32xf32>
    %19 = tpu.matmul %17, %18, %cst_15 {dimension_numbers = #tpu.dot_dimension_numbers<[1], [0], [0], [1], [0, 0, 1, 1], [], []>} : vector<128x128xf32>, vector<128x32xf32>, vector<128x32xf32> -> vector<128x32xf32>
    %cst_16 = arith.constant 0.000000e+00 : f32
    %20 = vector.broadcast %cst_16 : f32 to vector<128x32xf32>
    %21 = arith.maximumf %19, %20 : vector<128x32xf32>
    %22 = math.sqrt %21 : vector<128x32xf32>
    %cst_17 = arith.constant 0.000000e+00 : f32
    %23 = vector.broadcast %cst_17 : f32 to vector<128x32xf32>
    %24 = arith.subf %23, %19 : vector<128x32xf32>
    %cst_18 = arith.constant 0.000000e+00 : f32
    %25 = vector.broadcast %cst_18 : f32 to vector<128x32xf32>
    %26 = arith.maximumf %24, %25 : vector<128x32xf32>
    %27 = math.sqrt %26 : vector<128x32xf32>
    %28 = arith.subf %22, %27 : vector<128x32xf32>
    %29 = vector.shape_cast %28 : vector<128x32xf32> to vector<16x8x32xf32>
    %30 = arith.mulf %29, %29 : vector<16x8x32xf32>
    %cst_19 = arith.constant dense<0.000000e+00> : vector<16x8xf32>
    %31 = vector.multi_reduction <add>, %30, %cst_19 [2] : vector<16x8x32xf32> to vector<16x8xf32>
    %32 = vector.shape_cast %31 : vector<16x8xf32> to vector<16x8x1xf32>
    %cst_20 = arith.constant dense<0.000000e+00> : vector<16x1xf32>
    %33 = vector.multi_reduction <add>, %32, %cst_20 [1] : vector<16x8x1xf32> to vector<16x1xf32>
    %34 = vector.shape_cast %33 : vector<16x1xf32> to vector<16x1x1xf32>
    %35 = math.sqrt %34 : vector<16x1x1xf32>
    %cst_21 = arith.constant 9.99999996E-13 : f32
    %36 = vector.broadcast %cst_21 : f32 to vector<16x1x1xf32>
    %37 = arith.maximumf %35, %36 : vector<16x1x1xf32>
    %38 = vector.broadcast %37 : vector<16x1x1xf32> to vector<16x8x32xf32>
    %39 = arith.divf %29, %38 : vector<16x8x32xf32>
    %40 = vector.shape_cast %39 : vector<16x8x32xf32> to vector<128x32xf32>
    %41 = arith.truncf %40 : vector<128x32xf32> to vector<128x32xbf16>
    %c0_22 = arith.constant 0 : index
    %c0_23 = arith.constant 0 : index
    %42 = vector.load %arg8[%c0_22, %c0_23] : memref<32x16xbf16, #tpu.memory_space<vmem>>, vector<32x16xbf16>
    %cst_24 = arith.constant dense<0.000000e+00> : vector<128x16xf32>
    %43 = tpu.matmul %41, %42, %cst_24 {dimension_numbers = #tpu.dot_dimension_numbers<[1], [0], [0], [1], [0, 0, 1, 1], [], []>} : vector<128x32xbf16>, vector<32x16xbf16>, vector<128x16xf32> -> vector<128x16xf32>
    %c0_25 = arith.constant 0 : index
    %c0_26 = arith.constant 0 : index
    %44 = vector.load %arg9[%c0_25, %c0_26] : memref<1x16xf32, #tpu.memory_space<vmem>>, vector<1x16xf32>
    %45 = vector.broadcast %44 : vector<1x16xf32> to vector<128x16xf32>
    %46 = arith.addf %43, %45 : vector<128x16xf32>
    %cst_27 = arith.constant 0.000000e+00 : f32
    %47 = vector.broadcast %cst_27 : f32 to vector<128x16xf32>
    %48 = arith.maximumf %46, %47 : vector<128x16xf32>
    %49 = arith.truncf %48 : vector<128x16xf32> to vector<128x16xbf16>
    %c0_28 = arith.constant 0 : index
    %c0_29 = arith.constant 0 : index
    %50 = vector.load %arg10[%c0_28, %c0_29] : memref<16x2xbf16, #tpu.memory_space<vmem>>, vector<16x2xbf16>
    %cst_30 = arith.constant dense<0.000000e+00> : vector<128x2xf32>
    %51 = tpu.matmul %49, %50, %cst_30 {dimension_numbers = #tpu.dot_dimension_numbers<[1], [0], [0], [1], [0, 0, 1, 1], [], []>} : vector<128x16xbf16>, vector<16x2xbf16>, vector<128x2xf32> -> vector<128x2xf32>
    %c0_31 = arith.constant 0 : index
    %c0_32 = arith.constant 0 : index
    %52 = vector.load %arg11[%c0_31, %c0_32] : memref<1x2xf32, #tpu.memory_space<vmem>>, vector<1x2xf32>
    %53 = vector.broadcast %52 : vector<1x2xf32> to vector<128x2xf32>
    %54 = arith.addf %51, %53 : vector<128x2xf32>
    %55 = vector.shape_cast %54 : vector<128x2xf32> to vector<16x8x2xf32>
    %cst_33 = arith.constant dense<0xFF800000> : vector<16x2xf32>
    %56 = vector.multi_reduction <maximumf>, %55, %cst_33 [1] : vector<16x8x2xf32> to vector<16x2xf32>
    %57 = vector.shape_cast %56 : vector<16x2xf32> to vector<16x1x2xf32>
    %58 = vector.broadcast %57 : vector<16x1x2xf32> to vector<16x8x2xf32>
    %59 = arith.subf %55, %58 : vector<16x8x2xf32>
    %60 = math.exp %59 : vector<16x8x2xf32>
    %cst_34 = arith.constant dense<0.000000e+00> : vector<16x2xf32>
    %61 = vector.multi_reduction <add>, %60, %cst_34 [1] : vector<16x8x2xf32> to vector<16x2xf32>
    %62 = vector.shape_cast %61 : vector<16x2xf32> to vector<16x1x2xf32>
    %63 = vector.broadcast %62 : vector<16x1x2xf32> to vector<16x8x2xf32>
    %64 = arith.divf %60, %63 : vector<16x8x2xf32>
    %65 = arith.truncf %64 : vector<16x8x2xf32> to vector<16x8x2xbf16>
    "tpu.trace_start"() <{level = 10 : i32, message = "bcg,bcf->bgf"}> : () -> ()
    %cst_35 = arith.constant dense<0.000000e+00> : vector<16x2x128xf32>
    %66 = tpu.matmul %65, %0, %cst_35 {dimension_numbers = #tpu.dot_dimension_numbers<[1], [1], [2], [2], [0, 0, 0, 2, 1, 2], [0], [0]>} : vector<16x8x2xbf16>, vector<16x8x128xbf16>, vector<16x2x128xf32> -> vector<16x2x128xf32>
    "tpu.trace_stop"() : () -> ()
    %c0_36 = arith.constant 0 : index
    %c0_37 = arith.constant 0 : index
    %c0_38 = arith.constant 0 : index
    %67 = vector.load %arg12[%c0_36, %c0_37, %c0_38] : memref<16x2x128xf32, #tpu.memory_space<vmem>>, vector<16x2x128xf32>
    tpu.vector_store %arg12[%c0_36, %c0_37, %c0_38], %66 {strides = array<i32>} : memref<16x2x128xf32, #tpu.memory_space<vmem>>, vector<16x2x128xf32>,
    return
  }
  func.func @transform_0(%arg0: i32) -> (i32, i32, i32) {
    %c0_i32 = arith.constant 0 : i32
    %c0_i32_0 = arith.constant 0 : i32
    %c0_i32_1 = arith.constant 0 : i32
    return %arg0, %c0_i32, %c0_i32_0 : i32, i32, i32
  }
  func.func @transform_1(%arg0: i32) -> (i32, i32) {
    %c0_i32 = arith.constant 0 : i32
    %c0_i32_0 = arith.constant 0 : i32
    return %arg0, %c0_i32 : i32, i32
  }
  func.func @transform_2(%arg0: i32) -> (i32, i32) {
    %c0_i32 = arith.constant 0 : i32
    %c0_i32_0 = arith.constant 0 : i32
    %c0_i32_1 = arith.constant 0 : i32
    return %c0_i32, %c0_i32_0 : i32, i32
  }
  func.func @transform_3(%arg0: i32) -> (i32, i32) {
    %c0_i32 = arith.constant 0 : i32
    %c0_i32_0 = arith.constant 0 : i32
    %c0_i32_1 = arith.constant 0 : i32
    return %c0_i32, %c0_i32_0 : i32, i32
  }
  func.func @transform_4(%arg0: i32) -> (i32, i32) {
    %c0_i32 = arith.constant 0 : i32
    %c0_i32_0 = arith.constant 0 : i32
    %c0_i32_1 = arith.constant 0 : i32
    return %c0_i32, %c0_i32_0 : i32, i32
  }
  func.func @transform_5(%arg0: i32) -> (i32, i32) {
    %c0_i32 = arith.constant 0 : i32
    %c0_i32_0 = arith.constant 0 : i32
    %c0_i32_1 = arith.constant 0 : i32
    return %c0_i32, %c0_i32_0 : i32, i32
  }
  func.func @transform_6(%arg0: i32) -> (i32, i32) {
    %c0_i32 = arith.constant 0 : i32
    %c0_i32_0 = arith.constant 0 : i32
    %c0_i32_1 = arith.constant 0 : i32
    return %c0_i32, %c0_i32_0 : i32, i32
  }
  func.func @transform_7(%arg0: i32) -> (i32, i32) {
    %c0_i32 = arith.constant 0 : i32
    %c0_i32_0 = arith.constant 0 : i32
    %c0_i32_1 = arith.constant 0 : i32
    return %c0_i32, %c0_i32_0 : i32, i32
  }
  func.func @transform_8(%arg0: i32) -> (i32, i32) {
    %c0_i32 = arith.constant 0 : i32
    %c0_i32_0 = arith.constant 0 : i32
    %c0_i32_1 = arith.constant 0 : i32
    return %c0_i32, %c0_i32_0 : i32, i32
  }
  func.func @transform_9(%arg0: i32) -> (i32, i32) {
    %c0_i32 = arith.constant 0 : i32
    %c0_i32_0 = arith.constant 0 : i32
    %c0_i32_1 = arith.constant 0 : i32
    return %c0_i32, %c0_i32_0 : i32, i32
  }
  func.func @transform_10(%arg0: i32) -> (i32, i32) {
    %c0_i32 = arith.constant 0 : i32
    %c0_i32_0 = arith.constant 0 : i32
    %c0_i32_1 = arith.constant 0 : i32
    return %c0_i32, %c0_i32_0 : i32, i32
  }
  func.func @transform_11(%arg0: i32) -> (i32, i32, i32) {
    %c0_i32 = arith.constant 0 : i32
    %c0_i32_0 = arith.constant 0 : i32
    %c0_i32_1 = arith.constant 0 : i32
    return %arg0, %c0_i32, %c0_i32_0 : i32, i32, i32
  }
}

</mosaic_0001>

<bundles_post_ra>
// kernel: tpu_custom_call.1
= control target key start
LH: loop header
LB: loop body
LE: loop exit
PB: predicated region body
PF: predicated region fallthrough
CT: control target
= control target key end

     0   :  { %16 = vsyncpa [#allocation3], 0  ;;  %s5396_s0 = inlined_call_operand.hbm [shape: bf16[64,8,128], index: 0, kind: input, shape index: {}]   ;;  %s5397_s1 = inlined_call_operand.vmem [shape: bf16[64,32], index: 1, kind: input, shape index: {}]   ;;  %s5398_s2 = inlined_call_operand.vmem [shape: bf16[128,128], index: 2, kind: input, shape index: {}]   ;;  %s5399_s3 = inlined_call_operand.vmem [shape: f32[1,128], index: 3, kind: input, shape index: {}]   ;;  %s5400_s4 = inlined_call_operand.vmem [shape: bf16[32,128], index: 4, kind: input, shape index: {}]   ;;  %s5401_s5 = inlined_call_operand.vmem [shape: f32[1,128], index: 5, kind: input, shape index: {}]   ;;  %s5402_s6 = inlined_call_operand.vmem [shape: f32[128,32], index: 6, kind: input, shape index: {}]   ;;  %s5403_s7 = inlined_call_operand.vmem [shape: bf16[32,16], index: 7, kind: input, shape index: {}]   ;;  %s5404_s8 = inlined_call_operand.vmem [shape: f32[1,16], index: 8, kind: input, shape index: {}]   ;;  %s5405_s9 = inlined_call_operand.vmem [shape: bf16[16,2], index: 9, kind: input, shape index: {}]   ;;  %s5406_s10 = inlined_call_operand.vmem [shape: f32[1,2], index: 10, kind: input, shape index: {}]   ;;  %s5407_s11 = inlined_call_operand.hbm [shape: f32[64,2,128], index: 11, kind: output, shape index: {}]  }
   0x1   :  { %18 = vsyncpa [#allocation3 + $0x1], 0 }
   0x2   :  { %19 = vsyncpa [#allocation4], 0 }
   0x3   :  { %21 = vsyncpa [#allocation4 + $0x1], 0  ;;  %s3872_s17 = smov 0   ;;  %s3874_s18 = smov 0  }
   0x4   :  { %s3876_s19 = smov 0   ;;  %s3878_s20 = smov 0  }
   0x5 LB: > { %5413 = sst [smem:[#allocation8_spill]] %s3794_s17  ;;  %s3893_s21 = sadd.s32 4294967295, %s3806_s20   ;;  %s3806_s20 = sphi %s3878_s20, %s5471_s20   ;;  %s3802_s19 = sphi %s3876_s19, %s5476_s19   ;;  %s3798_s18 = sphi %s3874_s18, %s5475_s18   ;;  %s3794_s17 = sphi %s3872_s17, %s5474_s17  }
   0x6   : > { %5414 = sst [smem:[#allocation9_spill]] %s3802_s19  ;;  %s3278_s22 = sadd.s32 4294967294, %s3806_s20  }
   0x7   : > { %s3897_s23 = sadd.s32 1, %s3806_s20   ;;  %s34_s24 = sadd.s32 1, %s3802_s19 }
   0x8   : > { %5415 = sst [smem:[#allocation10_spill]] %s3897_s23  ;;  %s31_s25 = ssub.s32 %s3806_s20, %s3897_s23 }
   0x9   : > { %p41_p0 = scmp.ne.s32.totalorder %s3802_s19, %s3798_s18  ;;  %p32_p1 = scmp.eq.s32.totalorder %s31_s25, 0 }
   0xa   : > { %p42_p2 = scmp.eq.s32.totalorder %s3806_s20, 0  ;;  %p47_p3 = scmp.ne.s32.totalorder %s3798_s18, %s3794_s17 }
   0xb   : > { %p48_p4 = scmp.eq.s32.totalorder %s3893_s21, 0  ;;  %p286_p7 = scmp.eq.s32.totalorder %s3893_s21, 3 }
   0xc   : > { %s3909_s26 = scalar_select %p32_p1, %s3802_s19, %s34_s24  }
   0xd   : > { %p3911_p5 = por %p42_p2, %p41_p0  ;;  %p3915_p6 = por %p48_p4, %p47_p3 }
   0xe   : > { %5416 = sst [smem:[#allocation11_spill]] %s3909_s26  ;;  %p292_p8 = scmp.eq.s32.totalorder %s3278_s22, 3 }
   0xf   : > { %p3451_p9 = scmp.lt.s32.totalorder %s3806_s20, 4  ;;  %p3921_p10 = por %p286_p7, %p41_p0 }
  0x10   : > { %p3925_p11 = por %p292_p8, %p47_p3  ;;  %s339_s12 = sand.u32 1, %s3802_s19  }
  0x11   : > { %s3415_s13 = sshll.u32 %s3806_s20, 6  ;;  %s3281_s14 = sshll.u32 %s339_s12, 6 }
  0x12   : > { %s5420_s30 = scalar_select %p3925_p11, 1, 0 }
  0x13   : > { %s348_s24 = scalar_lea.hbm %s5396_s0, %s3415_s13  ;;  %s343_s26 = scalar_lea.vmem [#allocation2], %s3281_s14 }
  0x14   : > { %5421 = sst [smem:[#allocation12_spill]] %s5420_s30  ;;  %s349_s25 = sshll.u32 %s348_s24, 4  ;;  %s350_s25 = int_to_ptr.hbm [resolvable:$true] %s349_s25 }
  0x15   : > { %s351_s23 = sshll.u32 %s343_s26, 4  ;;  %p3936_p12 = pnand %p3451_p9, %p3911_p5  ;;  %s352_s23 = int_to_ptr.vmem [resolvable:$true] %s351_s23 }
  0x16   : > { %p3284_p13 = scmp.ge.s32.totalorder %s3806_s20, 1  ;;  %p368_p0 = scmp.lt.s32.totalorder %s3806_s20, 5 }
  0x17   : > { %s340_s19 = scalar_lea.sflag [#allocation3], %s339_s12  ;;  %s3710_s30 = sshra.s32 %s350_s25, 4  ;;  %s3711_s30 = int_to_ptr.hbm [resolvable:$true] %s3710_s30 }
  0x18   : > { %s3712_s17 = scalar_lea.hbm %s3711_s30, 64  ;;  %p3714_p2 = pneg %p3936_p12 }
  0x19   : > { %p3713_p1 = scmp.ne.s32.totalorder %s3711_s30, %s3712_s17  ;;  %s3717_s27 = scalar_lea.hbm %s5396_s0, 256 }
  0x1a   : > { %p3718_p5 = scmp.lt.s32.totalorder %s3711_s30, %s5396_s0  ;;  %p3719_p7 = scmp.lt.s32.totalorder %s3717_s27, %s3712_s17 }
  0x1b   : > { %p3715_p3 = pnand %p3714_p2, %p3713_p1 }
  0x1c   : > { %p3720_p8 = por %p3719_p7, %p3718_p5 }
  0x1d   : > { %p3716_p4 = pneg %p3715_p3 }
  0x1f   : > { %p3721_p9 = pnand %p3720_p8, %p3716_p4 }
  0x21   : > { %3724 = shalt.err (!%p3721_p9)
}
  0x22   : > { %s3808_s12 = smov 64   ;;  %s3809_s16 = smov 4  }
  0x23   : > { %3446 = dma.hbm_to_vmem [thread:$0]  (!%p3936_p12), %s350_s25, 1024, %s352_s23, %s340_s19, %s3808_s12, %s3808_s12, %s3809_s16  }
  0x24   : > { %p369_p1 = pnand %p3284_p13, %p368_p0 }
  0x25   : > { %s3957_s24 = sand.u32 (!%p369_p1), 1, %s3798_s18  }
  0x26   : > { %372 = sbr.rel (%p369_p1) target bundleno = 1318 (0x526), region = 64  ;;  %s3285_s17 = sshll.u32 (!%p369_p1), %s3957_s24, 6 }
  0x27   : > { %s375_s30 = scalar_lea.sflag (!%p369_p1), [#allocation3], %s3957_s24  ;;  %s3961_s26 = scalar_lea.vmem (!%p369_p1), [#allocation2], %s3285_s17 }
  0x2b   : > { %3785 = dma.done.wait (%p3915_p6), %s375_s30, 1024  }
  0x2c   : > { %3787 = vsyncadd (%p3915_p6), %s375_s30, 4294966272  ;;  %s3287_s19 = sshll.u32 %s3893_s21, 1  ;;  %v3432_v0 = vld [vmem:[%s5398_s2 + $0x38] sm:$0xff]  ;;  %v3434_v1 = vld [vmem:[%s5400_s4 + $0x8] sm:$0xff]  ;;  %vm640_vm0 = vcmask 261120   ;;  %s3438_s15 = sshll.u32 %s3893_s21, 5 }
  0x2d   : > { %p425_p12 = scmp.lt.s32.totalorder %s3287_s19, 7  ;;  %566 = vmatpush.bf16.msra.mxu0 %v3432_v0  ;;  %v3431_v2 = vld [vmem:[%s5398_s2 + $0x30] sm:$0xff]  ;;  %650 = vmatpush.bf16.msra.mxu1 %v3434_v1  ;;  %v3433_v3 = vld [vmem:[%s5400_s4] sm:$0xff]  ;;  %v3430_v4 = vld [vmem:[%s5398_s2 + $0x28] sm:$0xff]  ;;  %s3189_s16 = scalar_lea.hbm %s5407_s11, %s3438_s15 }
  0x2e   : > { %v3429_v6 = vld [vmem:[%s5398_s2 + $0x20] sm:$0xff]  ;;  %v3428_v7 = vld [vmem:[%s5398_s2 + $0x18] sm:$0xff]  ;;  %v3427_v8 = vld [vmem:[%s5398_s2 + $0x10] sm:$0xff]  ;;  %s3178_s21 = scalar_lea.sflag [#allocation4], %s3957_s24 }
  0x2f   : > { %s5478_s19 = smov (!%p425_p12, %s3287_s19), 7  ;;  %v3426_v9 = vld [vmem:[%s5398_s2 + $0x8] sm:$0xff]  ;;  %v3425_v10 = vld [vmem:[%s5398_s2] sm:$0xff]  ;;  %v3418_v13 = vld [vmem:[%s3961_s26 + $0x10] sm:$0xff] }
  0x30   : > { %s3288_s22 = sshll.u32 %s5478_s19, 2  ;;  %v3416_v11 = vld [vmem:[%s3961_s26] sm:$0xff]  ;;  %v3417_v12 = vld [vmem:[%s3961_s26 + $0x8] sm:$0xff]  ;;  %v3419_v14 = vld [vmem:[%s3961_s26 + $0x18] sm:$0xff] }
  0x31   : > { %s428_s30 = scalar_lea.vmem %s5397_s1, %s3288_s22  ;;  %567 = vmatpush.bf16.msra.mxu0 %v3431_v2  ;;  %651 = vmatpush.bf16.msra.mxu1 %v3433_v3  ;;  %v3420_v15 = vld [vmem:[%s3961_s26 + $0x20] sm:$0xff]  ;;  %v737_v16 = vld [vmem:[%s5402_s6 + $0x78] sm:$0xff]  ;;  %v736_v17 = vld [vmem:[%s5402_s6 + $0x70] sm:$0xff]  ;;  %s3760_s22 = scalar_lea.hbm %s5407_s11, 128 }
  0x32   : > { %v3424_v5 = vld [vmem:[%s428_s30] sm:$0xff]  ;;  %738 = vmatpush.msra.mxu2 %v737_v16  ;;  %v735_v18 = vld [vmem:[%s5402_s6 + $0x68] sm:$0xff]  ;;  %v733_v20 = vld [vmem:[%s5402_s6 + $0x58] sm:$0xff]  ;;  %s3192_s30 = sshll.u32 %s3189_s16, 4  ;;  %s3193_s30 = int_to_ptr.hbm [resolvable:$true] %s3192_s30 }
  0x33   : > { %v734_v19 = vld [vmem:[%s5402_s6 + $0x60] sm:$0xff]  ;;  %v732_v21 = vld [vmem:[%s5402_s6 + $0x50] sm:$0xff]  ;;  %v731_v22 = vld [vmem:[%s5402_s6 + $0x48] sm:$0xff]  ;;  %s3754_s19 = sshra.s32 %s3193_s30, 4  ;;  %s3755_s19 = int_to_ptr.hbm [resolvable:$true] %s3754_s19 }
  0x34   : > { %3365 = vmatmul.msk.bf16.vlgmr.msra.gmra.mxu1 %vm640_vm0, %v3424_v5  ;;  %739 = vmatpush.msra.mxu2 %v736_v17  ;;  %v3421_v23 = vld [vmem:[%s3961_s26 + $0x28] sm:$0xff]  ;;  %v730_v24 = vld [vmem:[%s5402_s6 + $0x40] sm:$0xff]  ;;  %v729_v25 = vld [vmem:[%s5402_s6 + $0x38] sm:$0xff]  ;;  %s3756_s23 = scalar_lea.hbm %s3755_s19, 32  ;;  %p3761_p2 = scmp.lt.s32.totalorder %s3755_s19, %s5407_s11 }
  0x35   : > { %568 = vmatpush.bf16.msra.mxu0 %v3430_v4  ;;  %v728_v26 = vld [vmem:[%s5402_s6 + $0x30] sm:$0xff]  ;;  %v727_v27 = vld [vmem:[%s5402_s6 + $0x28] sm:$0xff]  ;;  %v726_v28 = vld [vmem:[%s5402_s6 + $0x20] sm:$0xff]  ;;  %p3757_p6 = scmp.ne.s32.totalorder %s3755_s19, %s3756_s23  ;;  %p3762_p3 = scmp.lt.s32.totalorder %s3760_s22, %s3756_s23 }
  0x36   : > { %740 = vmatpush.msra.mxu2 %v735_v18  ;;  %v725_v29 = vld [vmem:[%s5402_s6 + $0x18] sm:$0xff]  ;;  %v3422_v30 = vld [vmem:[%s3961_s26 + $0x30] sm:$0xff]  ;;  %v723_v32 = vld [vmem:[%s5402_s6 + $0x8] sm:$0xff] }
  0x37   : > { %v724_v31 = vld [vmem:[%s5402_s6 + $0x10] sm:$0xff]  ;;  %v722_v33 = vld [vmem:[%s5402_s6] sm:$0xff]  ;;  %v3423_v34 = vld [vmem:[%s3961_s26 + $0x38] sm:$0xff]  ;;  %p3758_p13 = pnand %p3757_p6, %p3921_p10  ;;  %p3763_p4 = por %p3762_p3, %p3761_p2 }
  0x38   : > { %741 = vmatpush.msra.mxu2 %v734_v19  ;;  %v3514_v35 = vld [vmem:[%s5401_s5] ss:$0 sm:$0xff] }
  0x39   : > { %569 = vmatpush.bf16.msra.mxu0 %v3429_v6  ;;  %v4064_v38 = vld [vmem:[%s5399_s3] ss:$0 sm:$0xff]  ;;  %p3759_p0 = pneg %p3758_p13 }
  0x3a   : > { %742 = vmatpush.msra.mxu2 %v733_v20 }
  0x3b   : > { %p3764_p5 = pnand %p3763_p4, %p3759_p0 }
  0x3c   : > { %743 = vmatpush.msra.mxu2 %v732_v21 }
  0x3d   : > { %570 = vmatpush.bf16.msra.mxu0 %v3428_v7 }
  0x3e   : > { %744 = vmatpush.msra.mxu2 %v731_v22 }
  0x40   : > { %745 = vmatpush.msra.mxu2 %v730_v24 }
  0x41   : > { %571 = vmatpush.bf16.msra.mxu0 %v3427_v8 }
  0x42   : > { %746 = vmatpush.msra.mxu2 %v729_v25 }
  0x44   : > { %747 = vmatpush.msra.mxu2 %v728_v26 }
  0x45   : > { %572 = vmatpush.bf16.msra.mxu0 %v3426_v9 }
  0x46   : > { %748 = vmatpush.msra.mxu2 %v727_v27 }
  0x48   : > { %749 = vmatpush.msra.mxu2 %v726_v28 }
  0x49   : > { %573 = vmatpush.bf16.msra.mxu0 %v3425_v10 }
  0x4a   : > { %750 = vmatpush.msra.mxu2 %v725_v29 }
  0x4c   : > { %574 = vmatmul.bf16.vlgmr.msra.gmra.mxu0 %v3416_v11  ;;  %751 = vmatpush.msra.mxu2 %v724_v31 }
  0x4e   : > { %752 = vmatpush.msra.mxu2 %v723_v32 }
  0x50   : > { %753 = vmatpush.msra.mxu2 %v722_v33 }
  0x5c   : > { %579 = vmatmul.bf16.gmra.mxu0 %v3417_v12 }
  0x6c   : > { %584 = vmatmul.bf16.gmra.mxu0 %v3418_v13 }
  0x7c   : > { %589 = vmatmul.bf16.gmra.mxu0 %v3419_v14 }
  0x8c   : > { %594 = vmatmul.bf16.gmra.mxu0 %v3420_v15 }
  0x9c   : > { %599 = vmatmul.bf16.gmra.mxu0 %v3421_v23 }
  0xac   : > { %604 = vmatmul.bf16.gmra.mxu0 %v3422_v30 }
  0xb1   : > { %v653_v36 = vpop.f32.mrf.mxu1 }
  0xb2   : > { %v654_v37 = vadd.f32 %v3514_v35, %v653_v36 }
  0xb4   : > { %v674_v39 = vperm.slane %v654_v37, 0  ;;  %v660_v43 = vrot.slane %v654_v37, 1  ;;  %v661_v48 = vrot.slane %v654_v37, 2  ;;  %v662_v53 = vrot.slane %v654_v37, 3 }
  0xb5   : > { %v663_v58 = vrot.slane %v654_v37, 4  ;;  %v664_v63 = vrot.slane %v654_v37, 5  ;;  %v665_v4 = vrot.slane %v654_v37, 6  ;;  %v666_v9 = vrot.slane %v654_v37, 7 }
  0xb6   : > { %v675_v46 = vperm.slane %v660_v43, 0  ;;  %v676_v51 = vperm.slane %v661_v48, 0  ;;  %v677_v56 = vperm.slane %v662_v53, 0 }
  0xb7   : > { %v678_v61 = vperm.slane %v663_v58, 0  ;;  %v679_v2 = vperm.slane %v664_v63, 0  ;;  %v680_v7 = vperm.slane %v665_v4, 0  ;;  %v681_v12 = vperm.slane %v666_v9, 0 }
  0xb9   : > { %v655_v13 = vpop.f32.mrf.mxu1 }
  0xba   : > { %v656_v15 = vadd.f32 %v3514_v35, %v655_v13 }
  0xbc   : > { %609 = vmatmul.bf16.gmra.mxu0 %v3423_v34  ;;  %v682_v18 = vperm.slane %v656_v15, 0  ;;  %v667_v20 = vrot.slane %v656_v15, 1  ;;  %v668_v25 = vrot.slane %v656_v15, 2  ;;  %v669_v30 = vrot.slane %v656_v15, 3 }
  0xbd   : > { %v670_v35 = vrot.slane %v656_v15, 4 }
  0xbe   : > { %v683_v23 = vperm.slane %v667_v20, 0  ;;  %v684_v28 = vperm.slane %v668_v25, 0  ;;  %v685_v33 = vperm.slane %v669_v30, 0 }
  0xc9   : > { %v575_v40 = vpop.f32.mrf.mxu0 }
  0xca   : > { %v576_v41 = vadd.f32 %v4064_v38, %v575_v40 }
  0xcc   : > { %v706_v42 = vmul.f32 %v674_v39, %v576_v41  ;;  %v686_v39 = vperm.slane %v670_v35, 0  ;;  %v671_v41 = vrot.slane %v656_v15, 5 }
  0xce   : > { %754 = vmatmul.f32.vlgmr.msra.gmra.mxu2 %v706_v42 }
  0xd1   : > { %v577_v44 = vpop.f32.mrf.mxu0 }
  0xd2   : > { %v578_v45 = vadd.f32 %v4064_v38, %v577_v44  ;;  %v687_v44 = vperm.slane %v671_v41, 0 }
  0xd4   : > { %v707_v47 = vmul.f32 %v675_v46, %v578_v45  ;;  %v672_v46 = vrot.slane %v656_v15, 6 }
  0xd6   : > { %757 = vmatmul.f32.gmra.mxu2 %v707_v47 }
  0xd9   : > { %v580_v49 = vpop.f32.mrf.mxu0 }
  0xda   : > { %v581_v50 = vadd.f32 %v4064_v38, %v580_v49  ;;  %v688_v49 = vperm.slane %v672_v46, 0 }
  0xdc   : > { %v708_v52 = vmul.f32 %v676_v51, %v581_v50  ;;  %v673_v51 = vrot.slane %v656_v15, 7 }
  0xde   : > { %760 = vmatmul.f32.gmra.mxu2 %v708_v52 }
  0xe1   : > { %v582_v54 = vpop.f32.mrf.mxu0 }
  0xe2   : > { %v583_v55 = vadd.f32 %v4064_v38, %v582_v54  ;;  %v689_v54 = vperm.slane %v673_v51, 0 }
  0xe4   : > { %v709_v57 = vmul.f32 %v677_v56, %v583_v55 }
  0xe6   : > { %763 = vmatmul.f32.gmra.mxu2 %v709_v57 }
  0xe9   : > { %v585_v59 = vpop.f32.mrf.mxu0 }
  0xea   : > { %v586_v60 = vadd.f32 %v4064_v38, %v585_v59 }
  0xec   : > { %v710_v62 = vmul.f32 %v678_v61, %v586_v60 }
  0xee   : > { %766 = vmatmul.f32.gmra.mxu2 %v710_v62 }
  0xf1   : > { %v587_v0 = vpop.f32.mrf.mxu0 }
  0xf2   : > { %v588_v1 = vadd.f32 %v4064_v38, %v587_v0 }
  0xf4   : > { %v711_v3 = vmul.f32 %v679_v2, %v588_v1 }
  0xf6   : > { %769 = vmatmul.f32.gmra.mxu2 %v711_v3 }
  0xf9   : > { %v590_v5 = vpop.f32.mrf.mxu0 }
  0xfa   : > { %v591_v6 = vadd.f32 %v4064_v38, %v590_v5 }
  0xfc   : > { %v712_v8 = vmul.f32 %v680_v7, %v591_v6 }
  0xfe   : > { %772 = vmatmul.f32.gmra.mxu2 %v712_v8 }
 0x101   : > { %v592_v10 = vpop.f32.mrf.mxu0 }
 0x102   : > { %v593_v11 = vadd.f32 %v4064_v38, %v592_v10 }
 0x104   : > { %v713_v14 = vmul.f32 %v681_v12, %v593_v11 }
 0x106   : > { %775 = vmatmul.f32.gmra.mxu2 %v713_v14 }
 0x109   : > { %v595_v16 = vpop.f32.mrf.mxu0 }
 0x10a   : > { %v596_v17 = vadd.f32 %v4064_v38, %v595_v16 }
 0x10c   : > { %v714_v19 = vmul.f32 %v682_v18, %v596_v17 }
 0x10e   : > { %778 = vmatmul.f32.gmra.mxu2 %v714_v19 }
 0x111   : > { %v597_v21 = vpop.f32.mrf.mxu0 }
 0x112   : > { %v598_v22 = vadd.f32 %v4064_v38, %v597_v21 }
 0x114   : > { %v715_v24 = vmul.f32 %v683_v23, %v598_v22 }
 0x116   : > { %781 = vmatmul.f32.gmra.mxu2 %v715_v24 }
 0x119   : > { %v600_v26 = vpop.f32.mrf.mxu0 }
 0x11a   : > { %v601_v27 = vadd.f32 %v4064_v38, %v600_v26 }
 0x11c   : > { %v716_v29 = vmul.f32 %v684_v28, %v601_v27 }
 0x11e   : > { %784 = vmatmul.f32.gmra.mxu2 %v716_v29 }
 0x121   : > { %v602_v31 = vpop.f32.mrf.mxu0 }
 0x122   : > { %v603_v32 = vadd.f32 %v4064_v38, %v602_v31 }
 0x124   : > { %v717_v34 = vmul.f32 %v685_v33, %v603_v32 }
 0x126   : > { %787 = vmatmul.f32.gmra.mxu2 %v717_v34 }
 0x129   : > { %v605_v36 = vpop.f32.mrf.mxu0 }
 0x12a   : > { %v606_v37 = vadd.f32 %v4064_v38, %v605_v36 }
 0x12c   : > { %v718_v40 = vmul.f32 %v686_v39, %v606_v37 }
 0x12e   : > { %790 = vmatmul.f32.gmra.mxu2 %v718_v40 }
 0x131   : > { %v607_v42 = vpop.f32.mrf.mxu0 }
 0x132   : > { %v608_v43 = vadd.f32 %v4064_v38, %v607_v42 }
 0x134   : > { %v719_v45 = vmul.f32 %v687_v44, %v608_v43 }
 0x136   : > { %793 = vmatmul.f32.gmra.mxu2 %v719_v45 }
 0x139   : > { %v610_v47 = vpop.f32.mrf.mxu0 }
 0x13a   : > { %v611_v48 = vadd.f32 %v4064_v38, %v610_v47 }
 0x13c   : > { %v720_v50 = vmul.f32 %v688_v49, %v611_v48 }
 0x13e   : > { %796 = vmatmul.f32.gmra.mxu2 %v720_v50 }
 0x141   : > { %v612_v52 = vpop.f32.mrf.mxu0 }
 0x142   : > { %v613_v53 = vadd.f32 %v4064_v38, %v612_v52 }
 0x144   : > { %v721_v55 = vmul.f32 %v689_v54, %v613_v53 }
 0x146   : > { %799 = vmatmul.f32.gmra.mxu2 %v721_v55 }
 0x151   : > { %v755_v56 = vpop.f32.mrf.mxu2 }
 0x152   : > { %v803_v57 = vmax.f32 %v755_v56, 0.0  ;;  %v1011_v58 = vsub.f32 0.0, %v755_v56 }
 0x154   : > { %3518 = vrsqrt.f32 %v803_v57  ;;  %v1027_v59 = vmax.f32 %v1011_v58, 0.0  ;;  %vm826_vm1 = vcmp.eq.f32.partialorder %v803_v57, inf  ;;  %vm828_vm2 = vcmp.eq.f32.partialorder %v803_v57, 0.0 }
 0x155   : > { %v829_v25 = vand.u32 2147483648, %v803_v57 }
 0x156   : > { %3520 = vrsqrt.f32 %v1027_v59  ;;  %vm1050_vm3 = vcmp.eq.f32.partialorder %v1027_v59, inf  ;;  %v1053_v26 = vand.u32 2147483648, %v1027_v59  ;;  %vm1052_vm4 = vcmp.eq.f32.partialorder %v1027_v59, 0.0 }
 0x159   : > { %v758_v60 = vpop.f32.mrf.mxu2 }
 0x15a   : > { %v3519_v61 = vpop.eup %3518  ;;  %v4082_v62 = vmax.f32 %v758_v60, 0.0  ;;  %v1012_v63 = vsub.f32 0.0, %v758_v60 }
 0x15b   : > { %v820_v0 = vmul.f32 %v3519_v61, %v803_v57 }
 0x15c   : > { %v3521_v1 = vpop.eup %3520  ;;  %3522 = vrsqrt.f32 %v4082_v62  ;;  %v4085_v2 = vmax.f32 %v1012_v63, 0.0  ;;  %vm838_vm5 = vcmp.eq.f32.partialorder %v4082_v62, inf  ;;  %v841_v47 = vand.u32 2147483648, %v4082_v62 }
 0x15d   : > { %v821_v38 = vmul.f32 %v3519_v61, %v820_v0  ;;  %v1044_v3 = vmul.f32 %v3521_v1, %v1027_v59  ;;  %vm840_vm6 = vcmp.eq.f32.partialorder %v4082_v62, 0.0 }
 0x15e   : > { %3524 = vrsqrt.f32 %v4085_v2  ;;  %vm1062_vm7 = vcmp.eq.f32.partialorder %v4085_v2, inf  ;;  %v1065_v53 = vand.u32 2147483648, %v4085_v2  ;;  %vm1064_vm8 = vcmp.eq.f32.partialorder %v4085_v2, 0.0 }
 0x15f   : > { %v822_v4 = vmul.f32 0.5, %v821_v38  ;;  %v1045_v5 = vmul.f32 %v3521_v1, %v1044_v3 }
 0x161   : > { %v761_v6 = vpop.f32.mrf.mxu2  ;;  %v823_v7 = vsub.f32 1.5, %v822_v4  ;;  %v1046_v8 = vmul.f32 0.5, %v1045_v5 }
 0x162   : > { %v3523_v9 = vpop.eup %3522  ;;  %v4088_v10 = vmax.f32 %v761_v6, 0.0  ;;  %v1013_v11 = vsub.f32 0.0, %v761_v6 }
 0x163   : > { %v824_v12 = vmul.f32 %v3519_v61, %v823_v7  ;;  %v1047_v13 = vsub.f32 1.5, %v1046_v8  ;;  %v832_v14 = vmul.f32 %v3523_v9, %v4082_v62 }
 0x164   : > { %v3525_v15 = vpop.eup %3524  ;;  %3526 = vrsqrt.f32 %v4088_v10  ;;  %v4092_v16 = vmax.f32 %v1013_v11, 0.0  ;;  %vm850_vm9 = vcmp.eq.f32.partialorder %v4088_v10, inf  ;;  %vm852_vm10 = vcmp.eq.f32.partialorder %v4088_v10, 0.0 }
 0x165   : > { %v825_v17 = vmul.f32 %v824_v12, %v803_v57  ;;  %v1048_v18 = vmul.f32 %v3521_v1, %v1047_v13  ;;  %v833_v19 = vmul.f32 %v3523_v9, %v832_v14  ;;  %v1056_v20 = vmul.f32 %v3525_v15, %v4085_v2 }
 0x166   : > { %3528 = vrsqrt.f32 %v4092_v16  ;;  %vm1074_vm11 = vcmp.eq.f32.partialorder %v4092_v16, inf  ;;  %vm1076_vm12 = vcmp.eq.f32.partialorder %v4092_v16, 0.0 }
 0x167   : > { %v827_v21 = vsel %vm826_vm1, %v803_v57, %v825_v17  ;;  %v1049_v22 = vmul.f32 %v1048_v18, %v1027_v59  ;;  %v834_v23 = vmul.f32 0.5, %v833_v19  ;;  %v1057_v24 = vmul.f32 %v3525_v15, %v1056_v20 }
 0x168   : > { %v830_v34 = vsel %vm828_vm2, %v829_v25, %v827_v21  ;;  %v1077_v19 = vand.u32 2147483648, %v4092_v16 }
 0x169   : > { %v764_v27 = vpop.f32.mrf.mxu2  ;;  %v1051_v28 = vsel %vm1050_vm3, %v1027_v59, %v1049_v22  ;;  %v835_v29 = vsub.f32 1.5, %v834_v23  ;;  %v1058_v30 = vmul.f32 0.5, %v1057_v24 }
 0x16a   : > { %v3527_v31 = vpop.eup %3526  ;;  %v4096_v32 = vmax.f32 %v764_v27, 0.0  ;;  %v1014_v33 = vsub.f32 0.0, %v764_v27  ;;  %v1054_v35 = vsel %vm1052_vm4, %v1053_v26, %v1051_v28 }
 0x16b   : > { %v4098_v36 = vsub.f32 %v830_v34, %v1054_v35  ;;  %v836_v37 = vmul.f32 %v3523_v9, %v835_v29  ;;  %v1059_v39 = vsub.f32 1.5, %v1058_v30  ;;  %v844_v40 = vmul.f32 %v3527_v31, %v4088_v10 }
 0x16c   : > { %v3529_v41 = vpop.eup %3528  ;;  %3530 = vrsqrt.f32 %v4096_v32  ;;  %v4102_v42 = vmax.f32 %v1014_v33, 0.0  ;;  %vm862_vm13 = vcmp.eq.f32.partialorder %v4096_v32, inf  ;;  %vm864_vm14 = vcmp.eq.f32.partialorder %v4096_v32, 0.0 }
 0x16d   : > { %v1251_v43 = vmul.f32 %v4098_v36, %v4098_v36  ;;  %v837_v44 = vmul.f32 %v836_v37, %v4082_v62  ;;  %v1060_v45 = vmul.f32 %v3525_v15, %v1059_v39  ;;  %v845_v46 = vmul.f32 %v3527_v31, %v844_v40 }
 0x16e   : > { %3532 = vrsqrt.f32 %v4102_v42  ;;  %v1068_v48 = vmul.f32 %v3529_v41, %v4092_v16  ;;  %v853_v15 = vand.u32 2147483648, %v4088_v10  ;;  %vm1086_vm15 = vcmp.eq.f32.partialorder %v4102_v42, inf }
 0x16f   : > { %v1267_v49 = vsel %vm640_vm0, %v1251_v43, 0.0  ;;  %v839_v50 = vsel %vm838_vm5, %v4082_v62, %v837_v44  ;;  %v1061_v51 = vmul.f32 %v1060_v45, %v4085_v2  ;;  %v846_v52 = vmul.f32 0.5, %v845_v46 }
 0x170   : > { %1268 = vadd.xlane.f32.xlu0 %v1267_v49  ;;  %v1069_v54 = vmul.f32 %v3529_v41, %v1068_v48  ;;  %v842_v56 = vsel %vm840_vm6, %v841_v47, %v839_v50  ;;  %v865_v46 = vand.u32 2147483648, %v4096_v32  ;;  %v1089_v47 = vand.u32 2147483648, %v4102_v42 }
 0x171   : > { %v767_v55 = vpop.f32.mrf.mxu2  ;;  %v1063_v57 = vsel %vm1062_vm7, %v4085_v2, %v1061_v51  ;;  %v847_v58 = vsub.f32 1.5, %v846_v52  ;;  %vm1088_vm1 = vcmp.eq.f32.partialorder %v4102_v42, 0.0 }
 0x172   : > { %v3531_v59 = vpop.eup %3530  ;;  %v4119_v60 = vmax.f32 %v767_v55, 0.0  ;;  %v1015_v61 = vsub.f32 0.0, %v767_v55  ;;  %v1066_v63 = vsel %vm1064_vm8, %v1065_v53, %v1063_v57  ;;  %v1070_v0 = vmul.f32 0.5, %v1069_v54 }
 0x173   : > { %v4121_v1 = vsub.f32 %v842_v56, %v1066_v63  ;;  %v848_v62 = vmul.f32 %v3527_v31, %v847_v58  ;;  %v856_v38 = vmul.f32 %v3531_v59, %v4096_v32 }
 0x174   : > { %v3533_v3 = vpop.eup %3532  ;;  %3534 = vrsqrt.f32 %v4119_v60  ;;  %v4125_v4 = vmax.f32 %v1015_v61, 0.0  ;;  %v1071_v5 = vsub.f32 1.5, %v1070_v0  ;;  %vm874_vm2 = vcmp.eq.f32.partialorder %v4119_v60, inf }
 0x175   : > { %v1252_v2 = vmul.f32 %v4121_v1, %v4121_v1  ;;  %v849_v6 = vmul.f32 %v848_v62, %v4088_v10  ;;  %v857_v7 = vmul.f32 %v3531_v59, %v856_v38  ;;  %v1080_v8 = vmul.f32 %v3533_v3, %v4102_v42 }
 0x176   : > { %3536 = vrsqrt.f32 %v4125_v4  ;;  %v1072_v9 = vmul.f32 %v3529_v41, %v1071_v5  ;;  %vm876_vm3 = vcmp.eq.f32.partialorder %v4119_v60, 0.0  ;;  %vm1098_vm4 = vcmp.eq.f32.partialorder %v4125_v4, inf }
 0x177   : > { %v1270_v11 = vsel %vm640_vm0, %v1252_v2, 0.0  ;;  %v851_v12 = vsel %vm850_vm9, %v4088_v10, %v849_v6  ;;  %v858_v13 = vmul.f32 0.5, %v857_v7  ;;  %v1081_v14 = vmul.f32 %v3533_v3, %v1080_v8 }
 0x178   : > { %1271 = vadd.xlane.f32.xlu0 %v1270_v11  ;;  %v1073_v17 = vmul.f32 %v1072_v9, %v4092_v16  ;;  %v854_v25 = vsel %vm852_vm10, %v853_v15, %v851_v12  ;;  %v1101_v9 = vand.u32 2147483648, %v4125_v4  ;;  %vm1100_vm5 = vcmp.eq.f32.partialorder %v4125_v4, 0.0 }
 0x179   : > { %v770_v18 = vpop.f32.mrf.mxu2  ;;  %v859_v20 = vsub.f32 1.5, %v858_v13  ;;  %v1082_v21 = vmul.f32 0.5, %v1081_v14 }
 0x17a   : > { %v3535_v22 = vpop.eup %3534  ;;  %v4141_v23 = vmax.f32 %v770_v18, 0.0  ;;  %v1016_v24 = vsub.f32 0.0, %v770_v18  ;;  %v1075_v26 = vsel %vm1074_vm11, %v4092_v16, %v1073_v17 }
 0x17b   : > { %v1078_v27 = vsel %vm1076_vm12, %v1077_v19, %v1075_v26  ;;  %v860_v10 = vmul.f32 %v3531_v59, %v859_v20  ;;  %v1083_v28 = vsub.f32 1.5, %v1082_v21  ;;  %v868_v29 = vmul.f32 %v3535_v22, %v4119_v60 }
 0x17c   : > { %v3537_v30 = vpop.eup %3536  ;;  %3538 = vrsqrt.f32 %v4141_v23  ;;  %v4146_v31 = vmax.f32 %v1016_v24, 0.0  ;;  %v4148_v33 = vsub.f32 %v854_v25, %v1078_v27  ;;  %vm886_vm6 = vcmp.eq.f32.partialorder %v4141_v23, inf }
 0x17d   : > { %v861_v34 = vmul.f32 %v860_v10, %v4096_v32  ;;  %v1084_v35 = vmul.f32 %v3533_v3, %v1083_v28  ;;  %v869_v37 = vmul.f32 %v3535_v22, %v868_v29  ;;  %v1092_v39 = vmul.f32 %v3537_v30, %v4125_v4 }
 0x17e   : > { %3540 = vrsqrt.f32 %v4146_v31  ;;  %v1253_v16 = vmul.f32 %v4148_v33, %v4148_v33  ;;  %v877_v3 = vand.u32 2147483648, %v4119_v60  ;;  %vm888_vm7 = vcmp.eq.f32.partialorder %v4141_v23, 0.0 }
 0x17f   : > { %v863_v40 = vsel %vm862_vm13, %v4096_v32, %v861_v34  ;;  %v1085_v41 = vmul.f32 %v1084_v35, %v4102_v42  ;;  %v870_v43 = vmul.f32 0.5, %v869_v37  ;;  %v1093_v44 = vmul.f32 %v3537_v30, %v1092_v39 }
 0x180   : > { %v1273_v45 = vsel %vm640_vm0, %v1253_v16, 0.0  ;;  %v866_v55 = vsel %vm864_vm14, %v865_v46, %v863_v40  ;;  %v889_v16 = vand.u32 2147483648, %v4141_v23  ;;  %vm1110_vm8 = vcmp.eq.f32.partialorder %v4146_v31, inf }
 0x181   : > { %1274 = vadd.xlane.f32.xlu1 %v1273_v45  ;;  %v773_v48 = vpop.f32.mrf.mxu2  ;;  %v1087_v49 = vsel %vm1086_vm15, %v4102_v42, %v1085_v41  ;;  %v871_v50 = vsub.f32 1.5, %v870_v43  ;;  %v1094_v51 = vmul.f32 0.5, %v1093_v44  ;;  %vm1112_vm9 = vcmp.eq.f32.partialorder %v4146_v31, 0.0 }
 0x182   : > { %v3539_v52 = vpop.eup %3538  ;;  %v4165_v53 = vmax.f32 %v773_v48, 0.0  ;;  %v1017_v54 = vsub.f32 0.0, %v773_v48  ;;  %v1090_v56 = vsel %vm1088_vm1, %v1089_v47, %v1087_v49  ;;  %v1113_v43 = vand.u32 2147483648, %v4146_v31 }
 0x183   : > { %v4169_v57 = vsub.f32 %v866_v55, %v1090_v56  ;;  %v872_v58 = vmul.f32 %v3535_v22, %v871_v50  ;;  %v1095_v59 = vsub.f32 1.5, %v1094_v51  ;;  %v880_v61 = vmul.f32 %v3539_v52, %v4141_v23 }
 0x184   : > { %v3541_v63 = vpop.eup %3540  ;;  %3542 = vrsqrt.f32 %v4165_v53  ;;  %v4173_v42 = vmax.f32 %v1017_v54, 0.0  ;;  %vm898_vm10 = vcmp.eq.f32.partialorder %v4165_v53, inf  ;;  %vm900_vm11 = vcmp.eq.f32.partialorder %v4165_v53, 0.0 }
 0x185   : > { %v1254_v0 = vmul.f32 %v4169_v57, %v4169_v57  ;;  %v873_v62 = vmul.f32 %v872_v58, %v4119_v60  ;;  %v1096_v38 = vmul.f32 %v3537_v30, %v1095_v59  ;;  %v881_v32 = vmul.f32 %v3539_v52, %v880_v61 }
 0x186   : > { %3544 = vrsqrt.f32 %v4173_v42  ;;  %v1104_v5 = vmul.f32 %v3541_v63, %v4146_v31  ;;  %vm1122_vm12 = vcmp.eq.f32.partialorder %v4173_v42, inf  ;;  %vm1124_vm13 = vcmp.eq.f32.partialorder %v4173_v42, 0.0 }
 0x187   : > { %v1276_v2 = vsel %vm640_vm0, %v1254_v0, 0.0  ;;  %v875_v6 = vsel %vm874_vm2, %v4119_v60, %v873_v62  ;;  %v1097_v7 = vmul.f32 %v1096_v38, %v4125_v4  ;;  %v882_v8 = vmul.f32 0.5, %v881_v32 }
 0x188   : > { %v1105_v11 = vmul.f32 %v3541_v63, %v1104_v5  ;;  %v878_v13 = vsel %vm876_vm3, %v877_v3, %v875_v6  ;;  %v1125_v6 = vand.u32 2147483648, %v4173_v42 }
 0x189   : > { %1277 = vadd.xlane.f32.xlu1 %v1276_v2  ;;  %v776_v12 = vpop.f32.mrf.mxu2  ;;  %v1099_v14 = vsel %vm1098_vm4, %v4125_v4, %v1097_v7  ;;  %v883_v15 = vsub.f32 1.5, %v882_v8  ;;  %v901_v2 = vand.u32 2147483648, %v4165_v53 }
 0x18a   : > { %v3543_v17 = vpop.eup %3542  ;;  %v4190_v18 = vmax.f32 %v776_v12, 0.0  ;;  %v1018_v19 = vsub.f32 0.0, %v776_v12  ;;  %v1102_v20 = vsel %vm1100_vm5, %v1101_v9, %v1099_v14  ;;  %v1106_v21 = vmul.f32 0.5, %v1105_v11 }
 0x18b   : > { %v4192_v60 = vsub.f32 %v878_v13, %v1102_v20  ;;  %v884_v22 = vmul.f32 %v3539_v52, %v883_v15  ;;  %v892_v24 = vmul.f32 %v3543_v17, %v4165_v53 }
 0x18c   : > { %v3545_v25 = vpop.eup %3544  ;;  %3546 = vrsqrt.f32 %v4190_v18  ;;  %v4196_v26 = vmax.f32 %v1018_v19, 0.0  ;;  %v1107_v27 = vsub.f32 1.5, %v1106_v21  ;;  %vm910_vm14 = vcmp.eq.f32.partialorder %v4190_v18, inf }
 0x18d   : > { %v1255_v4 = vmul.f32 %v4192_v60, %v4192_v60  ;;  %v885_v10 = vmul.f32 %v884_v22, %v4141_v23  ;;  %v893_v28 = vmul.f32 %v3543_v17, %v892_v24  ;;  %v1116_v29 = vmul.f32 %v3545_v25, %v4173_v42 }
 0x18e   : > { %3548 = vrsqrt.f32 %v4196_v26  ;;  %v1108_v30 = vmul.f32 %v3541_v63, %v1107_v27  ;;  %vm912_vm15 = vcmp.eq.f32.partialorder %v4190_v18, 0.0  ;;  %vm1134_vm1 = vcmp.eq.f32.partialorder %v4196_v26, inf }
 0x18f   : > { %v1279_v34 = vsel %vm640_vm0, %v1255_v4, 0.0  ;;  %v887_v35 = vsel %vm886_vm6, %v4141_v23, %v885_v10  ;;  %v894_v37 = vmul.f32 0.5, %v893_v28  ;;  %v1117_v39 = vmul.f32 %v3545_v25, %v1116_v29 }
 0x190   : > { %1280 = vadd.xlane.f32.xlu2 %v1279_v34  ;;  %v1109_v40 = vmul.f32 %v1108_v30, %v4146_v31  ;;  %v890_v49 = vsel %vm888_vm7, %v889_v16, %v887_v35  ;;  %v913_v10 = vand.u32 2147483648, %v4190_v18  ;;  %vm1136_vm2 = vcmp.eq.f32.partialorder %v4196_v26, 0.0 }
 0x191   : > { %v779_v41 = vpop.f32.mrf.mxu2  ;;  %v895_v44 = vsub.f32 1.5, %v894_v37  ;;  %v1118_v45 = vmul.f32 0.5, %v1117_v39  ;;  %v1137_v37 = vand.u32 2147483648, %v4196_v26 }
 0x192   : > { %v3547_v46 = vpop.eup %3546  ;;  %v4212_v47 = vmax.f32 %v779_v41, 0.0  ;;  %v1019_v48 = vsub.f32 0.0, %v779_v41  ;;  %v1111_v50 = vsel %vm1110_vm8, %v4146_v31, %v1109_v40 }
 0x193   : > { %v1114_v51 = vsel %vm1112_vm9, %v1113_v43, %v1111_v50  ;;  %v896_v23 = vmul.f32 %v3543_v17, %v895_v44  ;;  %v1119_v52 = vsub.f32 1.5, %v1118_v45  ;;  %v904_v54 = vmul.f32 %v3547_v46, %v4190_v18 }
 0x194   : > { %v3549_v55 = vpop.eup %3548  ;;  %3550 = vrsqrt.f32 %v4212_v47  ;;  %v4217_v56 = vmax.f32 %v1019_v48, 0.0  ;;  %v4219_v58 = vsub.f32 %v890_v49, %v1114_v51  ;;  %vm922_vm3 = vcmp.eq.f32.partialorder %v4212_v47, inf }
 0x195   : > { %v897_v59 = vmul.f32 %v896_v23, %v4165_v53  ;;  %v1120_v61 = vmul.f32 %v3545_v25, %v1119_v52  ;;  %v905_v63 = vmul.f32 %v3547_v46, %v904_v54  ;;  %v1128_v0 = vmul.f32 %v3549_v55, %v4196_v26 }
 0x196   : > { %3552 = vrsqrt.f32 %v4217_v56  ;;  %v1256_v31 = vmul.f32 %v4219_v58, %v4219_v58  ;;  %vm924_vm4 = vcmp.eq.f32.partialorder %v4212_v47, 0.0  ;;  %vm1146_vm5 = vcmp.eq.f32.partialorder %v4217_v56, inf }
 0x197   : > { %v899_v62 = vsel %vm898_vm10, %v4165_v53, %v897_v59  ;;  %v1121_v38 = vmul.f32 %v1120_v61, %v4173_v42  ;;  %v906_v32 = vmul.f32 0.5, %v905_v63  ;;  %v1129_v3 = vmul.f32 %v3549_v55, %v1128_v0 }
 0x198   : > { %v1282_v5 = vsel %vm640_vm0, %v1256_v31, 0.0  ;;  %v902_v15 = vsel %vm900_vm11, %v901_v2, %v899_v62  ;;  %vm1148_vm6 = vcmp.eq.f32.partialorder %v4217_v56, 0.0  ;;  %v1149_v2 = vand.u32 2147483648, %v4217_v56 }
 0x199   : > { %1283 = vadd.xlane.f32.xlu2 %v1282_v5  ;;  %v782_v7 = vpop.f32.mrf.mxu2  ;;  %v1123_v8 = vsel %vm1122_vm12, %v4173_v42, %v1121_v38  ;;  %v907_v9 = vsub.f32 1.5, %v906_v32  ;;  %v1130_v11 = vmul.f32 0.5, %v1129_v3  ;;  %v925_v32 = vand.u32 2147483648, %v4212_v47 }
 0x19a   : > { %v3551_v12 = vpop.eup %3550  ;;  %v4236_v13 = vmax.f32 %v782_v7, 0.0  ;;  %v1020_v14 = vsub.f32 0.0, %v782_v7  ;;  %v1126_v17 = vsel %vm1124_vm13, %v1125_v6, %v1123_v8 }
 0x19b   : > { %v4240_v19 = vsub.f32 %v902_v15, %v1126_v17  ;;  %v908_v20 = vmul.f32 %v3547_v46, %v907_v9  ;;  %v1131_v21 = vsub.f32 1.5, %v1130_v11  ;;  %v916_v22 = vmul.f32 %v3551_v12, %v4212_v47 }
 0x19c   : > { %v3553_v24 = vpop.eup %3552  ;;  %3554 = vrsqrt.f32 %v4236_v13  ;;  %v4244_v42 = vmax.f32 %v1020_v14, 0.0  ;;  %vm934_vm7 = vcmp.eq.f32.partialorder %v4236_v13, inf  ;;  %vm936_vm8 = vcmp.eq.f32.partialorder %v4236_v13, 0.0 }
 0x19d   : > { %v1257_v25 = vmul.f32 %v4240_v19, %v4240_v19  ;;  %v909_v27 = vmul.f32 %v908_v20, %v4190_v18  ;;  %v1132_v4 = vmul.f32 %v3549_v55, %v1131_v21  ;;  %v917_v53 = vmul.f32 %v3551_v12, %v916_v22 }
 0x19e   : > { %3556 = vrsqrt.f32 %v4244_v42  ;;  %v1140_v28 = vmul.f32 %v3553_v24, %v4217_v56  ;;  %vm1158_vm9 = vcmp.eq.f32.partialorder %v4244_v42, inf  ;;  %vm1160_vm10 = vcmp.eq.f32.partialorder %v4244_v42, 0.0 }
 0x19f   : > { %v1285_v29 = vsel %vm640_vm0, %v1257_v25, 0.0  ;;  %v911_v30 = vsel %vm910_vm14, %v4190_v18, %v909_v27  ;;  %v1133_v34 = vmul.f32 %v1132_v4, %v4196_v26  ;;  %v918_v35 = vmul.f32 0.5, %v917_v53 }
 0x1a0   : > { %1286 = vadd.xlane.f32.xlu0 %v1285_v29  ;;  %v1141_v39 = vmul.f32 %v3553_v24, %v1140_v28  ;;  %v914_v40 = vsel %vm912_vm15, %v913_v10, %v911_v30 }
 0x1a1   : > { %v785_v16 = vpop.f32.mrf.mxu2  ;;  %v1135_v41 = vsel %vm1134_vm1, %v4196_v26, %v1133_v34  ;;  %v919_v43 = vsub.f32 1.5, %v918_v35  ;;  %v937_v35 = vand.u32 2147483648, %v4236_v13 }
 0x1a2   : > { %v3555_v44 = vpop.eup %3554  ;;  %v4261_v45 = vmax.f32 %v785_v16, 0.0  ;;  %v1021_v46 = vsub.f32 0.0, %v785_v16  ;;  %v1138_v48 = vsel %vm1136_vm2, %v1137_v37, %v1135_v41  ;;  %v1142_v49 = vmul.f32 0.5, %v1141_v39 }
 0x1a3   : > { %v4263_v50 = vsub.f32 %v914_v40, %v1138_v48  ;;  %v920_v18 = vmul.f32 %v3551_v12, %v919_v43  ;;  %v928_v51 = vmul.f32 %v3555_v44, %v4236_v13  ;;  %v1161_v37 = vand.u32 2147483648, %v4244_v42 }
 0x1a4   : > { %v3557_v23 = vpop.eup %3556  ;;  %3558 = vrsqrt.f32 %v4261_v45  ;;  %v4267_v52 = vmax.f32 %v1021_v46, 0.0  ;;  %v1143_v54 = vsub.f32 1.5, %v1142_v49  ;;  %vm946_vm11 = vcmp.eq.f32.partialorder %v4261_v45, inf }
 0x1a5   : > { %v1258_v26 = vmul.f32 %v4263_v50, %v4263_v50  ;;  %v921_v55 = vmul.f32 %v920_v18, %v4212_v47  ;;  %v929_v59 = vmul.f32 %v3555_v44, %v928_v51  ;;  %v1152_v61 = vmul.f32 %v3557_v23, %v4244_v42 }
 0x1a6   : > { %3560 = vrsqrt.f32 %v4267_v52  ;;  %v1144_v63 = vmul.f32 %v3553_v24, %v1143_v54  ;;  %vm948_vm12 = vcmp.eq.f32.partialorder %v4261_v45, 0.0  ;;  %vm1170_vm13 = vcmp.eq.f32.partialorder %v4267_v52, inf }
 0x1a7   : > { %v1288_v0 = vsel %vm640_vm0, %v1258_v26, 0.0  ;;  %v923_v31 = vsel %vm922_vm3, %v4212_v47, %v921_v55  ;;  %v930_v62 = vmul.f32 0.5, %v929_v59  ;;  %v1153_v38 = vmul.f32 %v3557_v23, %v1152_v61 }
 0x1a8   : > { %1289 = vadd.xlane.f32.xlu1 %v1288_v0  ;;  %v1145_v3 = vmul.f32 %v1144_v63, %v4217_v56  ;;  %v926_v12 = vsel %vm924_vm4, %v925_v32, %v923_v31  ;;  %v949_v63 = vand.u32 2147483648, %v4261_v45  ;;  %vm1172_vm14 = vcmp.eq.f32.partialorder %v4267_v52, 0.0 }
 0x1a9   : > { %v788_v5 = vpop.f32.mrf.mxu2  ;;  %v931_v6 = vsub.f32 1.5, %v930_v62  ;;  %v1154_v7 = vmul.f32 0.5, %v1153_v38 }
 0x1aa   : > { %v3559_v8 = vpop.eup %3558  ;;  %v4283_v9 = vmax.f32 %v788_v5, 0.0  ;;  %v1022_v11 = vsub.f32 0.0, %v788_v5  ;;  %v1147_v14 = vsel %vm1146_vm5, %v4217_v56, %v1145_v3  ;;  %v1173_v3 = vand.u32 2147483648, %v4267_v52 }
 0x1ab   : > { %v1150_v15 = vsel %vm1148_vm6, %v1149_v2, %v1147_v14  ;;  %v932_v47 = vmul.f32 %v3555_v44, %v931_v6  ;;  %v1155_v17 = vsub.f32 1.5, %v1154_v7  ;;  %v940_v20 = vmul.f32 %v3559_v8, %v4261_v45 }
 0x1ac   : > { %v3561_v21 = vpop.eup %3560  ;;  %3562 = vrsqrt.f32 %v4283_v9  ;;  %v4288_v22 = vmax.f32 %v1022_v11, 0.0  ;;  %v4290_v24 = vsub.f32 %v926_v12, %v1150_v15  ;;  %vm958_vm15 = vcmp.eq.f32.partialorder %v4283_v9, inf }
 0x1ad   : > { %v933_v25 = vmul.f32 %v932_v47, %v4236_v13  ;;  %v1156_v27 = vmul.f32 %v3557_v23, %v1155_v17  ;;  %v941_v4 = vmul.f32 %v3559_v8, %v940_v20  ;;  %v1164_v53 = vmul.f32 %v3561_v21, %v4267_v52 }
 0x1ae   : > { %3564 = vrsqrt.f32 %v4288_v22  ;;  %v1259_v56 = vmul.f32 %v4290_v24, %v4290_v24  ;;  %vm960_vm1 = vcmp.eq.f32.partialorder %v4283_v9, 0.0  ;;  %vm1182_vm2 = vcmp.eq.f32.partialorder %v4288_v22, inf }
 0x1af   : > { %v935_v10 = vsel %vm934_vm7, %v4236_v13, %v933_v25  ;;  %v1157_v28 = vmul.f32 %v1156_v27, %v4244_v42  ;;  %v942_v29 = vmul.f32 0.5, %v941_v4  ;;  %v1165_v30 = vmul.f32 %v3561_v21, %v1164_v53 }
 0x1b0   : > { %v1291_v34 = vsel %vm640_vm0, %v1259_v56, 0.0  ;;  %v938_v48 = vsel %vm936_vm8, %v937_v35, %v935_v10  ;;  %v961_v35 = vand.u32 2147483648, %v4283_v9  ;;  %vm1184_vm3 = vcmp.eq.f32.partialorder %v4288_v22, 0.0 }
 0x1b1   : > { %1292 = vadd.xlane.f32.xlu2 %v1291_v34  ;;  %v791_v39 = vpop.f32.mrf.mxu2  ;;  %v1159_v16 = vsel %vm1158_vm9, %v4244_v42, %v1157_v28  ;;  %v943_v40 = vsub.f32 1.5, %v942_v29  ;;  %v1166_v41 = vmul.f32 0.5, %v1165_v30 }
 0x1b2   : > { %v3563_v43 = vpop.eup %3562  ;;  %v4307_v44 = vmax.f32 %v791_v39, 0.0  ;;  %v1023_v46 = vsub.f32 0.0, %v791_v39  ;;  %v1162_v49 = vsel %vm1160_vm10, %v1161_v37, %v1159_v16  ;;  %v1185_v16 = vand.u32 2147483648, %v4288_v22 }
 0x1b3   : > { %v4311_v18 = vsub.f32 %v938_v48, %v1162_v49  ;;  %v944_v51 = vmul.f32 %v3559_v8, %v943_v40  ;;  %v1167_v23 = vsub.f32 1.5, %v1166_v41  ;;  %v952_v54 = vmul.f32 %v3563_v43, %v4283_v9 }
 0x1b4   : > { %v3565_v26 = vpop.eup %3564  ;;  %3566 = vrsqrt.f32 %v4307_v44  ;;  %v4315_v42 = vmax.f32 %v1023_v46, 0.0  ;;  %vm970_vm4 = vcmp.eq.f32.partialorder %v4307_v44, inf  ;;  %vm972_vm5 = vcmp.eq.f32.partialorder %v4307_v44, 0.0 }
 0x1b5   : > { %v1260_v55 = vmul.f32 %v4311_v18, %v4311_v18  ;;  %v945_v59 = vmul.f32 %v944_v51, %v4261_v45  ;;  %v1168_v61 = vmul.f32 %v3561_v21, %v1167_v23  ;;  %v953_v13 = vmul.f32 %v3563_v43, %v952_v54 }
 0x1b6   : > { %3568 = vrsqrt.f32 %v4315_v42  ;;  %v1176_v0 = vmul.f32 %v3565_v26, %v4288_v22  ;;  %vm1194_vm6 = vcmp.eq.f32.partialorder %v4315_v42, inf  ;;  %vm1196_vm7 = vcmp.eq.f32.partialorder %v4315_v42, 0.0 }
 0x1b7   : > { %v1294_v31 = vsel %vm640_vm0, %v1260_v55, 0.0  ;;  %v947_v62 = vsel %vm946_vm11, %v4261_v45, %v945_v59  ;;  %v1169_v38 = vmul.f32 %v1168_v61, %v4267_v52  ;;  %v954_v32 = vmul.f32 0.5, %v953_v13 }
 0x1b8   : > { %1295 = vadd.xlane.f32.xlu0 %v1294_v31  ;;  %v1177_v5 = vmul.f32 %v3565_v26, %v1176_v0  ;;  %v950_v6 = vsel %vm948_vm12, %v949_v63, %v947_v62 }
 0x1b9   : > { %v794_v2 = vpop.f32.mrf.mxu2  ;;  %v1171_v7 = vsel %vm1170_vm13, %v4267_v52, %v1169_v38  ;;  %v955_v8 = vsub.f32 1.5, %v954_v32 }
 0x1ba   : > { %v3567_v11 = vpop.eup %3566  ;;  %v4332_v12 = vmax.f32 %v794_v2, 0.0  ;;  %v1024_v14 = vsub.f32 0.0, %v794_v2  ;;  %v1174_v15 = vsel %vm1172_vm14, %v1173_v3, %v1171_v7  ;;  %v1178_v47 = vmul.f32 0.5, %v1177_v5 }
 0x1bb   : > { %v4334_v17 = vsub.f32 %v950_v6, %v1174_v15  ;;  %v956_v45 = vmul.f32 %v3563_v43, %v955_v8  ;;  %v964_v20 = vmul.f32 %v3567_v11, %v4307_v44  ;;  %v973_v2 = vand.u32 2147483648, %v4307_v44 }
 0x1bc   : > { %v3569_v21 = vpop.eup %3568  ;;  %3570 = vrsqrt.f32 %v4332_v12  ;;  %v4338_v25 = vmax.f32 %v1024_v14, 0.0  ;;  %v1179_v27 = vsub.f32 1.5, %v1178_v47  ;;  %v1197_v6 = vand.u32 2147483648, %v4315_v42 }
 0x1bd   : > { %v1261_v52 = vmul.f32 %v4334_v17, %v4334_v17  ;;  %v957_v4 = vmul.f32 %v956_v45, %v4283_v9  ;;  %v965_v53 = vmul.f32 %v3567_v11, %v964_v20  ;;  %v1188_v56 = vmul.f32 %v3569_v21, %v4315_v42 }
 0x1be   : > { %3572 = vrsqrt.f32 %v4338_v25  ;;  %v1180_v10 = vmul.f32 %v3565_v26, %v1179_v27  ;;  %vm982_vm8 = vcmp.eq.f32.partialorder %v4332_v12, inf  ;;  %vm1206_vm9 = vcmp.eq.f32.partialorder %v4338_v25, inf }
 0x1bf   : > { %v1297_v28 = vsel %vm640_vm0, %v1261_v52, 0.0  ;;  %v959_v29 = vsel %vm958_vm15, %v4283_v9, %v957_v4  ;;  %v966_v30 = vmul.f32 0.5, %v965_v53  ;;  %v1189_v34 = vmul.f32 %v3569_v21, %v1188_v56 }
 0x1c0   : > { %1298 = vadd.xlane.f32.xlu1 %v1297_v28  ;;  %v1181_v37 = vmul.f32 %v1180_v10, %v4288_v22  ;;  %v962_v49 = vsel %vm960_vm1, %v961_v35, %v959_v29  ;;  %vm984_vm10 = vcmp.eq.f32.partialorder %v4332_v12, 0.0  ;;  %vm1208_vm11 = vcmp.eq.f32.partialorder %v4338_v25, 0.0 }
 0x1c1   : > { %v797_v39 = vpop.f32.mrf.mxu2  ;;  %v967_v40 = vsub.f32 1.5, %v966_v30  ;;  %v1190_v41 = vmul.f32 0.5, %v1189_v34 }
 0x1c2   : > { %v3571_v43 = vpop.eup %3570  ;;  %v4354_v46 = vmax.f32 %v797_v39, 0.0  ;;  %v1025_v48 = vsub.f32 0.0, %v797_v39  ;;  %v1183_v51 = vsel %vm1182_vm2, %v4288_v22, %v1181_v37 }
 0x1c3   : > { %v1186_v23 = vsel %vm1184_vm3, %v1185_v16, %v1183_v51  ;;  %v968_v9 = vmul.f32 %v3567_v11, %v967_v40  ;;  %v1191_v54 = vsub.f32 1.5, %v1190_v41  ;;  %v976_v26 = vmul.f32 %v3571_v43, %v4332_v12 }
 0x1c4   : > { %v3573_v55 = vpop.eup %3572  ;;  %3574 = vrsqrt.f32 %v4354_v46  ;;  %v4359_v59 = vmax.f32 %v1025_v48, 0.0  ;;  %v4361_v61 = vsub.f32 %v962_v49, %v1186_v23  ;;  %v985_v16 = vand.u32 2147483648, %v4332_v12 }
 0x1c5   : > { %v969_v13 = vmul.f32 %v968_v9, %v4307_v44  ;;  %v1192_v63 = vmul.f32 %v3569_v21, %v1191_v54  ;;  %v977_v0 = vmul.f32 %v3571_v43, %v976_v26  ;;  %v1200_v31 = vmul.f32 %v3573_v55, %v4338_v25 }
 0x1c6   : > { %3576 = vrsqrt.f32 %v4359_v59  ;;  %v1262_v22 = vmul.f32 %v4361_v61, %v4361_v61  ;;  %v1209_v40 = vand.u32 2147483648, %v4338_v25  ;;  %vm994_vm12 = vcmp.eq.f32.partialorder %v4354_v46, inf }
 0x1c7   : > { %v971_v62 = vsel %vm970_vm4, %v4307_v44, %v969_v13  ;;  %v1193_v38 = vmul.f32 %v1192_v63, %v4315_v42  ;;  %v978_v32 = vmul.f32 0.5, %v977_v0  ;;  %v1201_v3 = vmul.f32 %v3573_v55, %v1200_v31 }
 0x1c8   : > { %v1300_v5 = vsel %vm640_vm0, %v1262_v22, 0.0  ;;  %v974_v20 = vsel %vm972_vm5, %v973_v2, %v971_v62  ;;  %vm1218_vm13 = vcmp.eq.f32.partialorder %v4359_v59, inf  ;;  %vm996_vm14 = vcmp.eq.f32.partialorder %v4354_v46, 0.0 }
 0x1c9   : > { %1301 = vadd.xlane.f32.xlu2 %v1300_v5  ;;  %v800_v7 = vpop.f32.mrf.mxu2  ;;  %v1195_v8 = vsel %vm1194_vm6, %v4315_v42, %v1193_v38  ;;  %v979_v11 = vsub.f32 1.5, %v978_v32  ;;  %v1202_v14 = vmul.f32 0.5, %v1201_v3  ;;  %v997_v5 = vand.u32 2147483648, %v4354_v46 }
 0x1ca   : > { %v3575_v15 = vpop.eup %3574  ;;  %v4378_v47 = vmax.f32 %v800_v7, 0.0  ;;  %v1026_v45 = vsub.f32 0.0, %v800_v7  ;;  %v1198_v21 = vsel %vm1196_vm7, %v1197_v6, %v1195_v8  ;;  %v1221_v6 = vand.u32 2147483648, %v4359_v59 }
 0x1cb   : > { %v4382_v27 = vsub.f32 %v974_v20, %v1198_v21  ;;  %v980_v52 = vmul.f32 %v3571_v43, %v979_v11  ;;  %v1203_v4 = vsub.f32 1.5, %v1202_v14  ;;  %v988_v53 = vmul.f32 %v3575_v15, %v4354_v46 }
 0x1cc   : > { %v3577_v56 = vpop.eup %3576  ;;  %3578 = vrsqrt.f32 %v4378_v47  ;;  %v4386_v42 = vmax.f32 %v1026_v45, 0.0  ;;  %vm1220_vm15 = vcmp.eq.f32.partialorder %v4359_v59, 0.0  ;;  %vm1006_vm1 = vcmp.eq.f32.partialorder %v4378_v47, inf }
 0x1cd   : > { %v1263_v10 = vmul.f32 %v4382_v27, %v4382_v27  ;;  %v981_v28 = vmul.f32 %v980_v52, %v4332_v12  ;;  %v1204_v29 = vmul.f32 %v3573_v55, %v1203_v4  ;;  %v989_v44 = vmul.f32 %v3575_v15, %v988_v53 }
 0x1ce   : > { %3580 = vrsqrt.f32 %v4386_v42  ;;  %v1212_v30 = vmul.f32 %v3577_v56, %v4359_v59  ;;  %vm1230_vm2 = vcmp.eq.f32.partialorder %v4386_v42, inf  ;;  %vm1008_vm3 = vcmp.eq.f32.partialorder %v4378_v47, 0.0 }
 0x1cf   : > { %v1303_v34 = vsel %vm640_vm0, %v1263_v10, 0.0  ;;  %v983_v35 = vsel %vm982_vm8, %v4332_v12, %v981_v28  ;;  %v1205_v37 = vmul.f32 %v1204_v29, %v4338_v25  ;;  %v990_v39 = vmul.f32 0.5, %v989_v44 }
 0x1d0   : > { %1304 = vadd.xlane.f32.xlu0 %v1303_v34  ;;  %v1213_v41 = vmul.f32 %v3577_v56, %v1212_v30  ;;  %v986_v51 = vsel %vm984_vm10, %v985_v16, %v983_v35  ;;  %v1009_v10 = vand.u32 2147483648, %v4378_v47  ;;  %v1233_v28 = vand.u32 2147483648, %v4386_v42 }
 0x1d1   : > { %v1207_v43 = vsel %vm1206_vm9, %v4338_v25, %v1205_v37  ;;  %v991_v48 = vsub.f32 1.5, %v990_v39  ;;  %vm1232_vm4 = vcmp.eq.f32.partialorder %v4386_v42, 0.0 }
 0x1d2   : > { %v3579_v49 = vpop.eup %3578  ;;  %v1210_v23 = vsel %vm1208_vm11, %v1209_v40, %v1207_v43  ;;  %v1214_v9 = vmul.f32 0.5, %v1213_v41 }
 0x1d3   : > { %v4403_v54 = vsub.f32 %v986_v51, %v1210_v23  ;;  %v992_v26 = vmul.f32 %v3575_v15, %v991_v48  ;;  %v1000_v55 = vmul.f32 %v3579_v49, %v4378_v47 }
 0x1d4   : > { %v3581_v13 = vpop.eup %3580  ;;  %v1215_v63 = vsub.f32 1.5, %v1214_v9 }
 0x1d5   : > { %v1264_v0 = vmul.f32 %v4403_v54, %v4403_v54  ;;  %v993_v12 = vmul.f32 %v992_v26, %v4354_v46  ;;  %v1001_v31 = vmul.f32 %v3579_v49, %v1000_v55  ;;  %v1224_v25 = vmul.f32 %v3581_v13, %v4386_v42 }
 0x1d6   : > { %v1216_v22 = vmul.f32 %v3577_v56, %v1215_v63 }
 0x1d7   : > { %v1306_v62 = vsel %vm640_vm0, %v1264_v0, 0.0  ;;  %v1002_v38 = vmul.f32 0.5, %v1001_v31  ;;  %v1225_v32 = vmul.f32 %v3581_v13, %v1224_v25  ;;  %v995_v3 = vsel %vm994_vm12, %v4354_v46, %v993_v12 }
 0x1d8   : > { %1307 = vadd.xlane.f32.xlu1 %v1306_v62  ;;  %v1217_v2 = vmul.f32 %v1216_v22, %v4359_v59  ;;  %v998_v14 = vsel %vm996_vm14, %v997_v5, %v995_v3 }
 0x1d9   : > { %v1003_v7 = vsub.f32 1.5, %v1002_v38  ;;  %v1226_v8 = vmul.f32 0.5, %v1225_v32 }
 0x1da   : > { %v1219_v11 = vsel %vm1218_vm13, %v4359_v59, %v1217_v2 }
 0x1db   : > { %v1222_v15 = vsel %vm1220_vm15, %v1221_v6, %v1219_v11  ;;  %v1004_v45 = vmul.f32 %v3579_v49, %v1003_v7  ;;  %v1227_v20 = vsub.f32 1.5, %v1226_v8  ;;  %v3436_v7 = vld [vmem:[%s5403_s7 + $0x8] sm:$0xff] }
 0x1dc   : > { %v4420_v21 = vsub.f32 %v998_v14, %v1222_v15  ;;  %1917 = vmatpush.bf16.msra.mxu3 %v3436_v7 }
 0x1dd   : > { %v1005_v52 = vmul.f32 %v1004_v45, %v4378_v47  ;;  %v1228_v4 = vmul.f32 %v3581_v13, %v1227_v20 }
 0x1de   : > { %v1265_v53 = vmul.f32 %v4420_v21, %v4420_v21 }
 0x1df   : > { %v1007_v46 = vsel %vm1006_vm1, %v4378_v47, %v1005_v52  ;;  %v1229_v56 = vmul.f32 %v1228_v4, %v4386_v42  ;;  %v3435_v4 = vld [vmem:[%s5403_s7] sm:$0xff] }
 0x1e0   : > { %v1309_v59 = vsel %vm640_vm0, %v1265_v53, 0.0  ;;  %v1010_v44 = vsel %vm1008_vm3, %v1009_v10, %v1007_v46  ;;  %1918 = vmatpush.bf16.msra.mxu3 %v3435_v4 }
 0x1e1   : > { %1310 = vadd.xlane.f32.xlu2 %v1309_v59  ;;  %v1231_v29 = vsel %vm1230_vm2, %v4386_v42, %v1229_v56 }
 0x1e2   : > { %v1234_v30 = vsel %vm1232_vm4, %v1233_v28, %v1231_v29 }
 0x1e3   : > { %v1269_v34 = vpop.xlane.xlu0 %1268  ;;  %v4435_v35 = vsub.f32 %v1010_v44, %v1234_v30 }
 0x1e4   : > { %v1315_v37 = vrot.slane %v1269_v34, 4 }
 0x1e5   : > { %v1266_v39 = vmul.f32 %v4435_v35, %v4435_v35 }
 0x1e6   : > { %v1316_v16 = vadd.f32 %v1315_v37, %v1269_v34 }
 0x1e7   : > { %v1312_v40 = vsel %vm640_vm0, %v1266_v39, 0.0 }
 0x1e8   : > { %v1317_v41 = vrot.slane %v1316_v16, 2  ;;  %1313 = vadd.xlane.f32.xlu0 %v1312_v40 }
 0x1ea   : > { %v1318_v43 = vadd.f32 %v1317_v41, %v1316_v16 }
 0x1eb   : > { %v1272_v47 = vpop.xlane.xlu0 %1271 }
 0x1ec   : > { %v1319_v48 = vrot.slane %v1318_v43, 1  ;;  %v1321_v49 = vrot.slane %v1272_v47, 4 }
 0x1ee   : > { %v1320_v51 = vadd.f32 %v1319_v48, %v1318_v43  ;;  %v1322_v42 = vadd.f32 %v1321_v49, %v1272_v47 }
 0x1f0   : > { %3582 = vrsqrt.f32 %v1320_v51  ;;  %v1323_v23 = vrot.slane %v1322_v42, 2  ;;  %vm1418_vm5 = vcmp.eq.f32.partialorder %v1320_v51, inf  ;;  %v1421_v53 = vand.u32 2147483648, %v1320_v51 }
 0x1f1   : > { %vm1420_vm6 = vcmp.eq.f32.partialorder %v1320_v51, 0.0 }
 0x1f2   : > { %v1324_v9 = vadd.f32 %v1323_v23, %v1322_v42 }
 0x1f4   : > { %v1325_v26 = vrot.slane %v1324_v9, 1  ;;  %v1275_v55 = vpop.xlane.xlu1 %1274 }
 0x1f5   : > { %v1327_v13 = vrot.slane %v1275_v55, 4 }
 0x1f6   : > { %v3583_v63 = vpop.eup %3582  ;;  %v1326_v0 = vadd.f32 %v1325_v26, %v1324_v9 }
 0x1f7   : > { %v1412_v12 = vmul.f32 %v3583_v63, %v1320_v51  ;;  %v1328_v31 = vadd.f32 %v1327_v13, %v1275_v55 }
 0x1f8   : > { %3584 = vrsqrt.f32 %v1326_v0  ;;  %vm1430_vm7 = vcmp.eq.f32.partialorder %v1326_v0, inf  ;;  %vm1432_vm8 = vcmp.eq.f32.partialorder %v1326_v0, 0.0 }
 0x1f9   : > { %v1413_v25 = vmul.f32 %v3583_v63, %v1412_v12  ;;  %v1329_v22 = vrot.slane %v1328_v31, 2 }
 0x1fb   : > { %v1414_v62 = vmul.f32 0.5, %v1413_v25  ;;  %v1330_v38 = vadd.f32 %v1329_v22, %v1328_v31 }
 0x1fc   : > { %v1278_v32 = vpop.xlane.xlu1 %1277 }
 0x1fd   : > { %v1331_v3 = vrot.slane %v1330_v38, 1  ;;  %v1333_v5 = vrot.slane %v1278_v32, 4  ;;  %v1415_v2 = vsub.f32 1.5, %v1414_v62 }
 0x1fe   : > { %v3585_v6 = vpop.eup %3584 }
 0x1ff   : > { %v1424_v8 = vmul.f32 %v3585_v6, %v1326_v0  ;;  %v4443_v11 = vadd.f32 %v1331_v3, %v1330_v38  ;;  %v1334_v14 = vadd.f32 %v1333_v5, %v1278_v32  ;;  %v1416_v15 = vmul.f32 %v3583_v63, %v1415_v2 }
 0x201   : > { %v1425_v45 = vmul.f32 %v3585_v6, %v1424_v8  ;;  %3586 = vrsqrt.f32 %v4443_v11  ;;  %v1335_v20 = vrot.slane %v1334_v14, 2  ;;  %v1417_v52 = vmul.f32 %v1416_v15, %v1320_v51 }
 0x202   : > { %vm1442_vm9 = vcmp.eq.f32.partialorder %v4443_v11, inf  ;;  %vm1444_vm10 = vcmp.eq.f32.partialorder %v4443_v11, 0.0 }
 0x203   : > { %v1426_v46 = vmul.f32 0.5, %v1425_v45  ;;  %v1336_v56 = vadd.f32 %v1335_v20, %v1334_v14  ;;  %v1281_v59 = vpop.xlane.xlu2 %1280  ;;  %v1419_v10 = vsel %vm1418_vm5, %v1320_v51, %v1417_v52  ;;  %v1433_v51 = vand.u32 2147483648, %v1326_v0 }
 0x204   : > { %v1339_v28 = vrot.slane %v1281_v59, 4  ;;  %v1422_v29 = vsel %vm1420_vm6, %v1421_v53, %v1419_v10  ;;  %v1445_v20 = vand.u32 2147483648, %v4443_v11 }
 0x205   : > { %v1337_v44 = vrot.slane %v1336_v56, 1  ;;  %v1427_v30 = vsub.f32 1.5, %v1426_v46  ;;  %v1603_v34 = vmax.f32 %v1422_v29, 1e-12 }
 0x206   : > { %v1340_v37 = vadd.f32 %v1339_v28, %v1281_v59 }
 0x207   : > { %v3587_v39 = vpop.eup %3586  ;;  %v4449_v16 = vadd.f32 %v1337_v44, %v1336_v56  ;;  %v1428_v40 = vmul.f32 %v3585_v6, %v1427_v30  ;;  %3588 = vrcp.f32 %v1603_v34  ;;  %v1628_v7 = vand.u32 2147483647, %v1603_v34 }
 0x208   : > { %v1436_v41 = vmul.f32 %v3587_v39, %v4443_v11  ;;  %v1341_v43 = vrot.slane %v1340_v37, 2  ;;  %v1630_v8 = vand.u32 2147483648, %v1603_v34  ;;  %vm1624_vm12 = vweird.f32 %v1603_v34 }
 0x209   : > { %3590 = vrsqrt.f32 %v4449_v16  ;;  %v1429_v47 = vmul.f32 %v1428_v40, %v1326_v0  ;;  %vm1454_vm13 = vcmp.eq.f32.partialorder %v4449_v16, inf  ;;  %vm4468_vm14 = vcmp.eq.f32.partialorder %v1628_v7, 8.507059e+37 }
 0x20a   : > { %v1437_v48 = vmul.f32 %v3587_v39, %v1436_v41  ;;  %v1342_v49 = vadd.f32 %v1341_v43, %v1340_v37  ;;  %v1631_v44 = vor.u32 1.1754944e-38, %v1630_v8  ;;  %vm1456_vm15 = vcmp.eq.f32.partialorder %v4449_v16, 0.0 }
 0x20b   : > { %v1431_v42 = vsel %vm1430_vm7, %v1326_v0, %v1429_v47 }
 0x20c   : > { %v1438_v23 = vmul.f32 0.5, %v1437_v48  ;;  %v1343_v9 = vrot.slane %v1342_v49, 1  ;;  %v1284_v26 = vpop.xlane.xlu2 %1283  ;;  %v1434_v55 = vsel %vm1432_vm8, %v1433_v51, %v1431_v42 }
 0x20d   : > { %v3589_v13 = vpop.eup %3588  ;;  %v1345_v63 = vrot.slane %v1284_v26, 4  ;;  %v4453_v12 = vmax.f32 %v1434_v55, 1e-12 }
 0x20e   : > { %v4455_v31 = vadd.f32 %v1343_v9, %v1342_v49  ;;  %v1620_v25 = vmul.f32 %v3589_v13, %v1603_v34  ;;  %v1439_v22 = vsub.f32 1.5, %v1438_v23  ;;  %vm1625_vm11 = vweird.f32 %v3589_v13 }
 0x20f   : > { %v3591_v62 = vpop.eup %3590  ;;  %v1346_v38 = vadd.f32 %v1345_v63, %v1284_v26  ;;  %3592 = vrcp.f32 %v4453_v12  ;;  %vm4477_vm1 = vmor %vm1624_vm12, %vm1625_vm11  ;;  %v1643_v40 = vand.u32 2147483647, %v4453_v12  ;;  %v1645_v42 = vand.u32 2147483648, %v4453_v12 }
 0x210   : > { %v1448_v32 = vmul.f32 %v3591_v62, %v4449_v16  ;;  %3594 = vrsqrt.f32 %v4455_v31  ;;  %v1621_v0 = vsub.f32 1.0, %v1620_v25  ;;  %v1440_v5 = vmul.f32 %v3587_v39, %v1439_v22 }
 0x211   : > { %v1347_v3 = vrot.slane %v1346_v38, 2  ;;  %vm1639_vm3 = vweird.f32 %v4453_v12  ;;  %vm1644_vm5 = vcmp.eq.f32.partialorder %v1643_v40, 8.507059e+37  ;;  %vm1466_vm6 = vcmp.eq.f32.partialorder %v4455_v31, inf }
 0x212   : > { %v1449_v2 = vmul.f32 %v3591_v62, %v1448_v32  ;;  %v1622_v6 = vmul.f32 %v3589_v13, %v1621_v0  ;;  %v1441_v45 = vmul.f32 %v1440_v5, %v4443_v11  ;;  %v1646_v0 = vor.u32 1.1754944e-38, %v1645_v42 }
 0x213   : > { %v1348_v14 = vadd.f32 %v1347_v3, %v1346_v38  ;;  %v1287_v15 = vpop.xlane.xlu0 %1286  ;;  %v1457_v3 = vand.u32 2147483648, %v4449_v16  ;;  %vm1468_vm7 = vcmp.eq.f32.partialorder %v4455_v31, 0.0 }
 0x214   : > { %v1450_v52 = vmul.f32 0.5, %v1449_v2  ;;  %v1351_v4 = vrot.slane %v1287_v15, 4  ;;  %v1623_v53 = vadd.f32 %v3589_v13, %v1622_v6  ;;  %v1443_v59 = vsel %vm1442_vm9, %v4443_v11, %v1441_v45 }
 0x215   : > { %v3593_v46 = vpop.eup %3592  ;;  %v1349_v56 = vrot.slane %v1348_v14, 1  ;;  %v1446_v41 = vsel %vm1444_vm10, %v1445_v20, %v1443_v59 }
 0x216   : > { %v3595_v10 = vpop.eup %3594  ;;  %v1352_v28 = vadd.f32 %v1351_v4, %v1287_v15  ;;  %v1635_v30 = vmul.f32 %v3593_v46, %v4453_v12  ;;  %v1627_v47 = vsel %vm4477_vm1, %v3589_v13, %v1623_v53  ;;  %v1451_v49 = vsub.f32 1.5, %v1450_v52 }
 0x217   : > { %v1460_v37 = vmul.f32 %v3595_v10, %v4455_v31  ;;  %v4475_v34 = vadd.f32 %v1349_v56, %v1348_v14  ;;  %v4488_v23 = vmax.f32 %v1446_v41, 1e-12  ;;  %vm1640_vm2 = vweird.f32 %v3593_v46 }
 0x218   : > { %v1353_v43 = vrot.slane %v1352_v28, 2  ;;  %v1636_v48 = vsub.f32 1.0, %v1635_v30  ;;  %v1452_v55 = vmul.f32 %v3591_v62, %v1451_v49  ;;  %v1632_v25 = vsel %vm4468_vm14, %v1631_v44, %v1627_v47  ;;  %vm1641_vm4 = vmor %vm1639_vm3, %vm1640_vm2 }
 0x219   : > { %v1461_v51 = vmul.f32 %v3595_v10, %v1460_v37  ;;  %3596 = vrsqrt.f32 %v4475_v34  ;;  %v1633_v8 = vmul.f32 %v1632_v25, %v4098_v36  ;;  %vm1478_vm8 = vcmp.eq.f32.partialorder %v4475_v34, inf }
 0x21a   : > { %v1354_v9 = vadd.f32 %v1353_v43, %v1352_v28  ;;  %v1637_v26 = vmul.f32 %v3593_v46, %v1636_v48  ;;  %3598 = vrcp.f32 %v4488_v23  ;;  %v1453_v32 = vmul.f32 %v1452_v55, %v4449_v16 }
 0x21b   : > { %v1462_v63 = vmul.f32 0.5, %v1461_v51  ;;  %v1290_v11 = vpop.xlane.xlu1 %1289  ;;  %vm1654_vm9 = vweird.f32 %v4488_v23  ;;  %v1658_v39 = vand.u32 2147483647, %v4488_v23  ;;  %vm1480_vm10 = vcmp.eq.f32.partialorder %v4475_v34, 0.0 }
 0x21c   : > { %v1355_v13 = vrot.slane %v1354_v9, 1  ;;  %v1357_v22 = vrot.slane %v1290_v11, 4  ;;  %v1638_v38 = vadd.f32 %v3593_v46, %v1637_v26  ;;  %v1455_v12 = vsel %vm1454_vm13, %v4449_v16, %v1453_v32 }
 0x21d   : > { %v1463_v62 = vsub.f32 1.5, %v1462_v63  ;;  %v1458_v15 = vsel %vm1456_vm15, %v1457_v3, %v1455_v12  ;;  %v1660_v48 = vand.u32 2147483648, %v4488_v23  ;;  %vm4542_vm12 = vcmp.eq.f32.partialorder %v1658_v39, 8.507059e+37 }
 0x21e   : > { %v4496_v5 = vadd.f32 %v1355_v13, %v1354_v9  ;;  %v1358_v2 = vadd.f32 %v1357_v22, %v1290_v11  ;;  %v1642_v6 = vsel %vm1641_vm4, %v3593_v46, %v1638_v38  ;;  %v4509_v46 = vmax.f32 %v1458_v15, 1e-12 }
 0x21f   : > { %v3597_v7 = vpop.eup %3596  ;;  %v1647_v14 = vsel %vm1644_vm5, %v1646_v0, %v1642_v6  ;;  %v1464_v45 = vmul.f32 %v3595_v10, %v1463_v62  ;;  %v1661_v38 = vor.u32 1.1754944e-38, %v1660_v48  ;;  %v1481_v0 = vand.u32 2147483648, %v4475_v34 }
 0x220   : > { %v1472_v20 = vmul.f32 %v3597_v7, %v4475_v34  ;;  %3600 = vrsqrt.f32 %v4496_v5  ;;  %v1359_v52 = vrot.slane %v1358_v2, 2  ;;  %v1648_v4 = vmul.f32 %v1647_v14, %v4121_v1  ;;  %v4507_v53 = vpop.eup %3598 }
 0x221   : > { %v1465_v56 = vmul.f32 %v1464_v45, %v4455_v31  ;;  %v1650_v16 = vmul.f32 %v4507_v53, %v4488_v23  ;;  %3602 = vrcp.f32 %v4509_v46  ;;  %v1469_v1 = vand.u32 2147483648, %v4455_v31 }
 0x222   : > { %v1473_v59 = vmul.f32 %v3597_v7, %v1472_v20  ;;  %v1360_v36 = vadd.f32 %v1359_v52, %v1358_v2  ;;  %v1859_v28 = vpack.c.bf16 %v1648_v4, %v1633_v8  ;;  %vm1655_vm11 = vweird.f32 %v4507_v53 }
 0x223   : > { %v1651_v30 = vsub.f32 1.0, %v1650_v16  ;;  %v1467_v40 = vsel %vm1466_vm6, %v4455_v31, %v1465_v56  ;;  %v1673_v63 = vand.u32 2147483647, %v4509_v46  ;;  %vm1669_vm13 = vweird.f32 %v4509_v46  ;;  %vm4555_vm14 = vmor %vm1654_vm9, %vm1655_vm11 }
 0x224   : > { %v1474_v10 = vmul.f32 0.5, %v1473_v59  ;;  %v1361_v29 = vrot.slane %v1360_v36, 1  ;;  %v1293_v44 = vpop.xlane.xlu2 %1292  ;;  %3374 = vmatmul.msk.bf16.vlgmr.msra.gmra.mxu3 %vm640_vm0, %v1859_v28  ;;  %v1470_v49 = vsel %vm1468_vm7, %v1469_v1, %v1467_v40  ;;  %v1675_v2 = vand.u32 2147483648, %v4509_v46 }
 0x225   : > { %v1363_v37 = vrot.slane %v1293_v44, 4  ;;  %v1652_v47 = vmul.f32 %v4507_v53, %v1651_v30  ;;  %v4534_v26 = vmax.f32 %v1470_v49, 1e-12  ;;  %vm4559_vm15 = vcmp.eq.f32.partialorder %v1673_v63, 8.507059e+37 }
 0x226   : > { %v4524_v41 = vpop.eup %3600  ;;  %v4526_v43 = vadd.f32 %v1361_v29, %v1360_v36  ;;  %v1475_v9 = vsub.f32 1.5, %v1474_v10  ;;  %v1493_v15 = vand.u32 2147483648, %v4496_v5  ;;  %v1676_v10 = vor.u32 1.1754944e-38, %v1675_v2 }
 0x227   : > { %v1484_v51 = vmul.f32 %v4524_v41, %v4496_v5  ;;  %v1364_v42 = vadd.f32 %v1363_v37, %v1293_v44  ;;  %v1653_v55 = vadd.f32 %v4507_v53, %v1652_v47  ;;  %v3603_v11 = vpop.eup %3602  ;;  %vm1490_vm2 = vcmp.eq.f32.partialorder %v4496_v5, inf }
 0x228   : > { %3604 = vrsqrt.f32 %v4526_v43  ;;  %v1476_v13 = vmul.f32 %v3597_v7, %v1475_v9  ;;  %v1665_v32 = vmul.f32 %v3603_v11, %v4509_v46  ;;  %vm1670_vm1 = vweird.f32 %v3603_v11 }
 0x229   : > { %v1485_v25 = vmul.f32 %v4524_v41, %v1484_v51  ;;  %v1365_v31 = vrot.slane %v1364_v42, 2  ;;  %3606 = vrcp.f32 %v4534_v26  ;;  %v1657_v52 = vsel %vm4555_vm14, %v4507_v53, %v1653_v55  ;;  %vm1671_vm3 = vmor %vm1669_vm13, %vm1670_vm1 }
 0x22a   : > { %v1477_v6 = vmul.f32 %v1476_v13, %v4475_v34  ;;  %v1666_v8 = vsub.f32 1.0, %v1665_v32  ;;  %v1662_v44 = vsel %vm4542_vm12, %v1661_v38, %v1657_v52  ;;  %v1688_v39 = vand.u32 2147483647, %v4534_v26 }
 0x22b   : > { %v1366_v3 = vadd.f32 %v1365_v31, %v1364_v42  ;;  %v1296_v62 = vpop.xlane.xlu0 %1295  ;;  %v1486_v45 = vmul.f32 0.5, %v1485_v25  ;;  %vm1492_vm4 = vcmp.eq.f32.partialorder %v4496_v5, 0.0  ;;  %v1663_v9 = vmul.f32 %v1662_v44, %v4148_v33 }
 0x22c   : > { %v1369_v12 = vrot.slane %v1296_v62, 4  ;;  %v1479_v23 = vsel %vm1478_vm8, %v4475_v34, %v1477_v6  ;;  %v1667_v59 = vmul.f32 %v3603_v11, %v1666_v8  ;;  %v1690_v46 = vand.u32 2147483648, %v4534_v26 }
 0x22d   : > { %v1367_v20 = vrot.slane %v1366_v3, 1  ;;  %v1482_v36 = vsel %vm1480_vm10, %v1481_v0, %v1479_v23  ;;  %v1487_v40 = vsub.f32 1.5, %v1486_v45  ;;  %vm1502_vm5 = vcmp.eq.f32.partialorder %v4526_v43, inf }
 0x22e   : > { %v3605_v4 = vpop.eup %3604  ;;  %v1370_v56 = vadd.f32 %v1369_v12, %v1296_v62  ;;  %v4577_v29 = vmax.f32 %v1482_v36, 1e-12  ;;  %v1668_v30 = vadd.f32 %v3603_v11, %v1667_v59  ;;  %vm1684_vm6 = vweird.f32 %v4534_v26 }
 0x22f   : > { %v4572_v28 = vpop.eup %3606  ;;  %v1496_v16 = vmul.f32 %v3605_v4, %v4526_v43  ;;  %v4575_v1 = vadd.f32 %v1367_v20, %v1366_v3  ;;  %v1488_v22 = vmul.f32 %v4524_v41, %v1487_v40  ;;  %vm1504_vm7 = vcmp.eq.f32.partialorder %v4526_v43, 0.0 }
 0x230   : > { %v1371_v53 = vrot.slane %v1370_v56, 2  ;;  %v1680_v37 = vmul.f32 %v4572_v28, %v4534_v26  ;;  %v1672_v48 = vsel %vm1671_vm3, %v3603_v11, %v1668_v30  ;;  %v1703_v11 = vand.u32 2147483647, %v4577_v29 }
 0x231   : > { %v1497_v34 = vmul.f32 %v3605_v4, %v1496_v16  ;;  %3608 = vrsqrt.f32 %v4575_v1  ;;  %v1677_v55 = vsel %vm4559_vm15, %v1676_v10, %v1672_v48  ;;  %vm4603_vm8 = vcmp.eq.f32.partialorder %v1688_v39, 8.507059e+37 }
 0x232   : > { %v1372_v47 = vadd.f32 %v1371_v53, %v1370_v56  ;;  %v1681_v49 = vsub.f32 1.0, %v1680_v37  ;;  %3610 = vrcp.f32 %v4577_v29  ;;  %v1678_v31 = vmul.f32 %v1677_v55, %v4169_v57 }
 0x233   : > { %v1498_v51 = vmul.f32 0.5, %v1497_v34  ;;  %v1299_v42 = vpop.xlane.xlu1 %1298  ;;  %vm1685_vm9 = vweird.f32 %v4572_v28  ;;  %v1489_v2 = vmul.f32 %v1488_v22, %v4496_v5  ;;  %v1691_v8 = vor.u32 1.1754944e-38, %v1690_v46 }
 0x234   : > { %v1373_v63 = vrot.slane %v1372_v47, 1  ;;  %v1375_v25 = vrot.slane %v1299_v42, 4  ;;  %v1682_v13 = vmul.f32 %v4572_v28, %v1681_v49  ;;  %v1860_v0 = vpack.c.bf16 %v1678_v31, %v1663_v9  ;;  %vm4630_vm12 = vmor %vm1684_vm6, %vm1685_vm9 }
 0x235   : > { %v1499_v33 = vsub.f32 1.5, %v1498_v51  ;;  %vm1699_vm10 = vweird.f32 %v4577_v29  ;;  %vm4618_vm11 = vcmp.eq.f32.partialorder %v1703_v11, 8.507059e+37  ;;  %v1491_v20 = vsel %vm1490_vm2, %v4496_v5, %v1489_v2 }
 0x236   : > { %v4601_v38 = vadd.f32 %v1373_v63, %v1372_v47  ;;  %v1376_v32 = vadd.f32 %v1375_v25, %v1299_v42  ;;  %v1683_v62 = vadd.f32 %v4572_v28, %v1682_v13  ;;  %3375 = vmatmul.msk.bf16.gmra.mxu3 %vm640_vm0, %v1860_v0  ;;  %v1705_v56 = vand.u32 2147483648, %v4577_v29 }
 0x237   : > { %v4607_v57 = vpop.eup %3608  ;;  %v1500_v41 = vmul.f32 %v3605_v4, %v1499_v33  ;;  %v1494_v59 = vsel %vm1492_vm4, %v1493_v15, %v1491_v20  ;;  %v1505_v37 = vand.u32 2147483648, %v4526_v43  ;;  %vm1514_vm15 = vcmp.eq.f32.partialorder %v4575_v1, inf }
 0x238   : > { %v3611_v6 = vpop.eup %3610  ;;  %v1508_v12 = vmul.f32 %v4607_v57, %v4575_v1  ;;  %3612 = vrsqrt.f32 %v4601_v38  ;;  %v1377_v7 = vrot.slane %v1376_v32, 2  ;;  %v1687_v36 = vsel %vm4630_vm12, %v4572_v28, %v1683_v62 }
 0x239   : > { %v1695_v14 = vmul.f32 %v3611_v6, %v4577_v29  ;;  %v1501_v10 = vmul.f32 %v1500_v41, %v4526_v43  ;;  %v4643_v53 = vmax.f32 %v1494_v59, 1e-12  ;;  %vm1700_vm13 = vweird.f32 %v3611_v6 }
 0x23a   : > { %v1509_v52 = vmul.f32 %v4607_v57, %v1508_v12  ;;  %v1378_v23 = vadd.f32 %v1377_v7, %v1376_v32  ;;  %v1692_v40 = vsel %vm4603_vm8, %v1691_v8, %v1687_v36  ;;  %v1706_v47 = vor.u32 1.1754944e-38, %v1705_v56  ;;  %vm1701_vm14 = vmor %vm1699_vm10, %vm1700_vm13 }
 0x23b   : > { %v1696_v16 = vsub.f32 1.0, %v1695_v14  ;;  %v1503_v5 = vsel %vm1502_vm5, %v4526_v43, %v1501_v10  ;;  %3614 = vrcp.f32 %v4643_v53  ;;  %v1718_v55 = vand.u32 2147483647, %v4643_v53 }
 0x23c   : > { %v1510_v26 = vmul.f32 0.5, %v1509_v52  ;;  %v1379_v44 = vrot.slane %v1378_v23, 1  ;;  %v1302_v30 = vpop.xlane.xlu2 %1301  ;;  %v1506_v48 = vsel %vm1504_vm7, %v1505_v37, %v1503_v5  ;;  %v1720_v46 = vand.u32 2147483648, %v4643_v53 }
 0x23d   : > { %v1381_v34 = vrot.slane %v1302_v30, 4  ;;  %v1697_v39 = vmul.f32 %v3611_v6, %v1696_v16  ;;  %v4657_v9 = vmax.f32 %v1506_v48, 1e-12  ;;  %v1693_v13 = vmul.f32 %v1692_v40, %v4192_v60 }
 0x23e   : > { %v3613_v15 = vpop.eup %3612  ;;  %v4650_v28 = vadd.f32 %v1379_v44, %v1378_v23  ;;  %v1511_v63 = vsub.f32 1.5, %v1510_v26  ;;  %vm1516_vm1 = vcmp.eq.f32.partialorder %v4575_v1, 0.0  ;;  %v1517_v3 = vand.u32 2147483648, %v4575_v1 }
 0x23f   : > { %v1520_v49 = vmul.f32 %v3613_v15, %v4601_v38  ;;  %v1382_v51 = vadd.f32 %v1381_v34, %v1302_v30  ;;  %v1698_v42 = vadd.f32 %v3611_v6, %v1697_v39  ;;  %vm1714_vm2 = vweird.f32 %v4643_v53 }
 0x240   : > { %3616 = vrsqrt.f32 %v4650_v28  ;;  %vm1526_vm3 = vcmp.eq.f32.partialorder %v4601_v38, inf  ;;  %vm4676_vm4 = vcmp.eq.f32.partialorder %v1718_v55, 8.507059e+37  ;;  %v1721_v12 = vor.u32 1.1754944e-38, %v1720_v46 }
 0x241   : > { %v1521_v25 = vmul.f32 %v3613_v15, %v1520_v49  ;;  %v1383_v43 = vrot.slane %v1382_v51, 2  ;;  %v1702_v31 = vsel %vm1701_vm14, %v3611_v6, %v1698_v42  ;;  %3618 = vrcp.f32 %v4657_v9  ;;  %v3615_v29 = vpop.eup %3614 }
 0x242   : > { %v1707_v11 = vsel %vm4618_vm11, %v1706_v47, %v1702_v31  ;;  %v1710_v2 = vmul.f32 %v3615_v29, %v4643_v53  ;;  %v1512_v7 = vmul.f32 %v4607_v57, %v1511_v63  ;;  %v1733_v45 = vand.u32 2147483647, %v4657_v9 }
 0x243   : > { %v1522_v22 = vmul.f32 0.5, %v1521_v25  ;;  %v1384_v33 = vadd.f32 %v1383_v43, %v1382_v51  ;;  %v1305_v32 = vpop.xlane.xlu0 %1304  ;;  %v1708_v0 = vmul.f32 %v1707_v11, %v4219_v58  ;;  %vm1528_vm5 = vcmp.eq.f32.partialorder %v4601_v38, 0.0 }
 0x244   : > { %v1387_v62 = vrot.slane %v1305_v32, 4  ;;  %v1711_v14 = vsub.f32 1.0, %v1710_v2  ;;  %v1735_v56 = vand.u32 2147483648, %v4657_v9  ;;  %v1513_v59 = vmul.f32 %v1512_v7, %v4575_v1 }
 0x245   : > { %v1385_v60 = vrot.slane %v1384_v33, 1  ;;  %v1861_v41 = vpack.c.bf16 %v1708_v0, %v1693_v13  ;;  %v1523_v20 = vsub.f32 1.5, %v1522_v22  ;;  %vm1715_vm6 = vweird.f32 %v3615_v29 }
 0x246   : > { %v3617_v8 = vpop.eup %3616  ;;  %v1388_v58 = vadd.f32 %v1387_v62, %v1305_v32  ;;  %v1712_v57 = vmul.f32 %v3615_v29, %v1711_v14  ;;  %v1515_v26 = vsel %vm1514_vm15, %v4575_v1, %v1513_v59  ;;  %vm1716_vm7 = vmor %vm1714_vm2, %vm1715_vm6  ;;  %vm1729_vm9 = vweird.f32 %v4657_v9 }
 0x247   : > { %v3619_v52 = vpop.eup %3618  ;;  %v1532_v23 = vmul.f32 %v3617_v8, %v4650_v28  ;;  %v4684_v4 = vadd.f32 %v1385_v60, %v1384_v33  ;;  %3376 = vmatmul.msk.bf16.gmra.mxu3 %vm640_vm0, %v1861_v41  ;;  %v1524_v44 = vmul.f32 %v3613_v15, %v1523_v20  ;;  %v1518_v39 = vsel %vm1516_vm1, %v1517_v3, %v1515_v26 }
 0x248   : > { %v1389_v36 = vrot.slane %v1388_v58, 2  ;;  %v1725_v16 = vmul.f32 %v3619_v52, %v4657_v9  ;;  %v1713_v37 = vadd.f32 %v3615_v29, %v1712_v57  ;;  %vm1730_vm8 = vweird.f32 %v3619_v52 }
 0x249   : > { %v1533_v10 = vmul.f32 %v3617_v8, %v1532_v23  ;;  %3620 = vrsqrt.f32 %v4684_v4  ;;  %v1525_v47 = vmul.f32 %v1524_v44, %v4601_v38  ;;  %v4699_v48 = vmax.f32 %v1518_v39, 1e-12  ;;  %vm1731_vm10 = vmor %vm1729_vm9, %vm1730_vm8 }
 0x24a   : > { %v1390_v30 = vadd.f32 %v1389_v36, %v1388_v58  ;;  %v1726_v34 = vsub.f32 1.0, %v1725_v16  ;;  %v1717_v42 = vsel %vm1716_vm7, %v3615_v29, %v1713_v37  ;;  %v1529_v55 = vand.u32 2147483648, %v4601_v38 }
 0x24b   : > { %v1534_v5 = vmul.f32 0.5, %v1533_v10  ;;  %v1308_v40 = vpop.xlane.xlu1 %1307  ;;  %v1527_v1 = vsel %vm1526_vm3, %v4601_v38, %v1525_v47  ;;  %3622 = vrcp.f32 %v4699_v48  ;;  %v1722_v63 = vsel %vm4676_vm4, %v1721_v12, %v1717_v42 }
 0x24c   : > { %v1391_v49 = vrot.slane %v1390_v30, 1  ;;  %v1393_v51 = vrot.slane %v1308_v40, 4  ;;  %v1727_v15 = vmul.f32 %v3619_v52, %v1726_v34  ;;  %vm1734_vm11 = vcmp.eq.f32.partialorder %v1733_v45, 8.507059e+37 }
 0x24d   : > { %v1736_v9 = vor.u32 1.1754944e-38, %v1735_v56  ;;  %v1530_v31 = vsel %vm1528_vm5, %v1529_v55, %v1527_v1  ;;  %v1535_v13 = vsub.f32 1.5, %v1534_v5  ;;  %v1723_v33 = vmul.f32 %v1722_v63, %v4240_v19 }
 0x24e   : > { %v4707_v53 = vadd.f32 %v1391_v49, %v1390_v30  ;;  %v1394_v46 = vadd.f32 %v1393_v51, %v1308_v40  ;;  %v1728_v25 = vadd.f32 %v3619_v52, %v1727_v15  ;;  %v4717_v0 = vmax.f32 %v1530_v31, 1e-12 }
 0x24f   : > { %v3621_v43 = vpop.eup %3620  ;;  %v1536_v60 = vmul.f32 %v3617_v8, %v1535_v13  ;;  %v1748_v38 = vand.u32 2147483647, %v4699_v48  ;;  %vm1744_vm12 = vweird.f32 %v4699_v48  ;;  %vm1538_vm13 = vcmp.eq.f32.partialorder %v4650_v28, inf }
 0x250   : > { %v1544_v11 = vmul.f32 %v3621_v43, %v4684_v4  ;;  %3624 = vrsqrt.f32 %v4707_v53  ;;  %v1395_v29 = vrot.slane %v1394_v46, 2  ;;  %v1732_v22 = vsel %vm1731_vm10, %v3619_v52, %v1728_v25 }
 0x251   : > { %v1737_v32 = vsel %vm1734_vm11, %v1736_v9, %v1732_v22  ;;  %v4720_v41 = vpop.eup %3622  ;;  %3626 = vrcp.f32 %v4717_v0  ;;  %vm1540_vm14 = vcmp.eq.f32.partialorder %v4650_v28, 0.0  ;;  %v1750_v20 = vand.u32 2147483648, %v4699_v48 }
 0x252   : > { %v1545_v3 = vmul.f32 %v3621_v43, %v1544_v11  ;;  %v1396_v62 = vadd.f32 %v1395_v29, %v1394_v46  ;;  %v1738_v2 = vmul.f32 %v1737_v32, %v4263_v50  ;;  %v1740_v19 = vmul.f32 %v4720_v41, %v4699_v48 }
 0x253   : > { %v1537_v52 = vmul.f32 %v1536_v60, %v4650_v28  ;;  %v1763_v56 = vand.u32 2147483647, %v4717_v0  ;;  %v1541_v59 = vand.u32 2147483648, %v4650_v28  ;;  %vm4742_vm15 = vcmp.eq.f32.partialorder %v1748_v38, 8.507059e+37 }
 0x254   : > { %v1546_v6 = vmul.f32 0.5, %v1545_v3  ;;  %v1397_v12 = vrot.slane %v1396_v62, 1  ;;  %v1311_v7 = vpop.xlane.xlu2 %1310  ;;  %v1862_v58 = vpack.c.bf16 %v1738_v2, %v1723_v33  ;;  %v1741_v45 = vsub.f32 1.0, %v1740_v19 }
 0x255   : > { %v1399_v14 = vrot.slane %v1311_v7, 4  ;;  %v1539_v26 = vsel %vm1538_vm13, %v4650_v28, %v1537_v52  ;;  %v1765_v37 = vand.u32 2147483648, %v4717_v0  ;;  %vm1745_vm1 = vweird.f32 %v4720_v41 }
 0x256   : > { %v4729_v50 = vpop.eup %3624  ;;  %v4731_v8 = vadd.f32 %v1397_v12, %v1396_v62  ;;  %v1547_v36 = vsub.f32 1.5, %v1546_v6  ;;  %v1742_v16 = vmul.f32 %v4720_v41, %v1741_v45  ;;  %v1542_v34 = vsel %vm1540_vm14, %v1541_v59, %v1539_v26  ;;  %vm4764_vm4 = vmor %vm1744_vm12, %vm1745_vm1 }
 0x257   : > { %v1400_v23 = vadd.f32 %v1399_v14, %v1311_v7  ;;  %v1556_v57 = vmul.f32 %v4729_v50, %v4707_v53  ;;  %3377 = vmatmul.msk.bf16.gmra.mxu3 %vm640_vm0, %v1862_v58  ;;  %v3627_v44 = vpop.eup %3626  ;;  %vm1550_vm2 = vcmp.eq.f32.partialorder %v4684_v4, inf  ;;  %vm1552_vm3 = vcmp.eq.f32.partialorder %v4684_v4, 0.0 }
 0x258   : > { %3628 = vrsqrt.f32 %v4731_v8  ;;  %v1548_v39 = vmul.f32 %v3621_v43, %v1547_v36  ;;  %v1743_v5 = vadd.f32 %v4720_v41, %v1742_v16  ;;  %v1755_v40 = vmul.f32 %v3627_v44, %v4717_v0 }
 0x259   : > { %v1401_v30 = vrot.slane %v1400_v23, 2  ;;  %v4758_v42 = vmax.f32 %v1542_v34, 1e-12  ;;  %v1557_v28 = vmul.f32 %v4729_v50, %v1556_v57  ;;  %v1553_v55 = vand.u32 2147483648, %v4684_v4 }
 0x25a   : > { %v1549_v51 = vmul.f32 %v1548_v39, %v4684_v4  ;;  %v1756_v1 = vsub.f32 1.0, %v1755_v40  ;;  %vm1760_vm5 = vweird.f32 %v3627_v44  ;;  %v1747_v31 = vsel %vm4764_vm4, %v4720_v41, %v1743_v5 }
 0x25b   : > { %v1402_v47 = vadd.f32 %v1401_v30, %v1400_v23  ;;  %v1314_v49 = vpop.xlane.xlu0 %1313  ;;  %3630 = vrcp.f32 %v4758_v42  ;;  %v1751_v22 = vor.u32 1.1754944e-38, %v1750_v20  ;;  %vm1759_vm6 = vweird.f32 %v4717_v0 }
 0x25c   : > { %v1405_v15 = vrot.slane %v1314_v49, 4  ;;  %v1551_v25 = vsel %vm1550_vm2, %v4684_v4, %v1549_v51  ;;  %v1757_v13 = vmul.f32 %v3627_v44, %v1756_v1  ;;  %v1766_v4 = vor.u32 1.1754944e-38, %v1765_v37  ;;  %vm1761_vm7 = vmor %vm1759_vm6, %vm1760_vm5 }
 0x25d   : > { %v1403_v46 = vrot.slane %v1402_v47, 1  ;;  %v1554_v11 = vsel %vm1552_vm3, %v1553_v55, %v1551_v25  ;;  %v1558_v62 = vmul.f32 0.5, %v1557_v28  ;;  %v1752_v60 = vsel %vm4742_vm15, %v1751_v22, %v1747_v31 }
 0x25e   : > { %v3629_v43 = vpop.eup %3628  ;;  %v1406_v9 = vadd.f32 %v1405_v15, %v1314_v49  ;;  %v4776_v33 = vmax.f32 %v1554_v11, 1e-12  ;;  %v1758_v3 = vadd.f32 %v3627_v44, %v1757_v13  ;;  %vm1764_vm8 = vcmp.eq.f32.partialorder %v1763_v56, 8.507059e+37 }
 0x25f   : > { %v1568_v29 = vmul.f32 %v3629_v43, %v4731_v8  ;;  %v4774_v48 = vadd.f32 %v1403_v46, %v1402_v47  ;;  %v1753_v0 = vmul.f32 %v1752_v60, %v4290_v24  ;;  %v1559_v45 = vsub.f32 1.5, %v1558_v62 }
 0x260   : > { %v1407_v32 = vrot.slane %v1406_v9, 2  ;;  %v1762_v38 = vsel %vm1761_vm7, %v3627_v44, %v1758_v3  ;;  %vm1562_vm9 = vcmp.eq.f32.partialorder %v4707_v53, inf  ;;  %vm1774_vm10 = vweird.f32 %v4758_v42 }
 0x261   : > { %v1569_v2 = vmul.f32 %v3629_v43, %v1568_v29  ;;  %3632 = vrsqrt.f32 %v4774_v48  ;;  %v3631_v6 = vpop.eup %3630  ;;  %v1767_v7 = vsel %vm1764_vm8, %v1766_v4, %v1762_v38  ;;  %v1778_v36 = vand.u32 2147483647, %v4758_v42 }
 0x262   : > { %v1408_v41 = vadd.f32 %v1407_v32, %v1406_v9  ;;  %3634 = vrcp.f32 %v4776_v33  ;;  %v1768_v19 = vmul.f32 %v1767_v7, %v4311_v18  ;;  %v1770_v14 = vmul.f32 %v3631_v6, %v4758_v42 }
 0x263   : > { %v1570_v12 = vmul.f32 0.5, %v1569_v2  ;;  %v1780_v57 = vand.u32 2147483648, %v4758_v42  ;;  %v1560_v24 = vmul.f32 %v4729_v50, %v1559_v45  ;;  %vm1775_vm11 = vweird.f32 %v3631_v6 }
 0x264   : > { %v1409_v58 = vrot.slane %v1408_v41, 1  ;;  %v1863_v52 = vpack.c.bf16 %v1768_v19, %v1753_v0  ;;  %v1771_v23 = vsub.f32 1.0, %v1770_v14  ;;  %v1793_v44 = vand.u32 2147483647, %v4776_v33  ;;  %vm4812_vm14 = vmor %vm1774_vm10, %vm1775_vm11 }
 0x265   : > { %v1571_v56 = vsub.f32 1.5, %v1570_v12  ;;  %v1795_v30 = vand.u32 2147483648, %v4776_v33  ;;  %v1561_v37 = vmul.f32 %v1560_v24, %v4707_v53  ;;  %v1565_v5 = vand.u32 2147483648, %v4707_v53 }
 0x266   : > { %v4788_v20 = vadd.f32 %v1409_v58, %v1408_v41  ;;  %v1772_v16 = vmul.f32 %v3631_v6, %v1771_v23  ;;  %vm1564_vm12 = vcmp.eq.f32.partialorder %v4707_v53, 0.0  ;;  %vm1574_vm13 = vcmp.eq.f32.partialorder %v4731_v8, inf }
 0x267   : > { %v3633_v59 = vpop.eup %3632  ;;  %3378 = vmatmul.msk.bf16.gmra.mxu3 %vm640_vm0, %v1863_v52  ;;  %v1572_v10 = vmul.f32 %v3629_v43, %v1571_v56  ;;  %v1563_v40 = vsel %vm1562_vm9, %v4707_v53, %v1561_v37  ;;  %v1577_v15 = vand.u32 2147483648, %v4731_v8  ;;  %vm1576_vm1 = vcmp.eq.f32.partialorder %v4731_v8, 0.0 }
 0x268   : > { %v1580_v18 = vmul.f32 %v3633_v59, %v4774_v48  ;;  %3636 = vrsqrt.f32 %v4788_v20  ;;  %v3635_v26 = vpop.eup %3634  ;;  %v1773_v39 = vadd.f32 %v3631_v6, %v1772_v16  ;;  %v1566_v28 = vsel %vm1564_vm12, %v1565_v5, %v1563_v40 }
 0x269   : > { %v1785_v50 = vmul.f32 %v3635_v26, %v4776_v33  ;;  %v1573_v47 = vmul.f32 %v1572_v10, %v4731_v8  ;;  %vm1790_vm15 = vweird.f32 %v3635_v26  ;;  %v4818_v53 = vmax.f32 %v1566_v28, 1e-12 }
 0x26a   : > { %v1581_v34 = vmul.f32 %v3633_v59, %v1580_v18  ;;  %v1777_v63 = vsel %vm4812_vm14, %v3631_v6, %v1773_v39  ;;  %v1781_v31 = vor.u32 1.1754944e-38, %v1780_v57  ;;  %vm1779_vm2 = vcmp.eq.f32.partialorder %v1778_v36, 8.507059e+37 }
 0x26b   : > { %v1786_v51 = vsub.f32 1.0, %v1785_v50  ;;  %v1575_v55 = vsel %vm1574_vm13, %v4731_v8, %v1573_v47  ;;  %3638 = vrcp.f32 %v4818_v53  ;;  %vm1789_vm3 = vweird.f32 %v4776_v33 }
 0x26c   : > { %v1582_v49 = vmul.f32 0.5, %v1581_v34  ;;  %v1578_v43 = vsel %vm1576_vm1, %v1577_v15, %v1575_v55  ;;  %v1782_v22 = vsel %vm1779_vm2, %v1781_v31, %v1777_v63  ;;  %vm1791_vm4 = vmor %vm1789_vm3, %vm1790_vm15  ;;  %v1796_v32 = vor.u32 1.1754944e-38, %v1795_v30 }
 0x26d   : > { %v1787_v25 = vmul.f32 %v3635_v26, %v1786_v51  ;;  %v4823_v13 = vmax.f32 %v1578_v43, 1e-12  ;;  %vm1794_vm5 = vcmp.eq.f32.partialorder %v1793_v44, 8.507059e+37  ;;  %v1783_v60 = vmul.f32 %v1782_v22, %v4334_v17 }
 0x26e   : > { %v3637_v46 = vpop.eup %3636  ;;  %v1583_v9 = vsub.f32 1.5, %v1582_v49  ;;  %vm1586_vm6 = vcmp.eq.f32.partialorder %v4774_v48, inf  ;;  %v1589_v33 = vand.u32 2147483648, %v4774_v48  ;;  %vm1588_vm7 = vcmp.eq.f32.partialorder %v4774_v48, 0.0 }
 0x26f   : > { %v1592_v42 = vmul.f32 %v3637_v46, %v4788_v20  ;;  %v1788_v11 = vadd.f32 %v3635_v26, %v1787_v25  ;;  %3640 = vrcp.f32 %v4823_v13  ;;  %vm1598_vm8 = vcmp.eq.f32.partialorder %v4788_v20, inf }
 0x270   : > { %v1584_v8 = vmul.f32 %v3633_v59, %v1583_v9  ;;  %vm1600_vm9 = vcmp.eq.f32.partialorder %v4788_v20, 0.0  ;;  %v1808_v52 = vand.u32 2147483647, %v4818_v53  ;;  %v1810_v23 = vand.u32 2147483648, %v4818_v53 }
 0x271   : > { %v1593_v29 = vmul.f32 %v3637_v46, %v1592_v42  ;;  %v1792_v3 = vsel %vm1791_vm4, %v3635_v26, %v1788_v11  ;;  %v3639_v38 = vpop.eup %3638  ;;  %v1601_v57 = vand.u32 2147483648, %v4788_v20  ;;  %vm1804_vm11 = vweird.f32 %v4818_v53 }
 0x272   : > { %v1797_v62 = vsel %vm1794_vm5, %v1796_v32, %v1792_v3  ;;  %v1585_v2 = vmul.f32 %v1584_v8, %v4774_v48  ;;  %v1800_v58 = vmul.f32 %v3639_v38, %v4818_v53  ;;  %vm1805_vm10 = vweird.f32 %v3639_v38 }
 0x273   : > { %v1594_v4 = vmul.f32 0.5, %v1593_v29  ;;  %v1798_v41 = vmul.f32 %v1797_v62, %v4361_v61  ;;  %v1823_v24 = vand.u32 2147483647, %v4823_v13  ;;  %v1825_v18 = vand.u32 2147483648, %v4823_v13  ;;  %vm1806_vm13 = vmor %vm1804_vm11, %vm1805_vm10 }
 0x274   : > { %v1587_v6 = vsel %vm1586_vm6, %v4774_v48, %v1585_v2  ;;  %v1801_v17 = vsub.f32 1.0, %v1800_v58  ;;  %v3437_v48 = vld [vmem:[%s5405_s9] sm:$0xff]  ;;  %v1811_v30 = vor.u32 1.1754944e-38, %v1810_v23  ;;  %vm1809_vm14 = vcmp.eq.f32.partialorder %v1808_v52, 8.507059e+37 }
 0x275   : > { %v1595_v12 = vsub.f32 1.5, %v1594_v4  ;;  %v1864_v7 = vpack.c.bf16 %v1798_v41, %v1783_v60  ;;  %v1590_v0 = vsel %vm1588_vm7, %v1589_v33, %v1587_v6  ;;  %v3641_v19 = vpop.eup %3640  ;;  %2028 = vmatpush.bf16.msrb.mxu1 %v3437_v48  ;;  %vm1819_vm15 = vweird.f32 %v4823_v13  ;;  %v3516_v60 = vld [vmem:[%s5404_s8] ss:$0 sm:$0xff] }
 0x276   : > { %v4837_v45 = vmax.f32 %v1590_v0, 1e-12  ;;  %v1815_v61 = vmul.f32 %v3641_v19, %v4823_v13  ;;  %v1802_v59 = vmul.f32 %v3639_v38, %v1801_v17  ;;  %vm1820_vm12 = vweird.f32 %v3641_v19 }
 0x277   : > { %v1596_v14 = vmul.f32 %v3637_v46, %v1595_v12  ;;  %3379 = vmatmul.msk.bf16.gmra.mxu3 %vm640_vm0, %v1864_v7  ;;  %vm1821_vm1 = vmor %vm1819_vm15, %vm1820_vm12  ;;  %v1826_v40 = vor.u32 1.1754944e-38, %v1825_v18  ;;  %vm1824_vm2 = vcmp.eq.f32.partialorder %v1823_v24, 8.507059e+37  ;;  %vm1996_vm11 = vcmask 130048  }
 0x278   : > { %3642 = vrcp.f32 %v4837_v45  ;;  %v1816_v36 = vsub.f32 1.0, %v1815_v61  ;;  %v1803_v10 = vadd.f32 %v3639_v38, %v1802_v59  ;;  %vm1834_vm4 = vweird.f32 %v4837_v45 }
 0x279   : > { %v1597_v56 = vmul.f32 %v1596_v14, %v4788_v20  ;;  %v1840_v43 = vand.u32 2147483648, %v4837_v45  ;;  %v1838_v42 = vand.u32 2147483647, %v4837_v45 }
 0x27a   : > { %v1817_v26 = vmul.f32 %v3641_v19, %v1816_v36  ;;  %v1807_v34 = vsel %vm1806_vm13, %v3639_v38, %v1803_v10 }
 0x27b   : > { %v1599_v16 = vsel %vm1598_vm8, %v4788_v20, %v1597_v56  ;;  %v1812_v5 = vsel %vm1809_vm14, %v1811_v30, %v1807_v34  ;;  %v1841_v11 = vor.u32 1.1754944e-38, %v1840_v43 }
 0x27c   : > { %v1602_v44 = vsel %vm1600_vm9, %v1601_v57, %v1599_v16  ;;  %v1818_v39 = vadd.f32 %v3641_v19, %v1817_v26  ;;  %v1813_v20 = vmul.f32 %v1812_v5, %v4382_v27  ;;  %vm1839_vm9 = vcmp.eq.f32.partialorder %v1838_v42, 8.507059e+37 }
 0x27d   : > { %v1618_v37 = vmax.f32 %v1602_v44, 1e-12 }
 0x27e   : > { %v3643_v50 = vpop.eup %3642  ;;  %v1822_v47 = vsel %vm1821_vm1, %v3641_v19, %v1818_v39 }
 0x27f   : > { %3644 = vrcp.f32 %v1618_v37  ;;  %v1830_v49 = vmul.f32 %v3643_v50, %v4837_v45  ;;  %v1827_v51 = vsel %vm1824_vm2, %v1826_v40, %v1822_v47  ;;  %vm1835_vm3 = vweird.f32 %v3643_v50 }
 0x280   : > { %v1828_v28 = vmul.f32 %v1827_v51, %v4403_v54  ;;  %v1855_v9 = vand.u32 2147483648, %v1618_v37  ;;  %v1853_v54 = vand.u32 2147483647, %v1618_v37  ;;  %vm1836_vm6 = vmor %vm1834_vm4, %vm1835_vm3  ;;  %vm1849_vm7 = vweird.f32 %v1618_v37 }
 0x281   : > { %v1831_v15 = vsub.f32 1.0, %v1830_v49 }
 0x282   : > { %v1865_v1 = vpack.c.bf16 %v1828_v28, %v1813_v20  ;;  %v1856_v8 = vor.u32 1.1754944e-38, %v1855_v9  ;;  %vm1854_vm10 = vcmp.eq.f32.partialorder %v1853_v54, 8.507059e+37 }
 0x283   : > { %v1832_v55 = vmul.f32 %v3643_v50, %v1831_v15 }
 0x285   : > { %v3645_v53 = vpop.eup %3644  ;;  %v1833_v63 = vadd.f32 %v3643_v50, %v1832_v55 }
 0x286   : > { %v1845_v46 = vmul.f32 %v3645_v53, %v1618_v37  ;;  %vm1850_vm5 = vweird.f32 %v3645_v53 }
 0x287   : > { %3380 = vmatmul.msk.bf16.gmra.mxu3 %vm640_vm0, %v1865_v1  ;;  %v1837_v31 = vsel %vm1836_vm6, %v3643_v50, %v1833_v63  ;;  %vm1851_vm8 = vmor %vm1849_vm7, %vm1850_vm5 }
 0x288   : > { %v1846_v25 = vsub.f32 1.0, %v1845_v46  ;;  %v1842_v22 = vsel %vm1839_vm9, %v1841_v11, %v1837_v31 }
 0x289   : > { %v1843_v4 = vmul.f32 %v1842_v22, %v4420_v21 }
 0x28a   : > { %v1847_v27 = vmul.f32 %v3645_v53, %v1846_v25 }
 0x28c   : > { %v1848_v13 = vadd.f32 %v3645_v53, %v1847_v27 }
 0x28e   : > { %v1852_v29 = vsel %vm1851_vm8, %v3645_v53, %v1848_v13 }
 0x28f   : > { %v1857_v32 = vsel %vm1854_vm10, %v1856_v8, %v1852_v29  ;;  %v4882_v8 = vld [vmem:[%s5406_s10] ss:$0 sm:$0xff] }
 0x290   : > { %v1858_v3 = vmul.f32 %v1857_v32, %v4435_v35 }
 0x292   : > { %v1866_v62 = vpack.c.bf16 %v1858_v3, %v1843_v4 }
 0x297   : > { %3381 = vmatmul.msk.bf16.gmra.mxu3 %vm640_vm0, %v1866_v62  ;;  %vm2070_vm0 = vcmask 15360  }
 0x2a7   : > { %v1920_v2 = vpop.f32.mrf.mxu3 }
 0x2a8   : > { %v1921_v41 = vadd.f32 %v3516_v60, %v1920_v2 }
 0x2aa   : > { %v1960_v6 = vmax.f32 %v1921_v41, 0.0 }
 0x2af   : > { %v1922_v33 = vpop.f32.mrf.mxu3 }
 0x2b0   : > { %v1923_v38 = vadd.f32 %v3516_v60, %v1922_v33 }
 0x2b2   : > { %v1961_v12 = vmax.f32 %v1923_v38, 0.0 }
 0x2b4   : > { %v1976_v7 = vpack.c.bf16 %v1961_v12, %v1960_v6 }
 0x2b6   : > { %3386 = vmatmul.msk.bf16.vlgmr.msrb.gmra.mxu1 %vm1996_vm11, %v1976_v7 }
 0x2b9   : > { %v1925_v35 = vpop.f32.mrf.mxu3 }
 0x2ba   : > { %v1926_v58 = vadd.f32 %v3516_v60, %v1925_v35 }
 0x2bc   : > { %v1962_v19 = vmax.f32 %v1926_v58, 0.0 }
 0x2c1   : > { %v1927_v21 = vpop.f32.mrf.mxu3 }
 0x2c2   : > { %v1928_v0 = vadd.f32 %v3516_v60, %v1927_v21 }
 0x2c4   : > { %v1963_v14 = vmax.f32 %v1928_v0, 0.0 }
 0x2c6   : > { %v1977_v45 = vpack.c.bf16 %v1963_v14, %v1962_v19 }
 0x2c8   : > { %3387 = vmatmul.msk.bf16.gmra.mxu1 %vm1996_vm11, %v1977_v45 }
 0x2ca   : > { %v1930_v17 = vpop.f32.mrf.mxu3 }
 0x2cb   : > { %v1931_v61 = vadd.f32 %v3516_v60, %v1930_v17 }
 0x2cd   : > { %v1964_v23 = vmax.f32 %v1931_v61, 0.0 }
 0x2d2   : > { %v1932_v48 = vpop.f32.mrf.mxu3 }
 0x2d3   : > { %v1933_v52 = vadd.f32 %v3516_v60, %v1932_v48 }
 0x2d5   : > { %v1965_v56 = vmax.f32 %v1933_v52, 0.0 }
 0x2d7   : > { %v1978_v59 = vpack.c.bf16 %v1965_v56, %v1964_v23 }
 0x2d9   : > { %3388 = vmatmul.msk.bf16.gmra.mxu1 %vm1996_vm11, %v1978_v59 }
 0x2da   : > { %v1935_v36 = vpop.f32.mrf.mxu3 }
 0x2db   : > { %v1936_v57 = vadd.f32 %v3516_v60, %v1935_v36 }
 0x2dd   : > { %v1966_v16 = vmax.f32 %v1936_v57, 0.0 }
 0x2e2   : > { %v1937_v24 = vpop.f32.mrf.mxu3 }
 0x2e3   : > { %v1938_v18 = vadd.f32 %v3516_v60, %v1937_v24 }
 0x2e5   : > { %v1967_v10 = vmax.f32 %v1938_v18, 0.0 }
 0x2e7   : > { %v1979_v26 = vpack.c.bf16 %v1967_v10, %v1966_v16 }
 0x2e9   : > { %3389 = vmatmul.msk.bf16.gmra.mxu1 %vm1996_vm11, %v1979_v26 }
 0x2ea   : > { %v1940_v44 = vpop.f32.mrf.mxu3 }
 0x2eb   : > { %v1941_v30 = vadd.f32 %v3516_v60, %v1940_v44 }
 0x2ed   : > { %v1968_v39 = vmax.f32 %v1941_v30, 0.0 }
 0x2f2   : > { %v1942_v37 = vpop.f32.mrf.mxu3 }
 0x2f3   : > { %v1943_v34 = vadd.f32 %v3516_v60, %v1942_v37 }
 0x2f5   : > { %v1969_v50 = vmax.f32 %v1943_v34, 0.0 }
 0x2f7   : > { %v1980_v5 = vpack.c.bf16 %v1969_v50, %v1968_v39 }
 0x2f9   : > { %3390 = vmatmul.msk.bf16.gmra.mxu1 %vm1996_vm11, %v1980_v5 }
 0x2fa   : > { %v1945_v40 = vpop.f32.mrf.mxu3 }
 0x2fb   : > { %v1946_v47 = vadd.f32 %v3516_v60, %v1945_v40 }
 0x2fd   : > { %v1970_v20 = vmax.f32 %v1946_v47, 0.0 }
 0x302   : > { %v1947_v49 = vpop.f32.mrf.mxu3 }
 0x303   : > { %v1948_v51 = vadd.f32 %v3516_v60, %v1947_v49 }
 0x305   : > { %v1971_v28 = vmax.f32 %v1948_v51, 0.0 }
 0x307   : > { %v1981_v15 = vpack.c.bf16 %v1971_v28, %v1970_v20 }
 0x309   : > { %3391 = vmatmul.msk.bf16.gmra.mxu1 %vm1996_vm11, %v1981_v15 }
 0x30a   : > { %v1950_v1 = vpop.f32.mrf.mxu3 }
 0x30b   : > { %v1951_v55 = vadd.f32 %v3516_v60, %v1950_v1 }
 0x30d   : > { %v1972_v63 = vmax.f32 %v1951_v55, 0.0 }
 0x312   : > { %v1952_v53 = vpop.f32.mrf.mxu3 }
 0x313   : > { %v1953_v46 = vadd.f32 %v3516_v60, %v1952_v53 }
 0x315   : > { %v1973_v25 = vmax.f32 %v1953_v46, 0.0 }
 0x317   : > { %v1982_v43 = vpack.c.bf16 %v1973_v25, %v1972_v63 }
 0x319   : > { %3392 = vmatmul.msk.bf16.gmra.mxu1 %vm1996_vm11, %v1982_v43 }
 0x31a   : > { %v1955_v9 = vpop.f32.mrf.mxu3 }
 0x31b   : > { %v1956_v42 = vadd.f32 %v3516_v60, %v1955_v9 }
 0x31d   : > { %v1974_v31 = vmax.f32 %v1956_v42, 0.0 }
 0x322   : > { %v1957_v27 = vpop.f32.mrf.mxu3 }
 0x323   : > { %v1958_v54 = vadd.f32 %v3516_v60, %v1957_v27 }
 0x325   : > { %v1975_v13 = vmax.f32 %v1958_v54, 0.0 }
 0x327   : > { %v1983_v11 = vpack.c.bf16 %v1975_v13, %v1974_v31 }
 0x329   : > { %3393 = vmatmul.msk.bf16.gmra.mxu1 %vm1996_vm11, %v1983_v11 }
 0x333   : > { %v2030_v29 = vpop.f32.mrf.mxu1 }
 0x334   : > { %v2031_v22 = vadd.f32 %v4882_v8, %v2030_v29 }
 0x336   : > { %v2071_v32 = vsel %vm2070_vm0, %v2031_v22, -inf }
 0x337   : > { %v2072_v3 = vrot.slane %v2071_v32, 4 }
 0x339   : > { %v2073_v4 = vmax.f32 %v2071_v32, %v2072_v3 }
 0x33b   : > { %v2074_v62 = vrot.slane %v2073_v4, 2  ;;  %v2032_v2 = vpop.f32.mrf.mxu1 }
 0x33c   : > { %v2033_v60 = vadd.f32 %v4882_v8, %v2032_v2 }
 0x33d   : > { %v2075_v41 = vmax.f32 %v2073_v4, %v2074_v62 }
 0x33e   : > { %v2078_v33 = vsel %vm2070_vm0, %v2033_v60, -inf }
 0x33f   : > { %v2076_v38 = vrot.slane %v2075_v41, 1  ;;  %v2079_v6 = vrot.slane %v2078_v33, 4 }
 0x341   : > { %v2077_v12 = vmax.f32 %v2075_v41, %v2076_v38  ;;  %v2080_v7 = vmax.f32 %v2078_v33, %v2079_v6 }
 0x343   : > { %v2183_v35 = vsub.f32 %v2031_v22, %v2077_v12  ;;  %v2081_v58 = vrot.slane %v2080_v7, 2 }
 0x345   : > { %v2199_v21 = vmul.f32 1.442695, %v2183_v35  ;;  %v2082_v0 = vmax.f32 %v2080_v7, %v2081_v58  ;;  %v2035_v14 = vpop.f32.mrf.mxu1 }
 0x346   : > { %v2036_v45 = vadd.f32 %v4882_v8, %v2035_v14 }
 0x347   : > { %3646 = vpow2.f32 %v2199_v21  ;;  %v2083_v19 = vrot.slane %v2082_v0, 1 }
 0x348   : > { %v2085_v61 = vsel %vm2070_vm0, %v2036_v45, -inf }
 0x349   : > { %v2084_v17 = vmax.f32 %v2082_v0, %v2083_v19  ;;  %v2086_v52 = vrot.slane %v2085_v61, 4 }
 0x34b   : > { %v2184_v48 = vsub.f32 %v2033_v60, %v2084_v17  ;;  %v2087_v59 = vmax.f32 %v2085_v61, %v2086_v52 }
 0x34d   : > { %v4890_v23 = vpop.eup %3646  ;;  %v2201_v56 = vmul.f32 1.442695, %v2184_v48  ;;  %v2088_v24 = vrot.slane %v2087_v59, 2  ;;  %v2037_v18 = vpop.f32.mrf.mxu1 }
 0x34e   : > { %v2231_v36 = vsel %vm2070_vm0, %v4890_v23, 0.0  ;;  %v2038_v16 = vadd.f32 %v4882_v8, %v2037_v18 }
 0x34f   : > { %v2232_v57 = vrot.slane %v2231_v36, 4  ;;  %3648 = vpow2.f32 %v2201_v56  ;;  %v2089_v26 = vmax.f32 %v2087_v59, %v2088_v24 }
 0x350   : > { %v2092_v44 = vsel %vm2070_vm0, %v2038_v16, -inf }
 0x351   : > { %v2233_v10 = vadd.f32 %v2232_v57, %v2231_v36  ;;  %v2090_v37 = vrot.slane %v2089_v26, 1  ;;  %v2093_v34 = vrot.slane %v2092_v44, 4 }
 0x353   : > { %v2234_v30 = vrot.slane %v2233_v10, 2  ;;  %v2091_v5 = vmax.f32 %v2089_v26, %v2090_v37  ;;  %v2094_v40 = vmax.f32 %v2092_v44, %v2093_v34 }
 0x355   : > { %v4896_v39 = vpop.eup %3648  ;;  %v2235_v50 = vadd.f32 %v2234_v30, %v2233_v10  ;;  %v2185_v20 = vsub.f32 %v2036_v45, %v2091_v5  ;;  %v2095_v28 = vrot.slane %v2094_v40, 2 }
 0x356   : > { %v2238_v47 = vsel %vm2070_vm0, %v4896_v39, 0.0  ;;  %v2040_v15 = vpop.f32.mrf.mxu1 }
 0x357   : > { %v2236_v49 = vrot.slane %v2235_v50, 1  ;;  %v2239_v51 = vrot.slane %v2238_v47, 4  ;;  %v2041_v1 = vadd.f32 %v4882_v8, %v2040_v15  ;;  %v2203_v46 = vmul.f32 1.442695, %v2185_v20 }
 0x358   : > { %v2096_v63 = vmax.f32 %v2094_v40, %v2095_v28 }
 0x359   : > { %v4901_v55 = vadd.f32 %v2236_v49, %v2235_v50  ;;  %v2240_v53 = vadd.f32 %v2239_v51, %v2238_v47  ;;  %v2099_v25 = vsel %vm2070_vm0, %v2041_v1, -inf }
 0x35a   : > { %v2097_v9 = vrot.slane %v2096_v63, 1  ;;  %v2100_v42 = vrot.slane %v2099_v25, 4 }
 0x35b   : > { %3650 = vrcp.f32 %v4901_v55  ;;  %v2241_v43 = vrot.slane %v2240_v53, 2  ;;  %vm2348_vm13 = vweird.f32 %v4901_v55  ;;  %v2354_v56 = vand.u32 2147483648, %v4901_v55 }
 0x35c   : > { %3652 = vpow2.f32 %v2203_v46  ;;  %v2098_v54 = vmax.f32 %v2096_v63, %v2097_v9  ;;  %v2101_v31 = vmax.f32 %v2099_v25, %v2100_v42  ;;  %v2352_v18 = vand.u32 2147483647, %v4901_v55 }
 0x35d   : > { %v2242_v27 = vadd.f32 %v2241_v43, %v2240_v53  ;;  %v2355_v47 = vor.u32 1.1754944e-38, %v2354_v56 }
 0x35e   : > { %v2186_v11 = vsub.f32 %v2038_v16, %v2098_v54  ;;  %v2102_v29 = vrot.slane %v2101_v31, 2  ;;  %v2042_v22 = vpop.f32.mrf.mxu1  ;;  %vm2353_vm15 = vcmp.eq.f32.partialorder %v2352_v18, 8.507059e+37 }
 0x35f   : > { %v2243_v13 = vrot.slane %v2242_v27, 1  ;;  %v2043_v32 = vadd.f32 %v4882_v8, %v2042_v22 }
 0x360   : > { %v2205_v62 = vmul.f32 1.442695, %v2186_v11  ;;  %v2103_v2 = vmax.f32 %v2101_v31, %v2102_v29 }
 0x361   : > { %v3651_v3 = vpop.eup %3650  ;;  %v4906_v4 = vadd.f32 %v2243_v13, %v2242_v27  ;;  %v2106_v41 = vsel %vm2070_vm0, %v2043_v32, -inf }
 0x362   : > { %v4908_v60 = vpop.eup %3652  ;;  %v2344_v33 = vmul.f32 %v3651_v3, %v4901_v55  ;;  %v2104_v6 = vrot.slane %v2103_v2, 1  ;;  %v2107_v12 = vrot.slane %v2106_v41, 4  ;;  %vm2349_vm12 = vweird.f32 %v3651_v3 }
 0x363   : > { %3654 = vrcp.f32 %v4906_v4  ;;  %v2245_v38 = vsel %vm2070_vm0, %v4908_v60, 0.0  ;;  %vm4922_vm14 = vmor %vm2348_vm13, %vm2349_vm12  ;;  %v2367_v25 = vand.u32 2147483647, %v4906_v4  ;;  %v2369_v42 = vand.u32 2147483648, %v4906_v4 }
 0x364   : > { %v2246_v7 = vrot.slane %v2245_v38, 4  ;;  %3656 = vpow2.f32 %v2205_v62  ;;  %v2345_v35 = vsub.f32 1.0, %v2344_v33  ;;  %v2105_v58 = vmax.f32 %v2103_v2, %v2104_v6 }
 0x365   : > { %v2108_v21 = vmax.f32 %v2106_v41, %v2107_v12  ;;  %vm2363_vm2 = vweird.f32 %v4906_v4  ;;  %vm4959_vm3 = vcmp.eq.f32.partialorder %v2367_v25, 8.507059e+37 }
 0x366   : > { %v2247_v0 = vadd.f32 %v2246_v7, %v2245_v38  ;;  %v2346_v19 = vmul.f32 %v3651_v3, %v2345_v35  ;;  %v2187_v14 = vsub.f32 %v2041_v1, %v2105_v58  ;;  %v2045_v17 = vpop.f32.mrf.mxu1  ;;  %v2370_v35 = vor.u32 1.1754944e-38, %v2369_v42 }
 0x367   : > { %v2109_v45 = vrot.slane %v2108_v21, 2  ;;  %v4917_v48 = vadd.f32 %v4882_v8, %v2045_v17 }
 0x368   : > { %v2248_v61 = vrot.slane %v2247_v0, 2  ;;  %v2347_v52 = vadd.f32 %v3651_v3, %v2346_v19  ;;  %v2207_v36 = vmul.f32 1.442695, %v2187_v14 }
 0x369   : > { %v4920_v59 = vpop.eup %3654  ;;  %v2110_v57 = vmax.f32 %v2108_v21, %v2109_v45  ;;  %v2113_v26 = vsel %vm2070_vm0, %v4917_v48, -inf }
 0x36a   : > { %v4927_v16 = vpop.eup %3656  ;;  %v2249_v10 = vadd.f32 %v2248_v61, %v2247_v0  ;;  %v2351_v44 = vsel %vm4922_vm14, %v3651_v3, %v2347_v52  ;;  %v2359_v30 = vmul.f32 %v4920_v59, %v4906_v4  ;;  %3658 = vpow2.f32 %v2207_v36 }
 0x36b   : > { %v2252_v37 = vsel %vm2070_vm0, %v4927_v16, 0.0  ;;  %v2111_v34 = vrot.slane %v2110_v57, 1  ;;  %v2114_v50 = vrot.slane %v2113_v26, 4  ;;  %v2356_v1 = vsel %vm2353_vm15, %v2355_v47, %v2351_v44 }
 0x36c   : > { %v2250_v5 = vrot.slane %v2249_v10, 1  ;;  %v2253_v40 = vrot.slane %v2252_v37, 4  ;;  %v2360_v49 = vsub.f32 1.0, %v2359_v30  ;;  %v4949_v13 = vmul.f32 %v4890_v23, %v2356_v1 }
 0x36d   : > { %v2112_v51 = vmax.f32 %v2110_v57, %v2111_v34  ;;  %v2115_v20 = vmax.f32 %v2113_v26, %v2114_v50  ;;  %vm2364_vm1 = vweird.f32 %v4920_v59 }
 0x36e   : > { %v4937_v28 = vadd.f32 %v2250_v5, %v2249_v10  ;;  %v2254_v15 = vadd.f32 %v2253_v40, %v2252_v37  ;;  %v2361_v55 = vmul.f32 %v4920_v59, %v2360_v49  ;;  %v2047_v63 = vpop.f32.mrf.mxu1  ;;  %vm4965_vm4 = vmor %vm2363_vm2, %vm2364_vm1  ;;  %v2583_v4 = vpack.c.bf16 %v4949_v13, %v4949_v13 }
 0x36f   : > { %v2188_v53 = vsub.f32 %v2043_v32, %v2112_v51  ;;  %v2116_v46 = vrot.slane %v2115_v20, 2  ;;  %v4943_v9 = vadd.f32 %v4882_v8, %v2047_v63 }
 0x370   : > { %3660 = vrcp.f32 %v4937_v28  ;;  %v2255_v43 = vrot.slane %v2254_v15, 2  ;;  %v4946_v27 = vpop.eup %3658  ;;  %v2362_v32 = vadd.f32 %v4920_v59, %v2361_v55  ;;  %v2382_v33 = vand.u32 2147483647, %v4937_v28 }
 0x371   : > { %v2209_v54 = vmul.f32 1.442695, %v2188_v53  ;;  %v2117_v31 = vmax.f32 %v2115_v20, %v2116_v46  ;;  %v2259_v29 = vsel %vm2070_vm0, %v4946_v27, 0.0  ;;  %v2120_v22 = vsel %vm2070_vm0, %v4943_v9, -inf }
 0x372   : > { %v2256_v11 = vadd.f32 %v2255_v43, %v2254_v15  ;;  %v2260_v3 = vrot.slane %v2259_v29, 4  ;;  %v2121_v2 = vrot.slane %v2120_v22, 4  ;;  %v2384_v0 = vand.u32 2147483648, %v4937_v28 }
 0x373   : > { %3662 = vpow2.f32 %v2209_v54  ;;  %v2118_v62 = vrot.slane %v2117_v31, 1  ;;  %v2366_v19 = vsel %vm4965_vm4, %v4920_v59, %v2362_v32  ;;  %vm2378_vm5 = vweird.f32 %v4937_v28 }
 0x374   : > { %v2257_v41 = vrot.slane %v2256_v11, 1  ;;  %v2261_v38 = vadd.f32 %v2260_v3, %v2259_v29  ;;  %v2122_v12 = vmax.f32 %v2120_v22, %v2121_v2  ;;  %vm4984_vm6 = vcmp.eq.f32.partialorder %v2382_v33, 8.507059e+37 }
 0x375   : > { %v2119_v6 = vmax.f32 %v2117_v31, %v2118_v62  ;;  %v2385_v44 = vor.u32 1.1754944e-38, %v2384_v0  ;;  %v2371_v30 = vsel %vm4959_vm3, %v2370_v35, %v2366_v19 }
 0x376   : > { %v3661_v58 = vpop.eup %3660  ;;  %v4969_v21 = vadd.f32 %v2257_v41, %v2256_v11  ;;  %v2262_v14 = vrot.slane %v2261_v38, 2  ;;  %v2123_v17 = vrot.slane %v2122_v12, 2  ;;  %v2050_v61 = vpop.f32.mrf.mxu1  ;;  %v5000_v15 = vmul.f32 %v4896_v39, %v2371_v30 }
 0x377   : > { %v2189_v45 = vsub.f32 %v4917_v48, %v2119_v6  ;;  %v2374_v52 = vmul.f32 %v3661_v58, %v4937_v28  ;;  %v4981_v56 = vadd.f32 %v4882_v8, %v2050_v61  ;;  %vm2379_vm7 = vweird.f32 %v3661_v58 }
 0x378   : > { %3664 = vrcp.f32 %v4969_v21  ;;  %v2263_v59 = vadd.f32 %v2262_v14, %v2261_v38  ;;  %v2124_v48 = vmax.f32 %v2122_v12, %v2123_v17  ;;  %v2397_v47 = vand.u32 2147483647, %v4969_v21  ;;  %vm2380_vm9 = vmor %vm2378_vm5, %vm2379_vm7 }
 0x379   : > { %v4988_v57 = vpop.eup %3662  ;;  %v2211_v24 = vmul.f32 1.442695, %v2189_v45  ;;  %v2375_v18 = vsub.f32 1.0, %v2374_v52  ;;  %v2127_v26 = vsel %vm2070_vm0, %v4981_v56, -inf  ;;  %vm2393_vm8 = vweird.f32 %v4969_v21 }
 0x37a   : > { %v2266_v10 = vsel %vm2070_vm0, %v4988_v57, 0.0  ;;  %v2264_v37 = vrot.slane %v2263_v59, 1  ;;  %v2125_v50 = vrot.slane %v2124_v48, 1  ;;  %v2128_v5 = vrot.slane %v2127_v26, 4 }
 0x37b   : > { %v2267_v34 = vrot.slane %v2266_v10, 4  ;;  %3666 = vpow2.f32 %v2211_v24  ;;  %v2376_v40 = vmul.f32 %v3661_v58, %v2375_v18  ;;  %v2399_v46 = vand.u32 2147483648, %v4969_v21 }
 0x37c   : > { %v4997_v49 = vadd.f32 %v2264_v37, %v2263_v59  ;;  %v2126_v20 = vmax.f32 %v2124_v48, %v2125_v50  ;;  %v2129_v55 = vmax.f32 %v2127_v26, %v2128_v5  ;;  %vm5013_vm10 = vcmp.eq.f32.partialorder %v2397_v47, 8.507059e+37 }
 0x37d   : > { %v2268_v51 = vadd.f32 %v2267_v34, %v2266_v10  ;;  %v2377_v53 = vadd.f32 %v3661_v58, %v2376_v40  ;;  %v2584_v14 = vpack.c.bf16 %v5000_v15, %v5000_v15  ;;  %v2400_v17 = vor.u32 1.1754944e-38, %v2399_v46 }
 0x37e   : > { %v3665_v1 = vpop.eup %3664  ;;  %3668 = vrcp.f32 %v4997_v49  ;;  %v2190_v25 = vsub.f32 %v4943_v9, %v2126_v20  ;;  %v2052_v43 = vpop.f32.mrf.mxu1  ;;  %v2130_v42 = vrot.slane %v2129_v55, 2  ;;  %v2412_v24 = vand.u32 2147483647, %v4997_v49 }
 0x37f   : > { %v2269_v63 = vrot.slane %v2268_v51, 2  ;;  %v2389_v39 = vmul.f32 %v3665_v1, %v4969_v21  ;;  %v5011_v54 = vadd.f32 %v4882_v8, %v2052_v43  ;;  %v2381_v31 = vsel %vm2380_vm9, %v3661_v58, %v2377_v53 }
 0x380   : > { %v2213_v9 = vmul.f32 1.442695, %v2190_v25  ;;  %v2386_v32 = vsel %vm4984_vm6, %v2385_v44, %v2381_v31  ;;  %v2131_v62 = vmax.f32 %v2129_v55, %v2130_v42  ;;  %vm2394_vm11 = vweird.f32 %v3665_v1 }
 0x381   : > { %v5017_v29 = vpop.eup %3666  ;;  %v2270_v22 = vadd.f32 %v2269_v63, %v2268_v51  ;;  %v2390_v28 = vsub.f32 1.0, %v2389_v39  ;;  %v2134_v2 = vsel %vm2070_vm0, %v5011_v54, -inf  ;;  %v2387_v41 = vmul.f32 %v4908_v60, %v2386_v32  ;;  %vm2395_vm12 = vmor %vm2393_vm8, %vm2394_vm11 }
 0x382   : > { %v2273_v3 = vsel %vm2070_vm0, %v5017_v29, 0.0  ;;  %3670 = vpow2.f32 %v2213_v9  ;;  %v2135_v38 = vrot.slane %v2134_v2, 4  ;;  %v2132_v6 = vrot.slane %v2131_v62, 1 }
 0x383   : > { %v2271_v33 = vrot.slane %v2270_v22, 1  ;;  %v2274_v23 = vrot.slane %v2273_v3, 4  ;;  %v2585_v12 = vpack.c.bf16 %v2387_v41, %v2387_v41  ;;  %v2391_v7 = vmul.f32 %v3665_v1, %v2390_v28 }
 0x384   : > { %v5026_v35 = vpop.eup %3668  ;;  %v2136_v19 = vmax.f32 %v2134_v2, %v2135_v38  ;;  %v2133_v45 = vmax.f32 %v2131_v62, %v2132_v6  ;;  %v2414_v15 = vand.u32 2147483648, %v4997_v49  ;;  %vm2408_vm14 = vweird.f32 %v4997_v49 }
 0x385   : > { %v5028_v58 = vadd.f32 %v2271_v33, %v2270_v22  ;;  %v2275_v0 = vadd.f32 %v2274_v23, %v2273_v3  ;;  %3490 = vxpose.binary.xlu1.c.b16.start.end [1/2] (short) (narrow) %v2585_v12, %v2583_v4, 16  ;;  %v2392_v60 = vadd.f32 %v3665_v1, %v2391_v7  ;;  %vm2409_vm13 = vweird.f32 %v5026_v35 }
 0x386   : > { %v2404_v61 = vmul.f32 %v5026_v35, %v4997_v49  ;;  %v2137_v36 = vrot.slane %v2136_v19, 2  ;;  %v2055_v59 = vpop.f32.mrf.mxu1  ;;  %v2191_v48 = vsub.f32 %v4981_v56, %v2133_v45  ;;  %vm2410_vm15 = vmor %vm2408_vm14, %vm2409_vm13  ;;  %vm2413_vm1 = vcmp.eq.f32.partialorder %v2412_v24, 8.507059e+37 }
 0x387   : > { %3672 = vrcp.f32 %v5028_v58  ;;  %v2276_v52 = vrot.slane %v2275_v0, 2  ;;  %v5044_v13 = vadd.f32 %v4882_v8, %v2055_v59  ;;  %v2396_v4 = vsel %vm2395_vm12, %v3665_v1, %v2392_v60 }
 0x388   : > { %v2405_v18 = vsub.f32 1.0, %v2404_v61  ;;  %v5046_v10 = vpop.eup %3670  ;;  %v2138_v44 = vmax.f32 %v2136_v19, %v2137_v36  ;;  %v2401_v30 = vsel %vm5013_vm10, %v2400_v17, %v2396_v4  ;;  %v2215_v37 = vmul.f32 1.442695, %v2191_v48 }
 0x389   : > { %v2277_v26 = vadd.f32 %v2276_v52, %v2275_v0  ;;  %v2280_v21 = vsel %vm2070_vm0, %v5046_v10, 0.0  ;;  %v2141_v56 = vsel %vm2070_vm0, %v5044_v13, -inf  ;;  %v2402_v34 = vmul.f32 %v4927_v16, %v2401_v30 }
 0x38a   : > { %v2281_v5 = vrot.slane %v2280_v21, 4  ;;  %v2139_v40 = vrot.slane %v2138_v44, 1  ;;  %v2142_v47 = vrot.slane %v2141_v56, 4  ;;  %3674 = vpow2.f32 %v2215_v37 }
 0x38b   : > { %v2278_v50 = vrot.slane %v2277_v26, 1  ;;  %v2586_v51 = vpack.c.bf16 %v2402_v34, %v2402_v34  ;;  %v2406_v20 = vmul.f32 %v5026_v35, %v2405_v18  ;;  %v2415_v22 = vor.u32 1.1754944e-38, %v2414_v15 }
 0x38c   : > { %v2282_v53 = vadd.f32 %v2281_v5, %v2280_v21  ;;  %v2140_v46 = vmax.f32 %v2138_v44, %v2139_v40  ;;  %v2143_v63 = vmax.f32 %v2141_v56, %v2142_v47  ;;  %vm2423_vm2 = vweird.f32 %v5028_v58 }
 0x38d   : > { %v5058_v1 = vpop.eup %3672  ;;  %v5060_v55 = vadd.f32 %v2278_v50, %v2277_v26  ;;  %3493 = vxpose.binary.xlu2.c.b16.start.end [1/2] (short) (narrow) %v2586_v51, %v2584_v14, 16  ;;  %v2407_v16 = vadd.f32 %v5026_v35, %v2406_v20  ;;  %v2427_v24 = vand.u32 2147483647, %v5028_v58  ;;  %v2429_v21 = vand.u32 2147483648, %v5028_v58 }
 0x38e   : > { %v2283_v25 = vrot.slane %v2282_v53, 2  ;;  %v2192_v43 = vsub.f32 %v5011_v54, %v2140_v46  ;;  %v2144_v39 = vrot.slane %v2143_v63, 2  ;;  %v2057_v42 = vpop.f32.mrf.mxu1  ;;  %v2419_v28 = vmul.f32 %v5058_v1, %v5028_v58 }
 0x38f   : > { %3676 = vrcp.f32 %v5060_v55  ;;  %v5069_v31 = vadd.f32 %v4882_v8, %v2057_v42  ;;  %v2411_v11 = vsel %vm2410_vm15, %v5026_v35, %v2407_v16  ;;  %v2442_v2 = vand.u32 2147483647, %v5060_v55 }
 0x390   : > { %v2284_v9 = vadd.f32 %v2283_v25, %v2282_v53  ;;  %v2217_v32 = vmul.f32 1.442695, %v2192_v43  ;;  %v2145_v49 = vmax.f32 %v2143_v63, %v2144_v39  ;;  %v5074_v3 = vpop.eup %3674  ;;  %v2416_v62 = vsel %vm2413_vm1, %v2415_v22, %v2411_v11 }
 0x391   : > { %v2148_v54 = vsel %vm2070_vm0, %v5069_v31, -inf  ;;  %v2444_v41 = vand.u32 2147483648, %v5060_v55  ;;  %v2287_v23 = vsel %vm2070_vm0, %v5074_v3, 0.0  ;;  %vm2424_vm3 = vweird.f32 %v5058_v1 }
 0x392   : > { %v2285_v33 = vrot.slane %v2284_v9, 1  ;;  %3678 = vpow2.f32 %v2217_v32  ;;  %v2146_v38 = vrot.slane %v2145_v49, 1  ;;  %v2288_v6 = vrot.slane %v2287_v23, 4  ;;  %vm5116_vm7 = vmor %vm2423_vm2, %vm2424_vm3 }
 0x393   : > { %v2149_v12 = vrot.slane %v2148_v54, 4  ;;  %v5087_v19 = vmul.f32 %v4946_v27, %v2416_v62  ;;  %vm2438_vm4 = vweird.f32 %v5060_v55  ;;  %v2420_v14 = vsub.f32 1.0, %v2419_v28 }
 0x394   : > { %v5084_v35 = vadd.f32 %v2285_v33, %v2284_v9  ;;  %v2147_v0 = vmax.f32 %v2145_v49, %v2146_v38  ;;  %v2289_v45 = vadd.f32 %v2288_v6, %v2287_v23  ;;  %v2445_v61 = vor.u32 1.1754944e-38, %v2444_v41 }
 0x395   : > { %v3677_v7 = vpop.eup %3676  ;;  %v2150_v60 = vmax.f32 %v2148_v54, %v2149_v12  ;;  %vm5093_vm5 = vcmp.eq.f32.partialorder %v2442_v2, 8.507059e+37  ;;  %v2421_v27 = vmul.f32 %v5058_v1, %v2420_v14  ;;  %v2587_v15 = vpack.c.bf16 %v5087_v19, %v5087_v19 }
 0x396   : > { %v2434_v17 = vmul.f32 %v3677_v7, %v5060_v55  ;;  %3680 = vrcp.f32 %v5084_v35  ;;  %v2193_v52 = vsub.f32 %v5044_v13, %v2147_v0  ;;  %v2060_v36 = vpop.f32.mrf.mxu1  ;;  %v2290_v48 = vrot.slane %v2289_v45, 2 }
 0x397   : > { %v2151_v4 = vrot.slane %v2150_v60, 2  ;;  %v5100_v18 = vadd.f32 %v4882_v8, %v2060_v36  ;;  %vm2439_vm6 = vweird.f32 %v3677_v7  ;;  %v2422_v13 = vadd.f32 %v5058_v1, %v2421_v27 }
 0x398   : > { %v2435_v26 = vsub.f32 1.0, %v2434_v17  ;;  %v5102_v44 = vpop.eup %3678  ;;  %v2219_v30 = vmul.f32 1.442695, %v2193_v52  ;;  %v2291_v37 = vadd.f32 %v2290_v48, %v2289_v45  ;;  %vm5120_vm8 = vcmp.eq.f32.partialorder %v2427_v24, 8.507059e+37  ;;  %vm2440_vm9 = vmor %vm2438_vm4, %vm2439_vm6 }
 0x399   : > { %v2294_v56 = vsel %vm2070_vm0, %v5102_v44, 0.0  ;;  %v2152_v34 = vmax.f32 %v2150_v60, %v2151_v4  ;;  %v2155_v50 = vsel %vm2070_vm0, %v5100_v18, -inf  ;;  %v2426_v39 = vsel %vm5116_vm7, %v5058_v1, %v2422_v13 }
 0x39a   : > { %v2295_v5 = vrot.slane %v2294_v56, 4  ;;  %3682 = vpow2.f32 %v2219_v30  ;;  %v2156_v40 = vrot.slane %v2155_v50, 4  ;;  %v2436_v47 = vmul.f32 %v3677_v7, %v2435_v26 }
 0x39b   : > { %v2292_v51 = vrot.slane %v2291_v37, 1  ;;  %v2153_v20 = vrot.slane %v2152_v34, 1  ;;  %v2430_v11 = vor.u32 1.1754944e-38, %v2429_v21  ;;  %v2457_v54 = vand.u32 2147483647, %v5084_v35 }
 0x39c   : > { %v5124_v63 = vpop.eup %3680  ;;  %v2296_v16 = vadd.f32 %v2295_v5, %v2294_v56  ;;  %v2157_v25 = vmax.f32 %v2155_v50, %v2156_v40  ;;  %v2437_v43 = vadd.f32 %v3677_v7, %v2436_v47  ;;  %vm2453_vm11 = vweird.f32 %v5084_v35 }
 0x39d   : > { %v5129_v42 = vadd.f32 %v2292_v51, %v2291_v37  ;;  %v2154_v58 = vmax.f32 %v2152_v34, %v2153_v20  ;;  %v2449_v22 = vmul.f32 %v5124_v63, %v5084_v35  ;;  %vm2454_vm10 = vweird.f32 %v5124_v63 }
 0x39e   : > { %v2297_v9 = vrot.slane %v2296_v16, 2  ;;  %v2158_v32 = vrot.slane %v2157_v25, 2  ;;  %v2062_v49 = vpop.f32.mrf.mxu1  ;;  %v2441_v28 = vsel %vm2440_vm9, %v3677_v7, %v2437_v43  ;;  %v2431_v7 = vsel %vm5120_vm8, %v2430_v11, %v2426_v39  ;;  %vm2455_vm12 = vmor %vm2453_vm11, %vm2454_vm10 }
 0x39f   : > { %3684 = vrcp.f32 %v5129_v42  ;;  %v2194_v1 = vsub.f32 %v5069_v31, %v2154_v58  ;;  %v5140_v62 = vadd.f32 %v4882_v8, %v2062_v49  ;;  %v2446_v55 = vsel %vm5093_vm5, %v2445_v61, %v2441_v28 }
 0x3a0   : > { %v5144_v2 = vpop.eup %3682  ;;  %v2298_v41 = vadd.f32 %v2297_v9, %v2296_v16  ;;  %v2159_v33 = vmax.f32 %v2157_v25, %v2158_v32  ;;  %v2447_v23 = vmul.f32 %v5017_v29, %v2446_v55  ;;  %v2450_v38 = vsub.f32 1.0, %v2449_v22 }
 0x3a1   : > { %v2301_v6 = vsel %vm2070_vm0, %v5144_v2, 0.0  ;;  %v2221_v12 = vmul.f32 1.442695, %v2194_v1  ;;  %v2162_v31 = vsel %vm2070_vm0, %v5140_v62, -inf  ;;  %v2432_v36 = vmul.f32 %v4988_v57, %v2431_v7 }
 0x3a2   : > { %v2299_v0 = vrot.slane %v2298_v41, 1  ;;  %v2302_v19 = vrot.slane %v2301_v6, 4  ;;  %v2160_v14 = vrot.slane %v2159_v33, 1  ;;  %v2163_v45 = vrot.slane %v2162_v31, 4 }
 0x3a3   : > { %3686 = vpow2.f32 %v2221_v12  ;;  %v2589_v60 = vpack.c.bf16 %v2447_v23, %v2447_v23  ;;  %v2451_v17 = vmul.f32 %v5124_v63, %v2450_v38  ;;  %v2459_v48 = vand.u32 2147483648, %v5084_v35 }
 0x3a4   : > { %v2303_v29 = vadd.f32 %v2302_v19, %v2301_v6  ;;  %v2161_v61 = vmax.f32 %v2159_v33, %v2160_v14  ;;  %v2164_v52 = vmax.f32 %v2162_v31, %v2163_v45  ;;  %v5158_v27 = vadd.f32 %v2299_v0, %v2298_v41 }
 0x3a5   : > { %v5156_v59 = vpop.eup %3684  ;;  %3496 = vxpose.binary.xlu0.c.b16.start.end [1/2] (short) (narrow) %v2589_v60, %v2587_v15, 16  ;;  %v2452_v24 = vadd.f32 %v5124_v63, %v2451_v17  ;;  %vm2458_vm13 = vcmp.eq.f32.partialorder %v2457_v54, 8.507059e+37  ;;  %v2460_v37 = vor.u32 1.1754944e-38, %v2459_v48  ;;  %v2588_v5 = vpack.c.bf16 %v2432_v36, %v2432_v36 }
 0x3a6   : > { %v2304_v4 = vrot.slane %v2303_v29, 2  ;;  %v2195_v26 = vsub.f32 %v5100_v18, %v2161_v61  ;;  %v2165_v30 = vrot.slane %v2164_v52, 2  ;;  %v2065_v13 = vpop.f32.mrf.mxu1  ;;  %v2464_v56 = vmul.f32 %v5156_v59, %v5129_v42 }
 0x3a7   : > { %v5167_v57 = vadd.f32 %v4882_v8, %v2065_v13  ;;  %v2456_v21 = vsel %vm2455_vm12, %v5124_v63, %v2452_v24  ;;  %3688 = vrcp.f32 %v5158_v27  ;;  %vm2469_vm14 = vweird.f32 %v5156_v59 }
 0x3a8   : > { %v2305_v34 = vadd.f32 %v2304_v4, %v2303_v29  ;;  %v2223_v35 = vmul.f32 1.442695, %v2195_v26  ;;  %v2166_v50 = vmax.f32 %v2164_v52, %v2165_v30  ;;  %v2461_v47 = vsel %vm2458_vm13, %v2460_v37, %v2456_v21 }
 0x3a9   : > { %v5172_v18 = vpop.eup %3686  ;;  %v2169_v40 = vsel %vm2070_vm0, %v5167_v57, -inf  ;;  %v2465_v51 = vsub.f32 1.0, %v2464_v56  ;;  %v2462_v16 = vmul.f32 %v5046_v10, %v2461_v47  ;;  %v2474_v58 = vand.u32 2147483648, %v5129_v42 }
 0x3aa   : > { %v2306_v20 = vrot.slane %v2305_v34, 1  ;;  %v2308_v15 = vsel %vm2070_vm0, %v5172_v18, 0.0  ;;  %3690 = vpow2.f32 %v2223_v35  ;;  %v2167_v53 = vrot.slane %v2166_v50, 1 }
 0x3ab   : > { %v2309_v46 = vrot.slane %v2308_v15, 4  ;;  %v2170_v63 = vrot.slane %v2169_v40, 4  ;;  %v2466_v25 = vmul.f32 %v5156_v59, %v2465_v51  ;;  %v2590_v9 = vpack.c.bf16 %v2462_v16, %v2462_v16 }
 0x3ac   : > { %v5181_v43 = vadd.f32 %v2306_v20, %v2305_v34  ;;  %v2168_v39 = vmax.f32 %v2166_v50, %v2167_v53  ;;  %vm2468_vm15 = vweird.f32 %v5129_v42  ;;  %v2472_v10 = vand.u32 2147483647, %v5129_v42 }
 0x3ad   : > { %v2310_v11 = vadd.f32 %v2309_v46, %v2308_v15  ;;  %v2171_v22 = vmax.f32 %v2169_v40, %v2170_v63  ;;  %v2467_v32 = vadd.f32 %v5156_v59, %v2466_v25  ;;  %v5190_v54 = vpop.eup %3688  ;;  %3499 = vxpose.binary.xlu2.c.b16.start.end [1/2] (short) (narrow) %v2590_v9, %v2588_v5, 16  ;;  %vm5197_vm1 = vmor %vm2468_vm15, %vm2469_vm14  ;;  %v2475_v38 = vor.u32 1.1754944e-38, %v2474_v58 }
 0x3ae   : > { %3692 = vrcp.f32 %v5181_v43  ;;  %v2196_v49 = vsub.f32 %v5140_v62, %v2168_v39  ;;  %v2067_v28 = vpop.f32.mrf.mxu1  ;;  %vm2473_vm2 = vcmp.eq.f32.partialorder %v2472_v10, 8.507059e+37  ;;  %v2504_v61 = vand.u32 2147483648, %v5181_v43 }
 0x3af   : > { %v2311_v1 = vrot.slane %v2310_v11, 2  ;;  %v2172_v55 = vrot.slane %v2171_v22, 2  ;;  %v5193_v41 = vadd.f32 %v4882_v8, %v2067_v28  ;;  %v2471_v42 = vsel %vm5197_vm1, %v5156_v59, %v2467_v32 }
 0x3b0   : > { %v5201_v62 = vpop.eup %3690  ;;  %v2225_v23 = vmul.f32 1.442695, %v2196_v49  ;;  %v2476_v45 = vsel %vm2473_vm2, %v2475_v38, %v2471_v42  ;;  %v2479_v52 = vmul.f32 %v5190_v54, %v5158_v27  ;;  %vm2498_vm3 = vweird.f32 %v5181_v43 }
 0x3b1   : > { %v2312_v6 = vadd.f32 %v2311_v1, %v2310_v11  ;;  %v2315_v12 = vsel %vm2070_vm0, %v5201_v62, 0.0  ;;  %v2173_v8 = vmax.f32 %v2171_v22, %v2172_v55  ;;  %v2176_v31 = vsel %vm2070_vm0, %v5193_v41, -inf }
 0x3b2   : > { %v2316_v7 = vrot.slane %v2315_v12, 4  ;;  %3694 = vpow2.f32 %v2225_v23  ;;  %v2177_v0 = vrot.slane %v2176_v31, 4  ;;  %v2502_v26 = vand.u32 2147483647, %v5181_v43 }
 0x3b3   : > { %v2313_v19 = vrot.slane %v2312_v6, 1  ;;  %v2174_v14 = vrot.slane %v2173_v8, 1  ;;  %v2480_v30 = vsub.f32 1.0, %v2479_v52  ;;  %v2477_v21 = vmul.f32 %v5074_v3, %v2476_v45 }
 0x3b4   : > { %v3693_v60 = vpop.eup %3692  ;;  %v2317_v17 = vadd.f32 %v2316_v7, %v2315_v12  ;;  %v2178_v29 = vmax.f32 %v2176_v31, %v2177_v0  ;;  %v2505_v50 = vor.u32 1.1754944e-38, %v2504_v61  ;;  %vm2484_vm5 = vweird.f32 %v5190_v54 }
 0x3b5   : > { %v5213_v36 = vadd.f32 %v2313_v19, %v2312_v6  ;;  %v2175_v59 = vmax.f32 %v2173_v8, %v2174_v14  ;;  %v2494_v24 = vmul.f32 %v3693_v60, %v5181_v43  ;;  %v2481_v5 = vmul.f32 %v5190_v54, %v2480_v30 }
 0x3b6   : > { %v2318_v48 = vrot.slane %v2317_v17, 2  ;;  %v2179_v4 = vrot.slane %v2178_v29, 2  ;;  %vm2499_vm4 = vweird.f32 %v3693_v60  ;;  %v2489_v46 = vand.u32 2147483648, %v5158_v27 }
 0x3b7   : > { %3696 = vrcp.f32 %v5213_v36  ;;  %v2197_v13 = vsub.f32 %v5167_v57, %v2175_v59  ;;  %v2495_v37 = vsub.f32 1.0, %v2494_v24  ;;  %v2487_v57 = vand.u32 2147483647, %v5158_v27  ;;  %vm2500_vm6 = vmor %vm2498_vm3, %vm2499_vm4 }
 0x3b8   : > { %v5221_v56 = vpop.eup %3694  ;;  %v2319_v34 = vadd.f32 %v2318_v48, %v2317_v17  ;;  %v2180_v35 = vmax.f32 %v2178_v29, %v2179_v4  ;;  %v2482_v39 = vadd.f32 %v5190_v54, %v2481_v5  ;;  %vm2503_vm7 = vcmp.eq.f32.partialorder %v2502_v26, 8.507059e+37 }
 0x3b9   : > { %v2322_v40 = vsel %vm2070_vm0, %v5221_v56, 0.0  ;;  %v2227_v47 = vmul.f32 1.442695, %v2197_v13  ;;  %v2496_v51 = vmul.f32 %v3693_v60, %v2495_v37  ;;  %v2591_v22 = vpack.c.bf16 %v2477_v21, %v2477_v21 }
 0x3ba   : > { %v2320_v20 = vrot.slane %v2319_v34, 1  ;;  %v2323_v15 = vrot.slane %v2322_v40, 4  ;;  %v2181_v53 = vrot.slane %v2180_v35, 1  ;;  %vm2483_vm8 = vweird.f32 %v5158_v27 }
 0x3bb   : > { %3698 = vpow2.f32 %v2227_v47  ;;  %v2497_v3 = vadd.f32 %v3693_v60, %v2496_v51  ;;  %vm5240_vm9 = vmor %vm2483_vm8, %vm2484_vm5  ;;  %vm5244_vm10 = vcmp.eq.f32.partialorder %v2487_v57, 8.507059e+37  ;;  %v2490_v33 = vor.u32 1.1754944e-38, %v2489_v46 }
 0x3bc   : > { %v5229_v63 = vadd.f32 %v2320_v20, %v2319_v34  ;;  %v2324_v16 = vadd.f32 %v2323_v15, %v2322_v40  ;;  %v2182_v25 = vmax.f32 %v2180_v35, %v2181_v53  ;;  %v2486_v27 = vsel %vm5240_vm9, %v5190_v54, %v2482_v39  ;;  %v435_v35 = vld [vmem:[%s3961_s26 + $0xc] sm:$0xf]  ;;  %v436_v20 = vld [vmem:[%s3961_s26 + $0x10] sm:$0xf] }
 0x3bd   : > { %v3697_v58 = vpop.eup %3696  ;;  %v2501_v11 = vsel %vm2500_vm6, %v3693_v60, %v2497_v3  ;;  %v2517_v6 = vand.u32 2147483647, %v5213_v36  ;;  %vm2619_vm11 = vcmask 1043456   ;;  %v2519_v31 = vand.u32 2147483648, %v5213_v36 }
 0x3be   : > { %v2325_v9 = vrot.slane %v2324_v16, 2  ;;  %v2198_v32 = vsub.f32 %v5193_v41, %v2182_v25  ;;  %v2506_v49 = vsel %vm2503_vm7, %v2505_v50, %v2501_v11  ;;  %3700 = vrcp.f32 %v5229_v63 }
 0x3bf   : > { %v2507_v28 = vmul.f32 %v5144_v2, %v2506_v49  ;;  %v2509_v1 = vmul.f32 %v3697_v58, %v5213_v36  ;;  %v432_v2 = vld [vmem:[%s3961_s26] sm:$0xf]  ;;  %vm2514_vm12 = vweird.f32 %v3697_v58  ;;  %v2491_v14 = vsel %vm5244_vm10, %v2490_v33, %v2486_v27 }
 0x3c0   : > { %v2326_v55 = vadd.f32 %v2325_v9, %v2324_v16  ;;  %v2229_v41 = vmul.f32 1.442695, %v2198_v32  ;;  %v2621_v54 = vsel %vm2619_vm11, %v432_v2, 0  ;;  %vm2513_vm13 = vweird.f32 %v5213_v36 }
 0x3c1   : > { %v5253_v23 = vpop.eup %3698  ;;  %v2593_v42 = vpack.c.bf16 %v2507_v28, %v2507_v28  ;;  %v2510_v38 = vsub.f32 1.0, %v2509_v1  ;;  %2630 = vmatpush.bf16.msrb.mxu3 %v2621_v54  ;;  %vm2515_vm14 = vmor %vm2513_vm13, %vm2514_vm12  ;;  %v2520_v29 = vor.u32 1.1754944e-38, %v2519_v31  ;;  %v2492_v52 = vmul.f32 %v5102_v44, %v2491_v14  ;;  %v433_v44 = vld [vmem:[%s3961_s26 + $0x4] sm:$0xf] }
 0x3c2   : > { %v2327_v12 = vrot.slane %v2326_v55, 1  ;;  %v2329_v8 = vsel %vm2070_vm0, %v5253_v23, 0.0  ;;  %3702 = vpow2.f32 %v2229_v41  ;;  %vm2518_vm15 = vcmp.eq.f32.partialorder %v2517_v6, 8.507059e+37 }
 0x3c3   : > { %v2330_v7 = vrot.slane %v2329_v8, 4  ;;  %3502 = vxpose.binary.xlu0.c.b16.start.end [1/2] (short) (narrow) %v2593_v42, %v2591_v22, 16  ;;  %v2511_v0 = vmul.f32 %v3697_v58, %v2510_v38  ;;  %v2592_v37 = vpack.c.bf16 %v2492_v52, %v2492_v52  ;;  %v2656_v47 = vsel %vm2619_vm11, %v433_v44, 0  ;;  %v437_v44 = vld [vmem:[%s3961_s26 + $0x14] sm:$0xf] }
 0x3c4   : > { %v5260_v19 = vadd.f32 %v2327_v12, %v2326_v55  ;;  %v5264_v45 = vpop.eup %3700  ;;  %v2726_v51 = vsel %vm2619_vm11, %v435_v35, 0  ;;  %2665 = vmatpush.bf16.msra.mxu1 %v2656_v47  ;;  %v2534_v22 = vand.u32 2147483648, %v5229_v63  ;;  %vm2528_vm1 = vweird.f32 %v5229_v63  ;;  %v439_v35 = vld [vmem:[%s3961_s26 + $0x1c] sm:$0xf]  ;;  %v440_v47 = vld [vmem:[%s3961_s26 + $0x20] sm:$0xf] }
 0x3c5   : > { %v2331_v60 = vadd.f32 %v2330_v7, %v2329_v8  ;;  %v2512_v17 = vadd.f32 %v3697_v58, %v2511_v0  ;;  %v2524_v4 = vmul.f32 %v5264_v45, %v5229_v63  ;;  %2735 = vmatpush.bf16.msrb.mxu0 %v2726_v51  ;;  %v2532_v9 = vand.u32 2147483647, %v5229_v63 }
 0x3c6   : > { %3704 = vrcp.f32 %v5260_v19  ;;  %v2535_v10 = vor.u32 1.1754944e-38, %v2534_v22  ;;  %v2549_v42 = vand.u32 2147483648, %v5260_v19  ;;  %vm2543_vm8 = vweird.f32 %v5260_v19 }
 0x3c7   : > { %v2332_v61 = vrot.slane %v2331_v60, 2  ;;  %v2516_v59 = vsel %vm2515_vm14, %v3697_v58, %v2512_v17  ;;  %v2525_v40 = vsub.f32 1.0, %v2524_v4  ;;  %vm2533_vm3 = vcmp.eq.f32.partialorder %v2532_v9, 8.507059e+37 }
 0x3c8   : > { %v5269_v24 = vpop.eup %3702  ;;  %v2521_v48 = vsel %vm2518_vm15, %v2520_v29, %v2516_v59  ;;  %v2547_v6 = vand.u32 2147483647, %v5260_v19  ;;  %v2901_v51 = vsel %vm2619_vm11, %v440_v47, 0 }
 0x3c9   : > { %v2333_v26 = vadd.f32 %v2332_v61, %v2331_v60  ;;  %v2336_v36 = vsel %vm2070_vm0, %v5269_v24, 0.0  ;;  %v2522_v30 = vmul.f32 %v5172_v18, %v2521_v48  ;;  %v2761_v18 = vsel %vm2619_vm11, %v436_v20, 0 }
 0x3ca   : > { %v2337_v13 = vrot.slane %v2336_v36, 4  ;;  %2770 = vmatpush.bf16.msrb.mxu2 %v2761_v18  ;;  %v2526_v46 = vmul.f32 %v5264_v45, %v2525_v40  ;;  %vm2529_vm0 = vweird.f32 %v5264_v45  ;;  %vm2548_vm12 = vcmp.eq.f32.partialorder %v2547_v6, 8.507059e+37  ;;  %v441_v18 = vld [vmem:[%s3961_s26 + $0x24] sm:$0xf] }
 0x3cb   : > { %v2334_v21 = vrot.slane %v2333_v26, 1  ;;  %v2594_v34 = vpack.c.bf16 %v2522_v30, %v2522_v30  ;;  %vm2530_vm2 = vmor %vm2528_vm1, %vm2529_vm0  ;;  %vm2615_vm1 = vcmask 64512  }
 0x3cc   : > { %v5278_v50 = vpop.eup %3704  ;;  %v2338_v5 = vadd.f32 %v2337_v13, %v2336_v36  ;;  %v2527_v58 = vadd.f32 %v5264_v45, %v2526_v46  ;;  %v434_v13 = vld [vmem:[%s3961_s26 + $0x8] sm:$0xf] }
 0x3cd   : > { %v2335_v15 = vadd.f32 %v2334_v21, %v2333_v26  ;;  %3505 = vxpose.binary.xlu2.c.b16.start.end [1/2] (short) (narrow) %v2594_v34, %v2592_v37, 16  ;;  %v2539_v3 = vmul.f32 %v5278_v50, %v5260_v19  ;;  %vm2544_vm5 = vweird.f32 %v5278_v50  ;;  %v2691_v21 = vsel %vm2619_vm11, %v434_v13, 0  ;;  %v438_v34 = vld [vmem:[%s3961_s26 + $0x18] sm:$0xf] }
 0x3ce   : > { %v2339_v53 = vrot.slane %v2338_v5, 2  ;;  %v2531_v28 = vsel %vm2530_vm2, %v5264_v45, %v2527_v58  ;;  %vm2545_vm10 = vmor %vm2543_vm8, %vm2544_vm5  ;;  %v2550_v45 = vor.u32 1.1754944e-38, %v2549_v42  ;;  %2700 = vmatpush.bf16.msra.mxu3 %v2691_v21  ;;  %2910 = vmatpush.bf16.msra.mxu2 %v2901_v51  ;;  %v444_v58 = vld [vmem:[%s3961_s26 + $0x30] sm:$0xf] }
 0x3cf   : > { %3706 = vrcp.f32 %v2335_v15  ;;  %v2540_v25 = vsub.f32 1.0, %v2539_v3  ;;  %v2564_v1 = vand.u32 2147483648, %v2335_v15  ;;  %v2562_v41 = vand.u32 2147483647, %v2335_v15  ;;  %v443_v3 = vld [vmem:[%s3961_s26 + $0x2c] sm:$0xf] }
 0x3d0   : > { %v2340_v57 = vadd.f32 %v2339_v53, %v2338_v5  ;;  %v2536_v27 = vsel %vm2533_vm3, %v2535_v10, %v2531_v28  ;;  %vm2558_vm6 = vweird.f32 %v2335_v15  ;;  %v2866_v5 = vsel %vm2619_vm11, %v439_v35, 0  ;;  %v442_v53 = vld [vmem:[%s3961_s26 + $0x28] sm:$0xf]  ;;  %v447_v10 = vld [vmem:[%s3961_s26 + $0x3c] sm:$0xf] }
 0x3d1   : > { %v2541_v49 = vmul.f32 %v5278_v50, %v2540_v25  ;;  %v2565_v38 = vor.u32 1.1754944e-38, %v2564_v1  ;;  %v2537_v8 = vmul.f32 %v5201_v62, %v2536_v27  ;;  %vm2563_vm9 = vcmp.eq.f32.partialorder %v2562_v41, 8.507059e+37  ;;  %2875 = vmatpush.bf16.msra.mxu0 %v2866_v5 }
 0x3d2   : > { %v2341_v16 = vrot.slane %v2340_v57, 1  ;;  %v2971_v46 = vsel %vm2619_vm11, %v442_v53, 0  ;;  %v3006_v25 = vsel %vm2619_vm11, %v443_v3, 0  ;;  %v3041_v9 = vsel %vm2619_vm11, %v444_v58, 0 }
 0x3d3   : > { %v2542_v33 = vadd.f32 %v5278_v50, %v2541_v49  ;;  %v2595_v61 = vpack.c.bf16 %v2537_v8, %v2537_v8 }
 0x3d4   : > { %v2342_v39 = vadd.f32 %v2341_v16, %v2340_v57  ;;  %v2936_v16 = vsel %vm2619_vm11, %v441_v18, 0 }
 0x3d5   : > { %v3707_v11 = vpop.eup %3706  ;;  %v2546_v0 = vsel %vm2545_vm10, %v5278_v50, %v2542_v33  ;;  %v2796_v50 = vsel %vm2619_vm11, %v437_v44, 0 }
 0x3d6   : > { %3708 = vrcp.f32 %v2342_v39  ;;  %v2554_v32 = vmul.f32 %v3707_v11, %v2335_v15  ;;  %vm2559_vm4 = vweird.f32 %v3707_v11  ;;  %v2579_v60 = vand.u32 2147483648, %v2342_v39  ;;  %2805 = vmatpush.bf16.msrb.mxu1 %v2796_v50 }
 0x3d7   : > { %vm2560_vm7 = vmor %vm2558_vm6, %vm2559_vm4  ;;  %v2577_v29 = vand.u32 2147483647, %v2342_v39  ;;  %v2551_v52 = vsel %vm2548_vm12, %v2550_v45, %v2546_v0  ;;  %vm2573_vm14 = vweird.f32 %v2342_v39 }
 0x3d8   : > { %v2555_v43 = vsub.f32 1.0, %v2554_v32  ;;  %v2580_v59 = vor.u32 1.1754944e-38, %v2579_v60  ;;  %v2552_v48 = vmul.f32 %v5221_v56, %v2551_v52 }
 0x3d9   : > { %vm2578_vm0 = vcmp.eq.f32.partialorder %v2577_v29, 8.507059e+37 }
 0x3da   : > { %v2556_v55 = vmul.f32 %v3707_v11, %v2555_v43  ;;  %v2596_v36 = vpack.c.bf16 %v2552_v48, %v2552_v48  ;;  %v445_v43 = vld [vmem:[%s3961_s26 + $0x34] sm:$0xf] }
 0x3db   : > { %v3076_v1 = vsel %vm2619_vm11, %v445_v43, 0 }
 0x3dc   : > { %v3709_v2 = vpop.eup %3708  ;;  %v2557_v63 = vadd.f32 %v3707_v11, %v2556_v55  ;;  %v3146_v55 = vsel %vm2619_vm11, %v447_v10, 0 }
 0x3dd   : > { %v2569_v12 = vmul.f32 %v3709_v2, %v2342_v39  ;;  %vm2574_vm13 = vweird.f32 %v3709_v2 }
 0x3de   : > { %v2561_v31 = vsel %vm2560_vm7, %v3707_v11, %v2557_v63  ;;  %vm2575_vm15 = vmor %vm2573_vm14, %vm2574_vm13  ;;  %v446_v11 = vld [vmem:[%s3961_s26 + $0x38] sm:$0xf]  ;;  %s3286_s26 = sshll.u32 %s3957_s24, 5 }
 0x3df   : > { %v2566_v7 = vsel %vm2563_vm9, %v2565_v38, %v2561_v31  ;;  %v2570_v54 = vsub.f32 1.0, %v2569_v12  ;;  %v3111_v32 = vsel %vm2619_vm11, %v446_v11, 0  ;;  %s5345_s14 = scalar_lea.vmem [#allocation5], %s3286_s26 }
 0x3e0   : > { %v2567_v14 = vmul.f32 %v5253_v23, %v2566_v7  ;;  %s3190_s17 = sshll.u32 %s5345_s14, 4  ;;  %s3191_s17 = int_to_ptr.vmem [resolvable:$true] %s3190_s17 }
 0x3e1   : > { %v2571_v17 = vmul.f32 %v3709_v2, %v2570_v54 }
 0x3e2   : > { %v2597_v19 = vpack.c.bf16 %v2567_v14, %v2567_v14 }
 0x3e3   : > { %v2572_v62 = vadd.f32 %v3709_v2, %v2571_v17 }
 0x3e4   : > { %3508 = vxpose.binary.xlu1.c.b16.start.end [1/2] (short) (narrow) %v2597_v19, %v2595_v61, 16 }
 0x3e5   : > { %v2576_v4 = vsel %vm2575_vm15, %v3709_v2, %v2572_v62 }
 0x3e6   : > { %v2581_v23 = vsel %vm2578_vm0, %v2580_v59, %v2576_v4 }
 0x3e7   : > { %v2582_v26 = vmul.f32 %v5269_v24, %v2581_v23  ;;  %v2831_v24 = vsel %vm2619_vm11, %v438_v34, 0 }
 0x3e9   : > { %v2598_v30 = vpack.c.bf16 %v2582_v26, %v2582_v26 }
 0x3eb   : > { %3511 = vxpose.binary.xlu0.c.b16.start.end [1/2] (short) (narrow) %v2598_v30, %v2596_v36, 16 }
 0x42e   : > { %v3494_v37 = vpop.trf.xlu2 }
 0x42f   : > { %3395 = vmatmul.msk.bf16.vlgmr.msra.gmra.mxu1 %vm2615_vm1, %v3494_v37 }
 0x430   : > { %2945 = vmatpush.bf16.msra.mxu1 %v2936_v16 }
 0x431   : > { %v3491_v56 = vpop.trf.xlu1 }
 0x432   : > { %3394 = vmatmul.msk.bf16.vlgmr.msrb.gmra.mxu3 %vm2615_vm1, %v3491_v56 }
 0x433   : > { %2840 = vmatpush.bf16.msrb.mxu3 %v2831_v24 }
 0x436   : > { %v3495_v40 = vpop.trf.xlu2 }
 0x437   : > { %3397 = vmatmul.msk.bf16.vlgmr.msrb.gmra.mxu0 %vm2615_vm1, %v3495_v40 }
 0x438   : > { %3015 = vmatpush.bf16.msrb.mxu0 %v3006_v25 }
 0x439   : > { %v3492_v20 = vpop.trf.xlu1 }
 0x442   : > { %3396 = vmatmul.msk.bf16.vlgmr.msra.gmra.mxu3 %vm2615_vm1, %v3492_v20 }
 0x443   : > { %2980 = vmatpush.bf16.msra.mxu3 %v2971_v46 }
 0x44e   : > { %v3500_v15 = vpop.trf.xlu2 }
 0x44f   : > { %3399 = vmatmul.msk.bf16.vlgmr.msrb.gmra.mxu1 %vm2615_vm1, %v3500_v15 }
 0x450   : > { %3085 = vmatpush.bf16.msrb.mxu1 %v3076_v1 }
 0x451   : > { %v3497_v57 = vpop.trf.xlu0 }
 0x452   : > { %3398 = vmatmul.msk.bf16.vlgmr.msrb.gmra.mxu2 %vm2615_vm1, %v3497_v57 }
 0x453   : > { %3050 = vmatpush.bf16.msrb.mxu2 %v3041_v9 }
 0x456   : > { %v3501_v39 = vpop.trf.xlu2 }
 0x457   : > { %3401 = vmatmul.msk.bf16.vlgmr.msra.gmra.mxu0 %vm2615_vm1, %v3501_v39 }
 0x458   : > { %3155 = vmatpush.bf16.msra.mxu0 %v3146_v55 }
 0x459   : > { %v3498_v22 = vpop.trf.xlu0 }
 0x45a   : > { %3400 = vmatmul.msk.bf16.vlgmr.msrb.gmra.mxu3 %vm2615_vm1, %v3498_v22 }
 0x45b   : > { %3120 = vmatpush.bf16.msrb.mxu3 %v3111_v32 }
 0x46e   : > { %v3506_v49 = vpop.trf.xlu2 }
 0x46f   : > { %v3503_v28 = vpop.trf.xlu0  ;;  %3403 = vmatmul.msk.bf16.vlgmr.msra.gmra.mxu1 %vm2615_vm1, %v3506_v49 }
 0x470   : > { %3402 = vmatmul.msk.bf16.vlgmr.msra.gmra.mxu2 %vm2615_vm1, %v3503_v28 }
 0x476   : > { %v3507_v41 = vpop.trf.xlu2 }
 0x477   : > { %v3504_v27 = vpop.trf.xlu0  ;;  %3405 = vmatmul.msk.bf16.vlgmr.msrb.gmra.mxu0 %vm2615_vm1, %v3507_v41 }
 0x478   : > { %3404 = vmatmul.msk.bf16.vlgmr.msra.gmra.mxu3 %vm2615_vm1, %v3504_v27 }
 0x490   : > { %v3509_v33 = vpop.trf.xlu1 }
 0x491   : > { %3406 = vmatmul.msk.bf16.vlgmr.msrb.gmra.mxu2 %vm2615_vm1, %v3509_v33 }
 0x497   : > { %v3512_v2 = vpop.trf.xlu0 }
 0x498   : > { %v3510_v63 = vpop.trf.xlu1  ;;  %3407 = vmatmul.msk.bf16.vlgmr.msrb.gmra.mxu1 %vm2615_vm1, %v3512_v2 }
 0x499   : > { %3408 = vmatmul.msk.bf16.vlgmr.msrb.gmra.mxu3 %vm2615_vm1, %v3510_v63 }
 0x49f   : > { %v3513_v42 = vpop.trf.xlu0 }
 0x4a0   : > { %3409 = vmatmul.msk.bf16.vlgmr.msra.gmra.mxu0 %vm2615_vm1, %v3513_v42 }
 0x4ac   : > { %v2667_v38 = vpop.f32.mrf.mxu1 }
 0x4ad   : > { %3162 = vst [vmem:[%s5345_s14 + $0x2] sm:$0x3] %v2667_v38 }
 0x4b4   : > { %v2669_v6 = vpop.f32.mrf.mxu1  ;;  %v2737_v12 = vpop.f32.mrf.mxu0 }
 0x4b5   : > { %v2632_v8 = vpop.f32.mrf.mxu3  ;;  %3164 = vst [vmem:[%s5345_s14 + $0x6] sm:$0x3] %v2737_v12 }
 0x4b6   : > { %3161 = vst [vmem:[%s5345_s14] sm:$0x3] %v2632_v8 }
 0x4bc   : > { %v2739_v31 = vpop.f32.mrf.mxu0 }
 0x4bd   : > { %v2634_v7 = vpop.f32.mrf.mxu3 }
 0x4c5   : > { %v2702_v0 = vpop.f32.mrf.mxu3 }
 0x4c6   : > { %3163 = vst [vmem:[%s5345_s14 + $0x4] sm:$0x3] %v2702_v0 }
 0x4cc   : > { %v2807_v14 = vpop.f32.mrf.mxu1 }
 0x4cd   : > { %v2704_v54 = vpop.f32.mrf.mxu3  ;;  %3166 = vst [vmem:[%s5345_s14 + $0xa] sm:$0x3] %v2807_v14 }
 0x4d4   : > { %v2809_v60 = vpop.f32.mrf.mxu1  ;;  %v2877_v17 = vpop.f32.mrf.mxu0 }
 0x4d5   : > { %v2772_v45 = vpop.f32.mrf.mxu2  ;;  %3168 = vst [vmem:[%s5345_s14 + $0xe] sm:$0x3] %v2877_v17 }
 0x4d6   : > { %3165 = vst [vmem:[%s5345_s14 + $0x8] sm:$0x3] %v2772_v45 }
 0x4dc   : > { %v2879_v19 = vpop.f32.mrf.mxu0 }
 0x4dd   : > { %v2774_v29 = vpop.f32.mrf.mxu2  ;;  %v2842_v61 = vpop.f32.mrf.mxu3 }
 0x4de   : > { %3167 = vst [vmem:[%s5345_s14 + $0xc] sm:$0x3] %v2842_v61 }
 0x4e5   : > { %v2844_v52 = vpop.f32.mrf.mxu3 }
 0x4ec   : > { %v2947_v62 = vpop.f32.mrf.mxu1 }
 0x4ed   : > { %3170 = vst [vmem:[%s5345_s14 + $0x12] sm:$0x3] %v2947_v62 }
 0x4f3   : > { %v2912_v59 = vpop.f32.mrf.mxu2 }
 0x4f4   : > { %3169 = vst [vmem:[%s5345_s14 + $0x10] sm:$0x3] %v2912_v59  ;;  %v2949_v48 = vpop.f32.mrf.mxu1  ;;  %v3017_v4 = vpop.f32.mrf.mxu0 }
 0x4f5   : > { %3172 = vst [vmem:[%s5345_s14 + $0x16] sm:$0x3] %v3017_v4 }
 0x4fb   : > { %v2914_v23 = vpop.f32.mrf.mxu2  ;;  %v2982_v26 = vpop.f32.mrf.mxu3 }
 0x4fc   : > { %3171 = vst [vmem:[%s5345_s14 + $0x14] sm:$0x3] %v2982_v26  ;;  %v3019_v36 = vpop.f32.mrf.mxu0 }
 0x503   : > { %v2984_v30 = vpop.f32.mrf.mxu3 }
 0x514   : > { %v3052_v13 = vpop.f32.mrf.mxu2 }
 0x515   : > { %3173 = vst [vmem:[%s5345_s14 + $0x18] sm:$0x3] %v3052_v13  ;;  %v3087_v21 = vpop.f32.mrf.mxu1 }
 0x516   : > { %3174 = vst [vmem:[%s5345_s14 + $0x1a] sm:$0x3] %v3087_v21 }
 0x51c   : > { %v3054_v37 = vpop.f32.mrf.mxu2  ;;  %v3122_v56 = vpop.f32.mrf.mxu3 }
 0x51d   : > { %3175 = vst [vmem:[%s5345_s14 + $0x1c] sm:$0x3] %v3122_v56  ;;  %v3089_v34 = vpop.f32.mrf.mxu1  ;;  %v3157_v44 = vpop.f32.mrf.mxu0 }
 0x51e   : > { %3176 = vst [vmem:[%s5345_s14 + $0x1e] sm:$0x3] %v3157_v44 }
 0x51f   : > { %3767 = shalt.err (!%p3764_p5)
}
 0x520   : > { %s3810_s24 = smov 32   ;;  %s3811_s14 = smov 2  }
 0x521   : > { %3441 = dma.vmem_to_hbm [thread:$0]  (%p3921_p10), %s3191_s17, 512, %s3193_s30, %s3178_s21, %s3810_s24, %s3810_s24, %s3811_s14  }
 0x524   : > { %v3124_v35 = vpop.f32.mrf.mxu3 }
 0x525   : > { %v3159_v24 = vpop.f32.mrf.mxu0 }
 0x526 PF: > { %s5469_s15 = sld [smem:[#allocation8_spill]]  ;;  %p3452_p7 = scmp.ge.s32.totalorder %s3806_s20, 2 }
 0x528   : > { %p3448_p8 = pnand %p3452_p7, %p3925_p11 }
 0x52a   : > { %p3449_p9 = pneg %p3448_p8 }
 0x52c   : > { %s3207_s12 = sand.u32 1, %s5469_s15  }
 0x52d   : > { %s3208_s16 = scalar_lea.sflag [#allocation4], %s3207_s12 }
 0x52e   : > { %3789 = dma.done.wait (%p3449_p9), %s3208_s16, 512  }
 0x52f   : > { %3791 = vsyncadd (%p3449_p9), %s3208_s16, 4294966784  ;;  %s5471_s20 = sld [smem:[#allocation10_spill]]  ;;  %s5474_s17 = smov %s3798_s18 }
 0x530   : > { %s5472_s19 = sld [smem:[#allocation9_spill]] }
 0x531   : > { %s5473_s23 = sld [smem:[#allocation11_spill]] }
 0x535   : > { %p24_p10 = scmp.ge.s32.totalorder %s5471_s20, 6  }
 0x536   : > { %s5475_s18 = smov %s5472_s19 }
 0x537   : > { %s5476_s19 = smov %s5473_s23  ;;  %26 = sbr.rel (!%p24_p10) target bundleno = 5 (0x5), region = 112 }
 0x53c   :  { %3214 = vsyncpa [#allocation3], 1 }
 0x53d   :  { %3216 = vsyncpa [#allocation3 + $0x1], 1 }
 0x53e   :  { %3217 = vsyncpa [#allocation4], 1 }
 0x53f   :  { %3219 = vsyncpa [#allocation4 + $0x1], 1 }

</bundles_post_ra>
